<compile_context>
chip_gen: v7x
topology: tpu7x:2x2x1
jax: 0.10.0
libtpu: 0.0.40
codegen_flags: <defaults>
</compile_context>

<pallas_src>
import functools

import jax
import jax.numpy as jnp
from jax.experimental import pallas as pl
from jax.experimental.pallas import tpu as pltpu

BN_EPS = 1e-5


def _pick_tn(cout):
    # 256-wide output tiles fill the 256x256 MXUs on v6e/v7x and halve grid
    # steps; 128 fallback (small channel counts / v5e's 128x128 MXUs).
    return 256 if cout % 256 == 0 else 128


def _vmem_limit_bytes(*block_nbytes):
    # Size scoped VMEM from the actual (double-buffered) tiles + headroom;
    # clamp to [32 MiB, 64 MiB] so it is valid on every generation (v7x has
    # 64 MiB physical per TC).
    need = 2 * sum(int(b) for b in block_nbytes) + (4 << 20)
    return int(min(max(need, 32 << 20), 64 << 20))


# ----------------------------------------------------------------------------
# Pallas kernel: fused 1x1 Conv (bf16 channel matmul, f32 accumulate) +
# BatchNorm (training-mode batch stats over the rows = B*H*W pixels) + ReLU.
# ----------------------------------------------------------------------------
def conv1x1_bn_relu_kernel(x_ref, w_ref, g_ref, beta_ref, o_ref):
    # x_ref: (M, Cin) bf16   w_ref: (Cin, tn) bf16
    # g_ref/beta_ref: (1, tn) f32   o_ref: (M, tn) bf16/f32
    z = jnp.dot(x_ref[...], w_ref[...], preferred_element_type=jnp.float32)
    # Training-mode BatchNorm2d: biased batch stats per output channel over all
    # pixels of this block (one modality), computed in f32.  The conv bias is
    # intentionally omitted: the mean subtraction cancels it exactly.
    mu = jnp.mean(z, axis=0, keepdims=True)
    var = jnp.mean((z - mu) * (z - mu), axis=0, keepdims=True)
    scale = g_ref[...] * jax.lax.rsqrt(var + BN_EPS)
    shift = beta_ref[...] - mu * scale
    o_ref[...] = jnp.maximum(z * scale + shift, 0.0).astype(o_ref.dtype)


# ----------------------------------------------------------------------------
# Stage wrappers.
# ----------------------------------------------------------------------------
def enc_conv_bn_relu(x_stack, w_stack, gamma, beta):
    """Per-modality encoder convs, all 4 in one pallas_call.

    x_stack: (4, M, Cin) bf16, w_stack: (4, Cin, Cout) bf16,
    gamma/beta: (4, 1, Cout) f32  ->  (4, M, Cout) bf16.
    """
    nm, M, Cin = x_stack.shape
    Cout = w_stack.shape[2]
    tn = _pick_tn(Cout)
    assert M % 8 == 0 and Cin % 128 == 0 and Cout % tn == 0

    blocks = (M * Cin * 2, Cin * tn * 2, tn * 4, tn * 4, M * tn * 2)
    return pl.pallas_call(
        conv1x1_bn_relu_kernel,
        out_shape=jax.ShapeDtypeStruct((nm, M, Cout), jnp.bfloat16),
        grid_spec=pltpu.PrefetchScalarGridSpec(
            num_scalar_prefetch=0,
            grid=(nm, Cout // tn),
            in_specs=[
                pl.BlockSpec((None, M, Cin), lambda m, j: (m, 0, 0)),
                pl.BlockSpec((None, Cin, tn), lambda m, j: (m, 0, j)),
                pl.BlockSpec((None, 1, tn), lambda m, j: (m, 0, j)),
                pl.BlockSpec((None, 1, tn), lambda m, j: (m, 0, j)),
            ],
            out_specs=pl.BlockSpec((None, M, tn), lambda m, j: (m, 0, j)),
        ),
        compiler_params=pltpu.CompilerParams(
            dimension_semantics=("parallel", "parallel"),
            vmem_limit_bytes=_vmem_limit_bytes(*blocks)),
    )(x_stack, w_stack, gamma, beta)


def dec_conv_bn_relu_to_slab(x_stack, w, gamma, beta):
    """Shared-weight decoder conv (the reference applies normal_decoder_conv to
    all four modalities).  Each (modality, channel-tile) grid step writes its
    result directly into its slot of the (M, 4*Cout) channel-concat slab, so no
    jnp.concatenate is needed.  BN stats stay per modality (one modality's rows
    per grid step).

    x_stack: (4, M, Cin) bf16, w: (Cin, Cout) bf16, gamma/beta: (1, Cout) f32
    ->  (M, 4*Cout) bf16 slab ordered [normal | surface | mucosal | tone].
    """
    nm, M, Cin = x_stack.shape
    Cout = w.shape[1]
    tn = _pick_tn(Cout)
    assert M % 8 == 0 and Cin % 128 == 0 and Cout % tn == 0
    n_j = Cout // tn

    blocks = (M * Cin * 2, Cin * tn * 2, tn * 4, tn * 4, M * tn * 2)
    return pl.pallas_call(
        conv1x1_bn_relu_kernel,
        out_shape=jax.ShapeDtypeStruct((M, nm * Cout), jnp.bfloat16),
        grid_spec=pltpu.PrefetchScalarGridSpec(
            num_scalar_prefetch=0,
            grid=(nm, n_j),
            in_specs=[
                pl.BlockSpec((None, M, Cin), lambda m, j: (m, 0, 0)),
                pl.BlockSpec((Cin, tn), lambda m, j: (0, j)),
                pl.BlockSpec((1, tn), lambda m, j: (0, j)),
                pl.BlockSpec((1, tn), lambda m, j: (0, j)),
            ],
            out_specs=pl.BlockSpec((M, tn), lambda m, j: (0, m * n_j + j)),
        ),
        compiler_params=pltpu.CompilerParams(
            dimension_semantics=("parallel", "parallel"),
            vmem_limit_bytes=_vmem_limit_bytes(*blocks)),
    )(x_stack, w, gamma, beta)


def mm_dec_conv_bn_relu(x_slab, w, gamma, beta, out_dtype=jnp.float32):
    """multimodal_transformer_decoder: Conv2d(4C->4C,1x1)+BN+ReLU on the slab.

    x_slab: (M, Cin) bf16, w: (Cin, Cout) bf16, gamma/beta: (1, Cout) f32.
    """
    M, Cin = x_slab.shape
    Cout = w.shape[1]
    tn = _pick_tn(Cout)
    assert M % 8 == 0 and Cin % 128 == 0 and Cout % tn == 0

    out_bytes = M * tn * jnp.dtype(out_dtype).itemsize
    blocks = (M * Cin * 2, Cin * tn * 2, tn * 4, tn * 4, out_bytes)
    return pl.pallas_call(
        conv1x1_bn_relu_kernel,
        out_shape=jax.ShapeDtypeStruct((M, Cout), out_dtype),
        grid_spec=pltpu.PrefetchScalarGridSpec(
            num_scalar_prefetch=0,
            grid=(Cout // tn,),
            in_specs=[
                pl.BlockSpec((M, Cin), lambda j: (0, 0)),
                pl.BlockSpec((Cin, tn), lambda j: (0, j)),
                pl.BlockSpec((1, tn), lambda j: (0, j)),
                pl.BlockSpec((1, tn), lambda j: (0, j)),
            ],
            out_specs=pl.BlockSpec((M, tn), lambda j: (0, j)),
        ),
        compiler_params=pltpu.CompilerParams(
            dimension_semantics=("parallel",),
            vmem_limit_bytes=_vmem_limit_bytes(*blocks)),
    )(x_slab, w, gamma, beta)


# ----------------------------------------------------------------------------
# Deterministic parameter construction (kaiming_normal_ conv weights stored in
# bf16 for the MXU, BN gamma=1 / beta=0 in f32), mirroring mmNet.__init__.
# Conv bias is omitted: training-mode BN cancels it exactly.
# ----------------------------------------------------------------------------
def make_conv_bn_params(key, cin, cout):
    std = (2.0 / cin) ** 0.5  # kaiming_normal_, fan_in, relu gain
    w = (std * jax.random.normal(key, (cin, cout), dtype=jnp.float32))
    return {
        "w": w.astype(jnp.bfloat16),
        "gamma": jnp.ones((1, cout), jnp.float32),
        "beta": jnp.zeros((1, cout), jnp.float32),
    }


def init_mmnet_params(key, c_enc, d_tok):
    ks = jax.random.split(key, 6)
    enc = [make_conv_bn_params(ks[i], c_enc, d_tok) for i in range(4)]
    return {
        # normal/surface/mucosal/tone encoder_conv: Conv2d(c_enc -> d_tok, 1x1)
        "enc_w": jnp.stack([p["w"] for p in enc], axis=0),          # (4,c_enc,d_tok)
        "enc_gamma": jnp.stack([p["gamma"] for p in enc], axis=0),  # (4,1,d_tok)
        "enc_beta": jnp.stack([p["beta"] for p in enc], axis=0),
        # normal_decoder_conv: Conv2d(d_tok -> c_enc, 1x1) -- reused for all 4
        "dec": make_conv_bn_params(ks[4], d_tok, c_enc),
        # multimodal_transformer_decoder: Conv2d(4*c_enc -> 4*c_enc, 1x1)
        "mm": make_conv_bn_params(ks[5], 4 * c_enc, 4 * c_enc),
    }


# ----------------------------------------------------------------------------
# mmNet forward (defined portion). Inputs are the stage-4 encoder features,
# one per modality, in NCHW.
# ----------------------------------------------------------------------------
def mmnet_forward(params, normal_x4, surface_x4, mucosal_x4, tone_x4):
    # TODO(synk): res2net50 encoders are undefined in the source; the x4
    # features are taken directly as inputs here.
    # TODO(synk): Decoder_sep is undefined in the source; the per-modality
    # sep/intra predictions of the training branch are not reproduced.
    B, C, H, W = normal_x4.shape
    M = B * H * W

    # Single NCHW -> (modality, M=B*H*W, C) layout transform at entry; all
    # subsequent stages stay in the pixel-row layout in bf16.
    x = jnp.stack([normal_x4, surface_x4, mucosal_x4, tone_x4], axis=0)
    x = jnp.transpose(x, (0, 1, 3, 4, 2)).reshape(4, M, C).astype(jnp.bfloat16)

    # *_encoder_conv: Conv2d(1024->512,1x1)+BN+ReLU, all 4 modalities fused.
    tokens = enc_conv_bn_relu(
        x, params["enc_w"], params["enc_gamma"], params["enc_beta"])

    # TODO(synk): Dynamic_mlp_sep transformers are undefined; passed through.
    intra_tokens = tokens

    # NOTE: the reference forward applies self.normal_decoder_conv to ALL four
    # modalities (surface/mucosal/tone decoder convs are never nn.Modules).
    # Each modality writes directly into its slot of the channel-concat slab,
    # so multimodal_token_x4 = cat(..., dim=channel) needs no extra copy.
    dp = params["dec"]
    multimodal_token_x4 = dec_conv_bn_relu_to_slab(
        intra_tokens, dp["w"], dp["gamma"], dp["beta"])        # (M, 4*C) bf16

    # TODO(synk): Dynamic_mlp_fuse is undefined in the source; passed through.
    multimodal_inter_token_x4 = multimodal_token_x4

    # multimodal_transformer_decoder: Conv2d(4C->4C,1x1)+BN+ReLU.
    mp = params["mm"]
    x4_inter = mm_dec_conv_bn_relu(
        multimodal_inter_token_x4, mp["w"], mp["gamma"], mp["beta"],
        out_dtype=jnp.float32)                                  # (M, 4*C) f32

    # TODO(synk): Decoder_fuse is undefined in the source; the fused stage-4
    # feature x4_inter (its input) is returned instead of fuse_pred.
    # Single rows -> NCHW layout transform at exit.
    return jnp.transpose(x4_inter.reshape(B, H, W, 4 * C), (0, 3, 1, 2))


if __name__ == "__main__":
    # Scaled-down shapes (real model: C_ENC=1024, D_TOK=512, larger spatial).
    B, C_ENC, D_TOK, H, W = 2, 256, 128, 8, 8

    root = jax.random.PRNGKey(0)
    k_param, k_n, k_s, k_m, k_t = jax.random.split(root, 5)

    params = init_mmnet_params(k_param, C_ENC, D_TOK)

    normal_x4 = jax.random.normal(k_n, (B, C_ENC, H, W), dtype=jnp.float32)
    surface_x4 = jax.random.normal(k_s, (B, C_ENC, H, W), dtype=jnp.float32)
    mucosal_x4 = jax.random.normal(k_m, (B, C_ENC, H, W), dtype=jnp.float32)
    tone_x4 = jax.random.normal(k_t, (B, C_ENC, H, W), dtype=jnp.float32)

    fwd = jax.jit(functools.partial(mmnet_forward, params))
    out = fwd(normal_x4, surface_x4, mucosal_x4, tone_x4)
    jax.block_until_ready(out)

    assert out.shape == (B, 4 * C_ENC, H, W), out.shape
    assert bool(jnp.all(jnp.isfinite(out)))
    print("KERNEL_OK")
</pallas_src>

<mosaic_0001>
module attributes {stable_mosaic.version = 11 : i64} {
  func.func @conv1x1_bn_relu_kernel(%arg0: i32, %arg1: i32, %arg2: memref<1x128x256xbf16, #tpu.memory_space<vmem>>, %arg3: memref<1x256x128xbf16, #tpu.memory_space<vmem>>, %arg4: memref<1x1x128xf32, #tpu.memory_space<vmem>>, %arg5: memref<1x1x128xf32, #tpu.memory_space<vmem>>, %arg6: memref<1x128x128xbf16, #tpu.memory_space<vmem>>) attributes {dimension_semantics = [#tpu.dimension_semantics<parallel>, #tpu.dimension_semantics<parallel>], iteration_bounds = array<i64: 4, 1>, scalar_prefetch = 0 : i64, scratch_operands = 0 : i64, tpu.core_type = #tpu.core_type<tc>, window_params = [{transform_indices = @transform_0, window_bounds = array<i64: 1, 128, 256>}, {transform_indices = @transform_1, window_bounds = array<i64: 1, 256, 128>}, {transform_indices = @transform_2, window_bounds = array<i64: 1, 1, 128>}, {transform_indices = @transform_3, window_bounds = array<i64: 1, 1, 128>}, {transform_indices = @transform_4, window_bounds = array<i64: 1, 128, 128>}]} {
    %c0 = arith.constant 0 : index
    %c0_0 = arith.constant 0 : index
    %c0_1 = arith.constant 0 : index
    %0 = vector.load %arg2[%c0, %c0_0, %c0_1] : memref<1x128x256xbf16, #tpu.memory_space<vmem>>, vector<1x128x256xbf16>
    %1 = vector.shape_cast %0 : vector<1x128x256xbf16> to vector<128x256xbf16>
    %c0_2 = arith.constant 0 : index
    %c0_3 = arith.constant 0 : index
    %c0_4 = arith.constant 0 : index
    %2 = vector.load %arg3[%c0_2, %c0_3, %c0_4] : memref<1x256x128xbf16, #tpu.memory_space<vmem>>, vector<1x256x128xbf16>
    %3 = vector.shape_cast %2 : vector<1x256x128xbf16> to vector<256x128xbf16>
    %cst = arith.constant dense<0.000000e+00> : vector<128x128xf32>
    %4 = tpu.matmul %1, %3, %cst {dimension_numbers = #tpu.dot_dimension_numbers<[1], [0], [0], [1], [0, 0, 1, 1], [], []>} : vector<128x256xbf16>, vector<256x128xbf16>, vector<128x128xf32> -> vector<128x128xf32>
    %cst_5 = arith.constant dense<0.000000e+00> : vector<128xf32>
    %5 = vector.multi_reduction <add>, %4, %cst_5 [0] : vector<128x128xf32> to vector<128xf32>
    %6 = vector.shape_cast %5 : vector<128xf32> to vector<1x128xf32>
    %cst_6 = arith.constant 1.280000e+02 : f32
    %7 = vector.broadcast %cst_6 : f32 to vector<1x128xf32>
    %8 = arith.divf %6, %7 : vector<1x128xf32>
    %9 = vector.broadcast %8 : vector<1x128xf32> to vector<128x128xf32>
    %10 = arith.subf %4, %9 : vector<128x128xf32>
    %11 = vector.broadcast %8 : vector<1x128xf32> to vector<128x128xf32>
    %12 = arith.subf %4, %11 : vector<128x128xf32>
    %13 = arith.mulf %10, %12 : vector<128x128xf32>
    %cst_7 = arith.constant dense<0.000000e+00> : vector<128xf32>
    %14 = vector.multi_reduction <add>, %13, %cst_7 [0] : vector<128x128xf32> to vector<128xf32>
    %15 = vector.shape_cast %14 : vector<128xf32> to vector<1x128xf32>
    %cst_8 = arith.constant 1.280000e+02 : f32
    %16 = vector.broadcast %cst_8 : f32 to vector<1x128xf32>
    %17 = arith.divf %15, %16 : vector<1x128xf32>
    %c0_9 = arith.constant 0 : index
    %c0_10 = arith.constant 0 : index
    %c0_11 = arith.constant 0 : index
    %18 = vector.load %arg4[%c0_9, %c0_10, %c0_11] : memref<1x1x128xf32, #tpu.memory_space<vmem>>, vector<1x1x128xf32>
    %19 = vector.shape_cast %18 : vector<1x1x128xf32> to vector<1x128xf32>
    %cst_12 = arith.constant 9.99999974E-6 : f32
    %20 = vector.broadcast %cst_12 : f32 to vector<1x128xf32>
    %21 = arith.addf %17, %20 : vector<1x128xf32>
    %22 = math.rsqrt %21 : vector<1x128xf32>
    %23 = arith.mulf %19, %22 : vector<1x128xf32>
    %c0_13 = arith.constant 0 : index
    %c0_14 = arith.constant 0 : index
    %c0_15 = arith.constant 0 : index
    %24 = vector.load %arg5[%c0_13, %c0_14, %c0_15] : memref<1x1x128xf32, #tpu.memory_space<vmem>>, vector<1x1x128xf32>
    %25 = vector.shape_cast %24 : vector<1x1x128xf32> to vector<1x128xf32>
    %26 = arith.mulf %8, %23 : vector<1x128xf32>
    %27 = arith.subf %25, %26 : vector<1x128xf32>
    %28 = vector.broadcast %23 : vector<1x128xf32> to vector<128x128xf32>
    %29 = arith.mulf %4, %28 : vector<128x128xf32>
    %30 = vector.broadcast %27 : vector<1x128xf32> to vector<128x128xf32>
    %31 = arith.addf %29, %30 : vector<128x128xf32>
    %cst_16 = arith.constant 0.000000e+00 : f32
    %32 = vector.broadcast %cst_16 : f32 to vector<128x128xf32>
    %33 = arith.maximumf %31, %32 : vector<128x128xf32>
    %34 = arith.truncf %33 : vector<128x128xf32> to vector<128x128xbf16>
    %c0_17 = arith.constant 0 : index
    %c0_18 = arith.constant 0 : index
    %c0_19 = arith.constant 0 : index
    %35 = vector.load %arg6[%c0_17, %c0_18, %c0_19] : memref<1x128x128xbf16, #tpu.memory_space<vmem>>, vector<1x128x128xbf16>
    %36 = vector.shape_cast %35 : vector<1x128x128xbf16> to vector<128x128xbf16>
    %37 = vector.shape_cast %34 : vector<128x128xbf16> to vector<1x128x128xbf16>
    tpu.vector_store %arg6[%c0_17, %c0_18, %c0_19], %37 {strides = array<i32>} : memref<1x128x128xbf16, #tpu.memory_space<vmem>>, vector<1x128x128xbf16>,
    return
  }
  func.func @transform_0(%arg0: i32, %arg1: i32) -> (i32, i32, i32) {
    %c0_i32 = arith.constant 0 : i32
    %c0_i32_0 = arith.constant 0 : i32
    %c0_i32_1 = arith.constant 0 : i32
    return %arg0, %c0_i32, %c0_i32_0 : i32, i32, i32
  }
  func.func @transform_1(%arg0: i32, %arg1: i32) -> (i32, i32, i32) {
    %c0_i32 = arith.constant 0 : i32
    %c0_i32_0 = arith.constant 0 : i32
    return %arg0, %c0_i32, %arg1 : i32, i32, i32
  }
  func.func @transform_2(%arg0: i32, %arg1: i32) -> (i32, i32, i32) {
    %c0_i32 = arith.constant 0 : i32
    %c0_i32_0 = arith.constant 0 : i32
    return %arg0, %c0_i32, %arg1 : i32, i32, i32
  }
  func.func @transform_3(%arg0: i32, %arg1: i32) -> (i32, i32, i32) {
    %c0_i32 = arith.constant 0 : i32
    %c0_i32_0 = arith.constant 0 : i32
    return %arg0, %c0_i32, %arg1 : i32, i32, i32
  }
  func.func @transform_4(%arg0: i32, %arg1: i32) -> (i32, i32, i32) {
    %c0_i32 = arith.constant 0 : i32
    %c0_i32_0 = arith.constant 0 : i32
    return %arg0, %c0_i32, %arg1 : i32, i32, i32
  }
}

module attributes {stable_mosaic.version = 11 : i64} {
  func.func @conv1x1_bn_relu_kernel(%arg0: i32, %arg1: i32, %arg2: memref<1x128x128xbf16, #tpu.memory_space<vmem>>, %arg3: memref<128x256xbf16, #tpu.memory_space<vmem>>, %arg4: memref<1x256xf32, #tpu.memory_space<vmem>>, %arg5: memref<1x256xf32, #tpu.memory_space<vmem>>, %arg6: memref<128x256xbf16, #tpu.memory_space<vmem>>) attributes {dimension_semantics = [#tpu.dimension_semantics<parallel>, #tpu.dimension_semantics<parallel>], iteration_bounds = array<i64: 4, 1>, scalar_prefetch = 0 : i64, scratch_operands = 0 : i64, tpu.core_type = #tpu.core_type<tc>, window_params = [{transform_indices = @transform_0, window_bounds = array<i64: 1, 128, 128>}, {transform_indices = @transform_1, window_bounds = array<i64: 128, 256>}, {transform_indices = @transform_2, window_bounds = array<i64: 1, 256>}, {transform_indices = @transform_3, window_bounds = array<i64: 1, 256>}, {transform_indices = @transform_4, window_bounds = array<i64: 128, 256>}]} {
    %c0 = arith.constant 0 : index
    %c0_0 = arith.constant 0 : index
    %c0_1 = arith.constant 0 : index
    %0 = vector.load %arg2[%c0, %c0_0, %c0_1] : memref<1x128x128xbf16, #tpu.memory_space<vmem>>, vector<1x128x128xbf16>
    %1 = vector.shape_cast %0 : vector<1x128x128xbf16> to vector<128x128xbf16>
    %c0_2 = arith.constant 0 : index
    %c0_3 = arith.constant 0 : index
    %2 = vector.load %arg3[%c0_2, %c0_3] : memref<128x256xbf16, #tpu.memory_space<vmem>>, vector<128x256xbf16>
    %cst = arith.constant dense<0.000000e+00> : vector<128x256xf32>
    %3 = tpu.matmul %1, %2, %cst {dimension_numbers = #tpu.dot_dimension_numbers<[1], [0], [0], [1], [0, 0, 1, 1], [], []>} : vector<128x128xbf16>, vector<128x256xbf16>, vector<128x256xf32> -> vector<128x256xf32>
    %cst_4 = arith.constant dense<0.000000e+00> : vector<256xf32>
    %4 = vector.multi_reduction <add>, %3, %cst_4 [0] : vector<128x256xf32> to vector<256xf32>
    %5 = vector.shape_cast %4 : vector<256xf32> to vector<1x256xf32>
    %cst_5 = arith.constant 1.280000e+02 : f32
    %6 = vector.broadcast %cst_5 : f32 to vector<1x256xf32>
    %7 = arith.divf %5, %6 : vector<1x256xf32>
    %8 = vector.broadcast %7 : vector<1x256xf32> to vector<128x256xf32>
    %9 = arith.subf %3, %8 : vector<128x256xf32>
    %10 = vector.broadcast %7 : vector<1x256xf32> to vector<128x256xf32>
    %11 = arith.subf %3, %10 : vector<128x256xf32>
    %12 = arith.mulf %9, %11 : vector<128x256xf32>
    %cst_6 = arith.constant dense<0.000000e+00> : vector<256xf32>
    %13 = vector.multi_reduction <add>, %12, %cst_6 [0] : vector<128x256xf32> to vector<256xf32>
    %14 = vector.shape_cast %13 : vector<256xf32> to vector<1x256xf32>
    %cst_7 = arith.constant 1.280000e+02 : f32
    %15 = vector.broadcast %cst_7 : f32 to vector<1x256xf32>
    %16 = arith.divf %14, %15 : vector<1x256xf32>
    %c0_8 = arith.constant 0 : index
    %c0_9 = arith.constant 0 : index
    %17 = vector.load %arg4[%c0_8, %c0_9] : memref<1x256xf32, #tpu.memory_space<vmem>>, vector<1x256xf32>
    %cst_10 = arith.constant 9.99999974E-6 : f32
    %18 = vector.broadcast %cst_10 : f32 to vector<1x256xf32>
    %19 = arith.addf %16, %18 : vector<1x256xf32>
    %20 = math.rsqrt %19 : vector<1x256xf32>
    %21 = arith.mulf %17, %20 : vector<1x256xf32>
    %c0_11 = arith.constant 0 : index
    %c0_12 = arith.constant 0 : index
    %22 = vector.load %arg5[%c0_11, %c0_12] : memref<1x256xf32, #tpu.memory_space<vmem>>, vector<1x256xf32>
    %23 = arith.mulf %7, %21 : vector<1x256xf32>
    %24 = arith.subf %22, %23 : vector<1x256xf32>
    %25 = vector.broadcast %21 : vector<1x256xf32> to vector<128x256xf32>
    %26 = arith.mulf %3, %25 : vector<128x256xf32>
    %27 = vector.broadcast %24 : vector<1x256xf32> to vector<128x256xf32>
    %28 = arith.addf %26, %27 : vector<128x256xf32>
    %cst_13 = arith.constant 0.000000e+00 : f32
    %29 = vector.broadcast %cst_13 : f32 to vector<128x256xf32>
    %30 = arith.maximumf %28, %29 : vector<128x256xf32>
    %31 = arith.truncf %30 : vector<128x256xf32> to vector<128x256xbf16>
    %c0_14 = arith.constant 0 : index
    %c0_15 = arith.constant 0 : index
    %32 = vector.load %arg6[%c0_14, %c0_15] : memref<128x256xbf16, #tpu.memory_space<vmem>>, vector<128x256xbf16>
    tpu.vector_store %arg6[%c0_14, %c0_15], %31 {strides = array<i32>} : memref<128x256xbf16, #tpu.memory_space<vmem>>, vector<128x256xbf16>,
    return
  }
  func.func @transform_0(%arg0: i32, %arg1: i32) -> (i32, i32, i32) {
    %c0_i32 = arith.constant 0 : i32
    %c0_i32_0 = arith.constant 0 : i32
    %c0_i32_1 = arith.constant 0 : i32
    return %arg0, %c0_i32, %c0_i32_0 : i32, i32, i32
  }
  func.func @transform_1(%arg0: i32, %arg1: i32) -> (i32, i32) {
    %c0_i32 = arith.constant 0 : i32
    %c0_i32_0 = arith.constant 0 : i32
    return %c0_i32, %arg1 : i32, i32
  }
  func.func @transform_2(%arg0: i32, %arg1: i32) -> (i32, i32) {
    %c0_i32 = arith.constant 0 : i32
    %c0_i32_0 = arith.constant 0 : i32
    return %c0_i32, %arg1 : i32, i32
  }
  func.func @transform_3(%arg0: i32, %arg1: i32) -> (i32, i32) {
    %c0_i32 = arith.constant 0 : i32
    %c0_i32_0 = arith.constant 0 : i32
    return %c0_i32, %arg1 : i32, i32
  }
  func.func @transform_4(%arg0: i32, %arg1: i32) -> (i32, i32) {
    %c1_i32 = arith.constant 1 : i32
    %0 = arith.muli %arg0, %c1_i32 : i32
    %1 = arith.addi %0, %arg1 : i32
    %c0_i32 = arith.constant 0 : i32
    %c0_i32_0 = arith.constant 0 : i32
    return %c0_i32, %1 : i32, i32
  }
}

module attributes {stable_mosaic.version = 11 : i64} {
  func.func @conv1x1_bn_relu_kernel(%arg0: i32, %arg1: memref<128x1024xbf16, #tpu.memory_space<vmem>>, %arg2: memref<1024x256xbf16, #tpu.memory_space<vmem>>, %arg3: memref<1x256xf32, #tpu.memory_space<vmem>>, %arg4: memref<1x256xf32, #tpu.memory_space<vmem>>, %arg5: memref<128x256xf32, #tpu.memory_space<vmem>>) attributes {dimension_semantics = [#tpu.dimension_semantics<parallel>], iteration_bounds = array<i64: 4>, scalar_prefetch = 0 : i64, scratch_operands = 0 : i64, tpu.core_type = #tpu.core_type<tc>, window_params = [{pipeline_mode = #tpu.pipeline_mode<synchronous>, transform_indices = @transform_0, window_bounds = array<i64: 128, 1024>}, {transform_indices = @transform_1, window_bounds = array<i64: 1024, 256>}, {transform_indices = @transform_2, window_bounds = array<i64: 1, 256>}, {transform_indices = @transform_3, window_bounds = array<i64: 1, 256>}, {transform_indices = @transform_4, window_bounds = array<i64: 128, 256>}]} {
    %c0 = arith.constant 0 : index
    %c0_0 = arith.constant 0 : index
    %0 = vector.load %arg1[%c0, %c0_0] : memref<128x1024xbf16, #tpu.memory_space<vmem>>, vector<128x1024xbf16>
    %c0_1 = arith.constant 0 : index
    %c0_2 = arith.constant 0 : index
    %1 = vector.load %arg2[%c0_1, %c0_2] : memref<1024x256xbf16, #tpu.memory_space<vmem>>, vector<1024x256xbf16>
    %cst = arith.constant dense<0.000000e+00> : vector<128x256xf32>
    %2 = tpu.matmul %0, %1, %cst {dimension_numbers = #tpu.dot_dimension_numbers<[1], [0], [0], [1], [0, 0, 1, 1], [], []>} : vector<128x1024xbf16>, vector<1024x256xbf16>, vector<128x256xf32> -> vector<128x256xf32>
    %cst_3 = arith.constant dense<0.000000e+00> : vector<256xf32>
    %3 = vector.multi_reduction <add>, %2, %cst_3 [0] : vector<128x256xf32> to vector<256xf32>
    %4 = vector.shape_cast %3 : vector<256xf32> to vector<1x256xf32>
    %cst_4 = arith.constant 1.280000e+02 : f32
    %5 = vector.broadcast %cst_4 : f32 to vector<1x256xf32>
    %6 = arith.divf %4, %5 : vector<1x256xf32>
    %7 = vector.broadcast %6 : vector<1x256xf32> to vector<128x256xf32>
    %8 = arith.subf %2, %7 : vector<128x256xf32>
    %9 = vector.broadcast %6 : vector<1x256xf32> to vector<128x256xf32>
    %10 = arith.subf %2, %9 : vector<128x256xf32>
    %11 = arith.mulf %8, %10 : vector<128x256xf32>
    %cst_5 = arith.constant dense<0.000000e+00> : vector<256xf32>
    %12 = vector.multi_reduction <add>, %11, %cst_5 [0] : vector<128x256xf32> to vector<256xf32>
    %13 = vector.shape_cast %12 : vector<256xf32> to vector<1x256xf32>
    %cst_6 = arith.constant 1.280000e+02 : f32
    %14 = vector.broadcast %cst_6 : f32 to vector<1x256xf32>
    %15 = arith.divf %13, %14 : vector<1x256xf32>
    %c0_7 = arith.constant 0 : index
    %c0_8 = arith.constant 0 : index
    %16 = vector.load %arg3[%c0_7, %c0_8] : memref<1x256xf32, #tpu.memory_space<vmem>>, vector<1x256xf32>
    %cst_9 = arith.constant 9.99999974E-6 : f32
    %17 = vector.broadcast %cst_9 : f32 to vector<1x256xf32>
    %18 = arith.addf %15, %17 : vector<1x256xf32>
    %19 = math.rsqrt %18 : vector<1x256xf32>
    %20 = arith.mulf %16, %19 : vector<1x256xf32>
    %c0_10 = arith.constant 0 : index
    %c0_11 = arith.constant 0 : index
    %21 = vector.load %arg4[%c0_10, %c0_11] : memref<1x256xf32, #tpu.memory_space<vmem>>, vector<1x256xf32>
    %22 = arith.mulf %6, %20 : vector<1x256xf32>
    %23 = arith.subf %21, %22 : vector<1x256xf32>
    %24 = vector.broadcast %20 : vector<1x256xf32> to vector<128x256xf32>
    %25 = arith.mulf %2, %24 : vector<128x256xf32>
    %26 = vector.broadcast %23 : vector<1x256xf32> to vector<128x256xf32>
    %27 = arith.addf %25, %26 : vector<128x256xf32>
    %cst_12 = arith.constant 0.000000e+00 : f32
    %28 = vector.broadcast %cst_12 : f32 to vector<128x256xf32>
    %29 = arith.maximumf %27, %28 : vector<128x256xf32>
    %c0_13 = arith.constant 0 : index
    %c0_14 = arith.constant 0 : index
    %30 = vector.load %arg5[%c0_13, %c0_14] : memref<128x256xf32, #tpu.memory_space<vmem>>, vector<128x256xf32>
    tpu.vector_store %arg5[%c0_13, %c0_14], %29 {strides = array<i32>} : memref<128x256xf32, #tpu.memory_space<vmem>>, vector<128x256xf32>,
    return
  }
  func.func @transform_0(%arg0: i32) -> (i32, i32) {
    %c0_i32 = arith.constant 0 : i32
    %c0_i32_0 = arith.constant 0 : i32
    %c0_i32_1 = arith.constant 0 : i32
    return %c0_i32, %c0_i32_0 : i32, i32
  }
  func.func @transform_1(%arg0: i32) -> (i32, i32) {
    %c0_i32 = arith.constant 0 : i32
    %c0_i32_0 = arith.constant 0 : i32
    return %c0_i32, %arg0 : i32, i32
  }
  func.func @transform_2(%arg0: i32) -> (i32, i32) {
    %c0_i32 = arith.constant 0 : i32
    %c0_i32_0 = arith.constant 0 : i32
    return %c0_i32, %arg0 : i32, i32
  }
  func.func @transform_3(%arg0: i32) -> (i32, i32) {
    %c0_i32 = arith.constant 0 : i32
    %c0_i32_0 = arith.constant 0 : i32
    return %c0_i32, %arg0 : i32, i32
  }
  func.func @transform_4(%arg0: i32) -> (i32, i32) {
    %c0_i32 = arith.constant 0 : i32
    %c0_i32_0 = arith.constant 0 : i32
    return %c0_i32, %arg0 : i32, i32
  }
}

</mosaic_0001>

<bundles_post_ra>
// kernel: mmnet_forward.3
= control target key start
LH: loop header
LB: loop body
LE: loop exit
PB: predicated region body
PF: predicated region fallthrough
CT: control target
= control target key end

     0   :  { %9 = vsyncpa [#allocation3], 0  ;;  %s1676_s0 = inlined_call_operand.vmem [shape: bf16[4,128,256], index: 0, kind: input, shape index: {}]   ;;  %s1677_s1 = inlined_call_operand.hbm [shape: bf16[4,256,128], index: 1, kind: input, shape index: {}]   ;;  %s1678_s2 = inlined_call_operand.vmem [shape: f32[4,1,128], index: 2, kind: input, shape index: {}]   ;;  %s1679_s3 = inlined_call_operand.vmem [shape: f32[4,1,128], index: 3, kind: input, shape index: {}]   ;;  %s1680_s4 = inlined_call_operand.vmem [shape: bf16[4,128,128], index: 4, kind: output, shape index: {}]  }
   0x1   :  { %11 = vsyncpa [#allocation3 + $0x1], 0  ;;  %s1402_s15 = smov 0   ;;  %s1404_s16 = smov 0  }
   0x2   :  { %s1406_s17 = smov 0   ;;  %s1408_s18 = smov 0  }
   0x3   :  { %s1410_s19 = smov 0   ;;  %s1412_s20 = smov 0  }
   0x4 LB: > { %s984_s21 = sadd.s32 4294967295, %s1372_s20   ;;  %s29_s22 = sadd.s32 1, %s1368_s19  ;;  %s1372_s20 = sphi %s1412_s20, %s17_s20   ;;  %s1368_s19 = sphi %s1410_s19, %s1688_s19   ;;  %s1364_s18 = sphi %s1408_s18, %s1687_s18   ;;  %s1360_s17 = sphi %s1406_s17, %s1686_s17   ;;  %s1356_s16 = sphi %s1404_s16, %s1685_s16   ;;  %s1352_s15 = sphi %s1402_s15, %s1684_s15  }
   0x5   : > { %p31_p0 = scmp.ge.s32.totalorder %s29_s22, 4  ;;  %s64_s23 = sadd.s32 1, %s1360_s17 }
   0x6   : > { %p71_p1 = scmp.ne.s32.totalorder %s1360_s17, %s1356_s16  ;;  %p72_p2 = scmp.eq.s32.totalorder %s1372_s20, 0 }
   0x7   : > { %s1690_s22 = smov (%p31_p0, %s29_s22), 0  ;;  %p77_p4 = scmp.ne.s32.totalorder %s1356_s16, %s1352_s15 }
   0x8   : > { %p1438_p3 = por %p72_p2, %p71_p1  ;;  %s59_s25 = ssub.s32 %s1368_s19, %s1690_s22 }
   0x9   : > { %p78_p5 = scmp.eq.s32.totalorder %s984_s21, 0  ;;  %p62_p6 = scmp.eq.s32.totalorder %s59_s25, 0 }
   0xa   : > { %p1199_p8 = scmp.lt.s32.totalorder %s1372_s20, 4  ;;  %s193_s28 = sand.u32 1, %s1360_s17  }
   0xb   : > { %p1445_p7 = por %p78_p5, %p77_p4  ;;  %s1047_s29 = sshll.u32 %s1368_s19, 11 }
   0xc   : > { %s1451_s27 = scalar_select %p62_p6, %s1360_s17, %s64_s23  }
   0xd   : > { %s988_s30 = sshll.u32 %s193_s28, 7  ;;  %s1458_s7 = scalar_lea.hbm %s1677_s1, %s1047_s29 }
   0xe   : > { %s197_s8 = scalar_lea.vmem [#allocation2], %s988_s30  ;;  %p1462_p9 = pnand %p1199_p8, %p1438_p3 }
   0xf   : > { %s205_s9 = sshll.u32 %s197_s8, 4  ;;  %s1468_s11 = scalar_lea.sflag [#allocation3], %s193_s28  ;;  %s1466_s9 = int_to_ptr.vmem [resolvable:$true] %s205_s9 }
  0x10   : > { %s1292_s12 = scalar_lea.hbm %s1458_s7, 2048  ;;  %p1294_p11 = pneg %p1462_p9 }
  0x11   : > { %p1293_p10 = scmp.ne.s32.totalorder %s1458_s7, %s1292_s12  ;;  %s1297_s15 = scalar_lea.hbm %s1677_s1, 8192 }
  0x12   : > { %p1298_p0 = scmp.lt.u32.totalorder %s1458_s7, %s1677_s1  ;;  %p1299_p1 = scmp.lt.u32.totalorder %s1297_s15, %s1292_s12 }
  0x13   : > { %p1295_p12 = pnand %p1294_p11, %p1293_p10  ;;  %p1301_p3 = scmp.lt.u32.totalorder %s1292_s12, %s1458_s7 }
  0x14   : > { %p1300_p2 = por %p1299_p1, %p1298_p0 }
  0x15   : > { %p1296_p13 = pneg %p1295_p12 }
  0x16   : > { %p1302_p4 = por %p1301_p3, %p1300_p2 }
  0x18   : > { %p1303_p5 = pnand %p1302_p4, %p1296_p13 }
  0x1a   : > { %1306 = shalt.err (!%p1303_p5)
}
  0x1b   : > { %s1307_s24 = scalar_lea.vmem %s1466_s9, 2048  ;;  %s1374_s25 = smov [#allocation2]  }
  0x1c   : > { %p1308_p6 = scmp.ne.s32.totalorder %s1466_s9, %s1307_s24  ;;  %s1312_s28 = sshll.u32 %s1374_s25, 4  ;;  %s1313_s28 = int_to_ptr.vmem [resolvable:$false] %s1312_s28 }
  0x1d   : > { %s1314_s29 = scalar_lea.vmem %s1313_s28, 4096  ;;  %p1315_p12 = scmp.lt.s32.totalorder %s1466_s9, %s1313_s28 }
  0x1e   : > { %p1310_p8 = pnand %p1308_p6, %p1294_p11  ;;  %p1316_p0 = scmp.lt.s32.totalorder %s1314_s29, %s1307_s24 }
  0x20   : > { %p1311_p10 = pneg %p1310_p8  ;;  %p1317_p1 = por %p1316_p0, %p1315_p12 }
  0x22   : > { %p1318_p2 = pnand %p1317_p1, %p1311_p10 }
  0x24   : > { %1321 = shalt.err (!%p1318_p2)
}
  0x25   : > { %s1375_s30 = smov 64   ;;  %s1376_s5 = smov 4  }
  0x26   : > { %1198 = dma.hbm_to_vmem [thread:$0]  (!%p1462_p9), %s1458_s7, 2048, %s1466_s9, %s1468_s11, %s1375_s30, %s1375_s30, %s1376_s5  }
  0x27   : > { %p991_p11 = scmp.ge.s32.totalorder %s1372_s20, 1  ;;  %p231_p13 = scmp.lt.s32.totalorder %s1372_s20, 5 }
  0x29   : > { %p232_p3 = pnand %p991_p11, %p231_p13 }
  0x2a   : > { %s237_s6 = sand.u32 (!%p232_p3), 1, %s1356_s16  }
  0x2b   : > { %235 = sbr.rel (%p232_p3) target bundleno = 441 (0x1b9), region = 36  ;;  %s992_s8 = sshll.u32 (!%p232_p3), %s237_s6, 7 }
  0x2c   : > { %s238_s12 = scalar_lea.sflag (!%p232_p3), [#allocation3], %s237_s6  ;;  %s1499_s13 = scalar_lea.vmem (!%p232_p3), [#allocation2], %s992_s8 }
  0x32   : > { %1347 = dma.done.wait (%p1445_p7), %s238_s12, 2048  }
  0x33   : > { %1349 = vsyncadd (%p1445_p7), %s238_s12, 4294965248  ;;  %v1250_v0 = vld [vmem:[%s1499_s13 + $0x40] sm:$0xff]   ;;  %v1252_v2 = vld [vmem:[%s1499_s13 + $0x48] sm:$0xff]   ;;  %p286_p9 = scmp.lt.s32.totalorder %s1364_s18, 3 }
  0x34   : > { %v1251_v1 = vld [vmem:[%s1499_s13] sm:$0xff]   ;;  %1113 = vmatprep.subr.bf16.mxu0 %v1250_v0  ;;  %1177 = vmatprep.subr.bf16.mxu1 %v1250_v0  ;;  %v1253_v3 = vld [vmem:[%s1499_s13 + $0x8] sm:$0xff]   ;;  %v1254_v4 = vld [vmem:[%s1499_s13 + $0x50] sm:$0xff]  }
  0x35   : > { %1114 = vmatpush3.bf16.msra.mxu0 %v1251_v1  ;;  %1185 = vmatpush3.bf16.msra.mxu1 %v1251_v1  ;;  %v1255_v5 = vld [vmem:[%s1499_s13 + $0x10] sm:$0xff]   ;;  %s1692_s18 = smov (!%p286_p9, %s1364_s18), 3  ;;  %v1256_v6 = vld [vmem:[%s1499_s13 + $0x58] sm:$0xff]   ;;  %v1258_v8 = vld [vmem:[%s1499_s13 + $0x60] sm:$0xff]  }
  0x36   : > { %1115 = vmatprep.subr.bf16.mxu0 %v1252_v2  ;;  %1178 = vmatprep.subr.bf16.mxu1 %v1252_v2  ;;  %v1257_v7 = vld [vmem:[%s1499_s13 + $0x18] sm:$0xff]   ;;  %s1048_s26 = sshll.u32 %s1692_s18, 7  ;;  %v1259_v9 = vld [vmem:[%s1499_s13 + $0x20] sm:$0xff]   ;;  %v1260_v10 = vld [vmem:[%s1499_s13 + $0x68] sm:$0xff]   ;;  %s296_s15 = scalar_lea.vmem %s1678_s2, %s1692_s18 }
  0x37   : > { %s1522_s10 = scalar_lea.vmem %s1676_s0, %s1048_s26  ;;  %v1261_v12 = vld [vmem:[%s1499_s13 + $0x28] sm:$0xff]   ;;  %v1262_v14 = vld [vmem:[%s1499_s13 + $0x70] sm:$0xff]   ;;  %v1264_v16 = vld [vmem:[%s1499_s13 + $0x78] sm:$0xff]   ;;  %s302_s24 = scalar_lea.vmem %s1679_s3, %s1692_s18 }
  0x38   : > { %v1268_v11 = vld [vmem:[%s1522_s10 + $0x4] ss:$8 sps:$4 sm:$0xff]   ;;  %v1263_v15 = vld [vmem:[%s1499_s13 + $0x30] sm:$0xff]   ;;  %v1265_v17 = vld [vmem:[%s1499_s13 + $0x38] sm:$0xff]   ;;  %s1049_s25 = sshll.u32 %s1692_s18, 6 }
  0x39   : > { %1116 = vmatpush3.bf16.msra.mxu0 %v1253_v3  ;;  %1186 = vmatpush3.bf16.msra.mxu1 %v1253_v3  ;;  %v1274_v13 = vld [vmem:[%s1522_s10 + $0x44] ss:$8 sps:$4 sm:$0xff]   ;;  %v1266_v18 = vld [vmem:[%s1522_s10] ss:$8 sps:$4 sm:$0xff]   ;;  %v1269_v20 = vld [vmem:[%s1522_s10 + $0x14] ss:$8 sps:$4 sm:$0xff]   ;;  %s310_s30 = scalar_lea.vmem %s1680_s4, %s1049_s25 }
  0x3a   : > { %1117 = vmatprep.subr.bf16.mxu0 %v1254_v4  ;;  %1179 = vmatprep.subr.bf16.mxu1 %v1254_v4  ;;  %v1272_v19 = vld [vmem:[%s1522_s10 + $0x40] ss:$8 sps:$4 sm:$0xff]   ;;  %v1278_v21 = vld [vmem:[%s1522_s10 + $0x54] ss:$8 sps:$4 sm:$0xff]   ;;  %v1271_v22 = vld [vmem:[%s1522_s10 + $0x10] ss:$8 sps:$4 sm:$0xff]  }
  0x3b   : > { %568 = vmatprep.mubr.bf16.mxu0 %v1268_v11  ;;  %600 = vmatprep.mubr.bf16.mxu1 %v1274_v13  ;;  %v1280_v23 = vld [vmem:[%s1522_s10 + $0x50] ss:$8 sps:$4 sm:$0xff]   ;;  %v1275_v24 = vld [vmem:[%s1522_s10 + $0x24] ss:$8 sps:$4 sm:$0xff]   ;;  %v1277_v26 = vld [vmem:[%s1522_s10 + $0x20] ss:$8 sps:$4 sm:$0xff]  }
  0x3c   : > { %v1284_v25 = vld [vmem:[%s1522_s10 + $0x64] ss:$8 sps:$4 sm:$0xff]   ;;  %v1286_v27 = vld [vmem:[%s1522_s10 + $0x60] ss:$8 sps:$4 sm:$0xff]   ;;  %v1281_v28 = vld [vmem:[%s1522_s10 + $0x34] ss:$8 sps:$4 sm:$0xff]  }
  0x3d   : > { %1118 = vmatpush3.bf16.msra.mxu0 %v1255_v5  ;;  %1187 = vmatpush3.bf16.msra.mxu1 %v1255_v5  ;;  %v1287_v29 = vld [vmem:[%s1522_s10 + $0x74] ss:$8 sps:$4 sm:$0xff]   ;;  %v1283_v30 = vld [vmem:[%s1522_s10 + $0x30] ss:$8 sps:$4 sm:$0xff]  }
  0x3e   : > { %1119 = vmatprep.subr.bf16.mxu0 %v1256_v6  ;;  %1180 = vmatprep.subr.bf16.mxu1 %v1256_v6  ;;  %v1289_v31 = vld [vmem:[%s1522_s10 + $0x70] ss:$8 sps:$4 sm:$0xff]  }
  0x41   : > { %1120 = vmatpush3.bf16.msra.mxu0 %v1257_v7  ;;  %1188 = vmatpush3.bf16.msra.mxu1 %v1257_v7 }
  0x42   : > { %1121 = vmatprep.subr.bf16.mxu0 %v1258_v8  ;;  %1181 = vmatprep.subr.bf16.mxu1 %v1258_v8 }
  0x45   : > { %1122 = vmatpush3.bf16.msra.mxu0 %v1259_v9  ;;  %1189 = vmatpush3.bf16.msra.mxu1 %v1259_v9 }
  0x46   : > { %1123 = vmatprep.subr.bf16.mxu0 %v1260_v10  ;;  %1182 = vmatprep.subr.bf16.mxu1 %v1260_v10 }
  0x49   : > { %1124 = vmatpush3.bf16.msra.mxu0 %v1261_v12  ;;  %1190 = vmatpush3.bf16.msra.mxu1 %v1261_v12 }
  0x4a   : > { %1125 = vmatprep.subr.bf16.mxu0 %v1262_v14  ;;  %1183 = vmatprep.subr.bf16.mxu1 %v1262_v14 }
  0x4d   : > { %1126 = vmatpush3.bf16.msra.mxu0 %v1263_v15  ;;  %1191 = vmatpush3.bf16.msra.mxu1 %v1263_v15 }
  0x4e   : > { %1127 = vmatprep.subr.bf16.mxu0 %v1264_v16  ;;  %1184 = vmatprep.subr.bf16.mxu1 %v1264_v16 }
  0x51   : > { %1128 = vmatpush3.bf16.msra.mxu0 %v1265_v17  ;;  %1192 = vmatpush3.bf16.msra.mxu1 %v1265_v17 }
  0x54   : > { %569 = vmatmul.mubr.bf16.vlgmr.msra.gmra.mrb[0].mxu0 %v1266_v18  ;;  %601 = vmatmul.mubr.bf16.vlgmr.msra.gmra.mrb[0].mxu1 %v1272_v19 }
  0x55   : > { %576 = vmatprep.mubr.bf16.mxu0 %v1269_v20  ;;  %608 = vmatprep.mubr.bf16.mxu1 %v1278_v21 }
  0x5c   : > { %577 = vmatmul.mubr.bf16.gmra.mrb[4].mxu0 %v1271_v22  ;;  %609 = vmatmul.mubr.bf16.gmra.mrb[4].mxu1 %v1280_v23 }
  0x5d   : > { %584 = vmatprep.mubr.bf16.mxu0 %v1275_v24  ;;  %616 = vmatprep.mubr.bf16.mxu1 %v1284_v25 }
  0x64   : > { %585 = vmatmul.mubr.bf16.gmra.mrb[8].mxu0 %v1277_v26  ;;  %617 = vmatmul.mubr.bf16.gmra.mrb[8].mxu1 %v1286_v27 }
  0x65   : > { %592 = vmatprep.mubr.bf16.mxu0 %v1281_v28  ;;  %624 = vmatprep.mubr.bf16.mxu1 %v1287_v29 }
  0x6c   : > { %593 = vmatmul.mubr.bf16.gmra.mrb[12].mxu0 %v1283_v30  ;;  %625 = vmatmul.mubr.bf16.gmra.mrb[12].mxu1 %v1289_v31 }
 0x127   : > { %v1129_v32 = vpop.f32.mrb[0].mxu0  ;;  %v1153_v33 = vpop.f32.mrb[0].mxu1 }
 0x128   : > { %v1130_v34 = vpop.f32.mrb[1].mxu0  ;;  %v1154_v35 = vpop.f32.mrb[1].mxu1 }
 0x129   : > { %v1547_v36 = vadd.f32 %v1130_v34, %v1129_v32  ;;  %v1132_v37 = vpop.f32.mrb[2].mxu0  ;;  %v1549_v38 = vadd.f32 %v1154_v35, %v1153_v33  ;;  %v1156_v39 = vpop.f32.mrb[2].mxu1 }
 0x12a   : > { %v1133_v40 = vpop.f32.mrb[3].mxu0  ;;  %v1157_v41 = vpop.f32.mrb[3].mxu1 }
 0x12b   : > { %v1551_v42 = vadd.f32 %v1133_v40, %v1132_v37  ;;  %v1553_v43 = vadd.f32 %v1157_v41, %v1156_v39 }
 0x12d   : > { %v633_v56 = vadd.f32 %v1551_v42, %v1547_v36 }
 0x12f   : > { %v1135_v44 = vpop.f32.mrb[4].mxu0  ;;  %v1159_v45 = vpop.f32.mrb[4].mxu1 }
 0x130   : > { %v1136_v46 = vpop.f32.mrb[5].mxu0  ;;  %v1160_v47 = vpop.f32.mrb[5].mxu1 }
 0x131   : > { %v1555_v48 = vadd.f32 %v1136_v46, %v1135_v44  ;;  %v1138_v49 = vpop.f32.mrb[6].mxu0  ;;  %v1557_v50 = vadd.f32 %v1160_v47, %v1159_v45  ;;  %v1162_v51 = vpop.f32.mrb[6].mxu1 }
 0x132   : > { %v1139_v52 = vpop.f32.mrb[7].mxu0  ;;  %v1163_v53 = vpop.f32.mrb[7].mxu1 }
 0x133   : > { %v1559_v54 = vadd.f32 %v1139_v52, %v1138_v49  ;;  %v1561_v55 = vadd.f32 %v1163_v53, %v1162_v51  ;;  %v634_v57 = vadd.f32 %v1555_v48, %v633_v56 }
 0x135   : > { %v635_v4 = vadd.f32 %v1559_v54, %v634_v57 }
 0x137   : > { %v1141_v58 = vpop.f32.mrb[8].mxu0  ;;  %v1165_v59 = vpop.f32.mrb[8].mxu1 }
 0x138   : > { %v1142_v60 = vpop.f32.mrb[9].mxu0  ;;  %v1166_v61 = vpop.f32.mrb[9].mxu1 }
 0x139   : > { %v1566_v62 = vadd.f32 %v1142_v60, %v1141_v58  ;;  %v1144_v63 = vpop.f32.mrb[10].mxu0  ;;  %v1568_v0 = vadd.f32 %v1166_v61, %v1165_v59  ;;  %v1168_v1 = vpop.f32.mrb[10].mxu1 }
 0x13a   : > { %v1145_v2 = vpop.f32.mrb[11].mxu0  ;;  %v1169_v3 = vpop.f32.mrb[11].mxu1 }
 0x13b   : > { %v1571_v5 = vadd.f32 %v1145_v2, %v1144_v63  ;;  %v1573_v6 = vadd.f32 %v1169_v3, %v1168_v1  ;;  %v636_v7 = vadd.f32 %v1566_v62, %v635_v4 }
 0x13d   : > { %v637_v12 = vadd.f32 %v1571_v5, %v636_v7 }
 0x13f   : > { %v1147_v8 = vpop.f32.mrb[12].mxu0  ;;  %v1171_v9 = vpop.f32.mrb[12].mxu1 }
 0x140   : > { %v1148_v10 = vpop.f32.mrb[13].mxu0  ;;  %v1172_v11 = vpop.f32.mrb[13].mxu1 }
 0x141   : > { %v1577_v13 = vadd.f32 %v1148_v10, %v1147_v8  ;;  %v1150_v14 = vpop.f32.mrb[14].mxu0  ;;  %v1579_v15 = vadd.f32 %v1172_v11, %v1171_v9  ;;  %v1174_v16 = vpop.f32.mrb[14].mxu1 }
 0x142   : > { %v1151_v17 = vpop.f32.mrb[15].mxu0  ;;  %v1175_v18 = vpop.f32.mrb[15].mxu1 }
 0x143   : > { %v638_v19 = vadd.f32 %v1577_v13, %v637_v12  ;;  %v1582_v20 = vadd.f32 %v1151_v17, %v1150_v14  ;;  %v1584_v21 = vadd.f32 %v1175_v18, %v1174_v16 }
 0x145   : > { %v639_v22 = vadd.f32 %v1582_v20, %v638_v19 }
 0x147   : > { %v640_v23 = vadd.f32 %v1549_v38, %v639_v22 }
 0x149   : > { %v641_v24 = vadd.f32 %v1553_v43, %v640_v23 }
 0x14b   : > { %v642_v25 = vadd.f32 %v1557_v50, %v641_v24 }
 0x14d   : > { %v643_v26 = vadd.f32 %v1561_v55, %v642_v25 }
 0x14f   : > { %v644_v27 = vadd.f32 %v1568_v0, %v643_v26 }
 0x151   : > { %v645_v28 = vadd.f32 %v1573_v6, %v644_v27 }
 0x153   : > { %v646_v29 = vadd.f32 %v1579_v15, %v645_v28 }
 0x155   : > { %v647_v30 = vadd.f32 %v1584_v21, %v646_v29 }
 0x157   : > { %v648_v31 = vrot.slane %v647_v30, 4 }
 0x159   : > { %v649_v32 = vadd.f32 %v648_v31, %v647_v30 }
 0x15b   : > { %v650_v33 = vrot.slane %v649_v32, 2 }
 0x15d   : > { %v651_v34 = vadd.f32 %v650_v33, %v649_v32 }
 0x15f   : > { %v652_v35 = vrot.slane %v651_v34, 1 }
 0x161   : > { %v653_v37 = vadd.f32 %v652_v35, %v651_v34 }
 0x163   : > { %v1595_v39 = vmul.f32 0.0078125, %v653_v37 }
 0x165   : > { %v656_v40 = vsub.f32 %v1547_v36, %v1595_v39  ;;  %v657_v41 = vsub.f32 %v1551_v42, %v1595_v39  ;;  %v658_v44 = vsub.f32 %v1555_v48, %v1595_v39  ;;  %v659_v47 = vsub.f32 %v1559_v54, %v1595_v39 }
 0x166   : > { %v660_v49 = vsub.f32 %v1566_v62, %v1595_v39  ;;  %v661_v53 = vsub.f32 %v1571_v5, %v1595_v39  ;;  %v662_v58 = vsub.f32 %v1577_v13, %v1595_v39  ;;  %v663_v61 = vsub.f32 %v1582_v20, %v1595_v39 }
 0x167   : > { %v672_v45 = vmul.f32 %v656_v40, %v656_v40  ;;  %v673_v46 = vmul.f32 %v657_v41, %v657_v41  ;;  %v674_v51 = vmul.f32 %v658_v44, %v658_v44  ;;  %v675_v56 = vmul.f32 %v659_v47, %v659_v47 }
 0x168   : > { %v676_v59 = vmul.f32 %v660_v49, %v660_v49  ;;  %v677_v63 = vmul.f32 %v661_v53, %v661_v53  ;;  %v664_v2 = vsub.f32 %v1549_v38, %v1595_v39  ;;  %v678_v3 = vmul.f32 %v662_v58, %v662_v58 }
 0x169   : > { %v688_v52 = vadd.f32 %v673_v46, %v672_v45  ;;  %v665_v7 = vsub.f32 %v1553_v43, %v1595_v39  ;;  %v679_v8 = vmul.f32 %v663_v61, %v663_v61  ;;  %v666_v10 = vsub.f32 %v1557_v50, %v1595_v39 }
 0x16a   : > { %v680_v11 = vmul.f32 %v664_v2, %v664_v2  ;;  %v667_v14 = vsub.f32 %v1561_v55, %v1595_v39  ;;  %v668_v18 = vsub.f32 %v1568_v0, %v1595_v39  ;;  %v669_v23 = vsub.f32 %v1573_v6, %v1595_v39 }
 0x16b   : > { %v689_v57 = vadd.f32 %v688_v52, %v674_v51  ;;  %v681_v16 = vmul.f32 %v665_v7, %v665_v7  ;;  %v682_v19 = vmul.f32 %v666_v10, %v666_v10  ;;  %v670_v26 = vsub.f32 %v1579_v15, %v1595_v39 }
 0x16c   : > { %v683_v24 = vmul.f32 %v667_v14, %v667_v14  ;;  %v684_v27 = vmul.f32 %v668_v18, %v668_v18  ;;  %v671_v29 = vsub.f32 %v1584_v21, %v1595_v39  ;;  %v685_v30 = vmul.f32 %v669_v23, %v669_v23 }
 0x16d   : > { %v690_v60 = vadd.f32 %v689_v57, %v675_v56  ;;  %v686_v32 = vmul.f32 %v670_v26, %v670_v26  ;;  %v718_v52 = vlaneseq  ;;  %v710_v56 = vld [vmem:[%s296_s15] sm:$0x1] }
 0x16e   : > { %v687_v34 = vmul.f32 %v671_v29, %v671_v29 }
 0x16f   : > { %v691_v1 = vadd.f32 %v690_v60, %v676_v59  ;;  %v719_v53 = vshrl.u32 %v718_v52, 7  ;;  %v714_v60 = vld [vmem:[%s302_s24] sm:$0x1] }
 0x171   : > { %v692_v4 = vadd.f32 %v691_v1, %v677_v63  ;;  %v720_v57 = vsub.s32 0, %v719_v53 }
 0x173   : > { %v693_v9 = vadd.f32 %v692_v4, %v678_v3 }
 0x175   : > { %v694_v12 = vadd.f32 %v693_v9, %v679_v8 }
 0x177   : > { %v695_v17 = vadd.f32 %v694_v12, %v680_v11 }
 0x179   : > { %v696_v22 = vadd.f32 %v695_v17, %v681_v16 }
 0x17b   : > { %v697_v25 = vadd.f32 %v696_v22, %v682_v19 }
 0x17d   : > { %v698_v28 = vadd.f32 %v697_v25, %v683_v24 }
 0x17f   : > { %v699_v31 = vadd.f32 %v698_v28, %v684_v27 }
 0x181   : > { %v700_v33 = vadd.f32 %v699_v31, %v685_v30 }
 0x183   : > { %v701_v35 = vadd.f32 %v700_v33, %v686_v32 }
 0x185   : > { %v702_v37 = vadd.f32 %v701_v35, %v687_v34 }
 0x187   : > { %v703_v40 = vrot.slane %v702_v37, 4 }
 0x189   : > { %v704_v41 = vadd.f32 %v703_v40, %v702_v37 }
 0x18b   : > { %v705_v44 = vrot.slane %v704_v41, 2 }
 0x18d   : > { %v706_v45 = vadd.f32 %v705_v44, %v704_v41 }
 0x18f   : > { %v707_v46 = vrot.slane %v706_v45, 1 }
 0x191   : > { %v708_v47 = vadd.f32 %v707_v46, %v706_v45 }
 0x193   : > { %v709_v49 = vmul.f32 0.0078125, %v708_v47 }
 0x195   : > { %v711_v51 = vadd.f32 1e-05, %v709_v49 }
 0x197   : > { %1290 = vrsqrt.f32 %v711_v51 }
 0x1a1   : > { %v1291_v58 = vpop.eup %1290 }
 0x1a2   : > { %v713_v59 = vmul.f32 %v1291_v58, %v710_v56 }
 0x1a4   : > { %v715_v61 = vmul.f32 %v713_v59, %v1595_v39  ;;  %v721_v63 = vrot.slane %v713_v59, %v720_v57 }
 0x1a6   : > { %v716_v1 = vsub.f32 %v714_v60, %v715_v61  ;;  %v723_v2 = vmul.f32 %v1547_v36, %v721_v63  ;;  %v724_v3 = vmul.f32 %v1551_v42, %v721_v63  ;;  %v725_v4 = vmul.f32 %v1555_v48, %v721_v63 }
 0x1a7   : > { %v726_v7 = vmul.f32 %v1559_v54, %v721_v63  ;;  %v727_v8 = vmul.f32 %v1566_v62, %v721_v63  ;;  %v728_v9 = vmul.f32 %v1571_v5, %v721_v63  ;;  %v729_v10 = vmul.f32 %v1577_v13, %v721_v63 }
 0x1a8   : > { %v730_v11 = vmul.f32 %v1582_v20, %v721_v63  ;;  %v731_v39 = vmul.f32 %v1549_v38, %v721_v63  ;;  %v732_v12 = vmul.f32 %v1553_v43, %v721_v63  ;;  %v733_v36 = vmul.f32 %v1557_v50, %v721_v63 }
 0x1a9   : > { %v734_v42 = vmul.f32 %v1561_v55, %v721_v63  ;;  %v743_v14 = vrot.slane %v716_v1, %v720_v57  ;;  %v735_v48 = vmul.f32 %v1568_v0, %v721_v63  ;;  %v736_v54 = vmul.f32 %v1573_v6, %v721_v63 }
 0x1aa   : > { %v737_v62 = vmul.f32 %v1579_v15, %v721_v63  ;;  %v738_v5 = vmul.f32 %v1584_v21, %v721_v63 }
 0x1ab   : > { %v745_v13 = vadd.f32 %v743_v14, %v723_v2  ;;  %v746_v20 = vadd.f32 %v743_v14, %v724_v3  ;;  %v747_v16 = vadd.f32 %v743_v14, %v725_v4  ;;  %v748_v38 = vadd.f32 %v743_v14, %v726_v7 }
 0x1ac   : > { %v749_v17 = vadd.f32 %v743_v14, %v727_v8  ;;  %v750_v43 = vadd.f32 %v743_v14, %v728_v9  ;;  %v751_v18 = vadd.f32 %v743_v14, %v729_v10  ;;  %v752_v50 = vadd.f32 %v743_v14, %v730_v11 }
 0x1ad   : > { %v753_v19 = vadd.f32 %v743_v14, %v731_v39  ;;  %v754_v55 = vadd.f32 %v743_v14, %v732_v12  ;;  %v755_v22 = vadd.f32 %v743_v14, %v733_v36  ;;  %v756_v23 = vadd.f32 %v743_v14, %v734_v42 }
 0x1ae   : > { %v757_v0 = vadd.f32 %v743_v14, %v735_v48  ;;  %v758_v24 = vadd.f32 %v743_v14, %v736_v54  ;;  %v759_v6 = vadd.f32 %v743_v14, %v737_v62  ;;  %v760_v25 = vadd.f32 %v743_v14, %v738_v5 }
 0x1af   : > { %v761_v15 = vmax.f32 %v745_v13, 0.0  ;;  %v762_v21 = vmax.f32 %v746_v20, 0.0  ;;  %v763_v26 = vmax.f32 %v747_v16, 0.0  ;;  %v764_v27 = vmax.f32 %v748_v38, 0.0 }
 0x1b0   : > { %v765_v28 = vmax.f32 %v749_v17, 0.0  ;;  %v766_v29 = vmax.f32 %v750_v43, 0.0  ;;  %v767_v30 = vmax.f32 %v751_v18, 0.0  ;;  %v768_v31 = vmax.f32 %v752_v50, 0.0 }
 0x1b1   : > { %v769_v32 = vmax.f32 %v753_v19, 0.0  ;;  %v770_v33 = vmax.f32 %v754_v55, 0.0  ;;  %v771_v34 = vmax.f32 %v755_v22, 0.0  ;;  %v772_v35 = vmax.f32 %v756_v23, 0.0 }
 0x1b2   : > { %v773_v37 = vmax.f32 %v757_v0, 0.0  ;;  %v774_v40 = vmax.f32 %v758_v24, 0.0  ;;  %v775_v41 = vmax.f32 %v759_v6, 0.0  ;;  %v776_v44 = vmax.f32 %v760_v25, 0.0 }
 0x1b3   : > { %v1069_v45 = vpack.c.bf16 %v762_v21, %v761_v15  ;;  %v1074_v46 = vpack.c.bf16 %v764_v27, %v763_v26  ;;  %v1079_v47 = vpack.c.bf16 %v766_v29, %v765_v28  ;;  %v1084_v49 = vpack.c.bf16 %v768_v31, %v767_v30 }
 0x1b4   : > { %v1089_v51 = vpack.c.bf16 %v770_v33, %v769_v32  ;;  %v1094_v52 = vpack.c.bf16 %v772_v35, %v771_v34  ;;  %v1099_v53 = vpack.c.bf16 %v774_v40, %v773_v37  ;;  %v1104_v56 = vpack.c.bf16 %v776_v44, %v775_v41 }
 0x1b5   : > { %1070 = vst [vmem:[%s310_s30] sm:$0xff] %v1069_v45   ;;  %1106 = vst [vmem:[%s310_s30 + $0x8] sm:$0xff] %v1074_v46  }
 0x1b6   : > { %1107 = vst [vmem:[%s310_s30 + $0x10] sm:$0xff] %v1079_v47   ;;  %1108 = vst [vmem:[%s310_s30 + $0x18] sm:$0xff] %v1084_v49  }
 0x1b7   : > { %1109 = vst [vmem:[%s310_s30 + $0x20] sm:$0xff] %v1089_v51   ;;  %1110 = vst [vmem:[%s310_s30 + $0x28] sm:$0xff] %v1094_v52  }
 0x1b8   : > { %1111 = vst [vmem:[%s310_s30 + $0x30] sm:$0xff] %v1099_v53   ;;  %1112 = vst [vmem:[%s310_s30 + $0x38] sm:$0xff] %v1104_v56  }
 0x1b9 PF: > { %s17_s20 = sadd.s32 1, %s1372_s20   ;;  %s1684_s15 = smov %s1356_s16 }
 0x1ba   : > { %p14_p7 = scmp.ge.s32.totalorder %s17_s20, 6   ;;  %s1685_s16 = smov %s1360_s17 }
 0x1bb   : > { %s1686_s17 = smov %s1451_s27  ;;  %s1687_s18 = smov %s1368_s19 }
 0x1bc   : > { %s1688_s19 = smov %s1690_s22  ;;  %16 = sbr.rel (!%p14_p7) target bundleno = 4 (0x4), region = 85 }
 0x1c3   :  { %884 = vsyncpa [#allocation3], 1 }
 0x1c4   :  { %886 = vsyncpa [#allocation3 + $0x1], 1 }

// kernel: mmnet_forward.4
= control target key start
LH: loop header
LB: loop body
LE: loop exit
PB: predicated region body
PF: predicated region fallthrough
CT: control target
= control target key end

     0   :  { %s1408_s15 = smov 0   ;;  %s1410_s16 = smov 0   ;;  %s1809_s0 = inlined_call_operand.vmem [shape: bf16[4,128,128], index: 0, kind: input, shape index: {}]   ;;  %s1810_s1 = inlined_call_operand.vmem [shape: bf16[128,256], index: 1, kind: input, shape index: {}]   ;;  %s1811_s2 = inlined_call_operand.vmem [shape: f32[1,256], index: 2, kind: input, shape index: {}]   ;;  %s1812_s3 = inlined_call_operand.vmem [shape: f32[1,256], index: 3, kind: input, shape index: {}]   ;;  %s1813_s4 = inlined_call_operand.vmem [shape: bf16[128,1024], index: 4, kind: output, shape index: {}]  }
   0x1   :  { %s1412_s17 = smov 0   ;;  %s1414_s18 = smov 0  }
   0x2   :  { %s1416_s19 = smov 0  }
   0x3 LB: > { %s1173_s20 = sadd.s32 4294967295, %s1379_s19   ;;  %s26_s21 = sadd.s32 1, %s1375_s18  ;;  %s1379_s19 = sphi %s1416_s19, %s14_s19   ;;  %s1375_s18 = sphi %s1414_s18, %s1818_s18   ;;  %s1371_s17 = sphi %s1412_s17, %s1817_s17   ;;  %s1367_s16 = sphi %s1410_s16, %s1816_s16   ;;  %s1363_s15 = sphi %s1408_s15, %s1815_s15  }
   0x4   : > { %p28_p0 = scmp.ge.s32.totalorder %s26_s21, 4  ;;  %s139_s22 = sadd.s32 1, %s1367_s16 }
   0x5   : > { %p149_p1 = scmp.ne.s32.totalorder %s1367_s16, %s1363_s15  ;;  %p150_p2 = scmp.eq.s32.totalorder %s1173_s20, 3 }
   0x6   : > { %s1820_s21 = smov (%p28_p0, %s26_s21), 0  ;;  %p1180_p4 = scmp.ge.s32.totalorder %s1379_s19, 1 }
   0x7   : > { %p1440_p3 = por %p150_p2, %p149_p1  ;;  %s136_s24 = ssub.s32 %s1375_s18, %s1820_s21 }
   0x8   : > { %p207_p5 = scmp.lt.s32.totalorder %s1379_s19, 5  ;;  %p137_p6 = scmp.eq.s32.totalorder %s136_s24, 0 }
   0xa   : > { %p208_p7 = pnand %p1180_p4, %p207_p5 }
   0xb   : > { %s1449_s25 = scalar_select %p137_p6, %s1367_s16, %s139_s22  }
   0xc   : > { %211 = sbr.rel (%p208_p7) target bundleno = 436 (0x1b4), region = 36  ;;  %v1305_v0 = vld [vmem:[%s1810_s1 + $0x4] ss:$8 sps:$4 sm:$0xff] (!%p208_p7)   ;;  %p245_p8 = scmp.lt.s32.totalorder (!%p208_p7), %s1371_s17, 3  ;;  %v1307_v1 = vld [vmem:[%s1810_s1] ss:$8 sps:$4 sm:$0xff] (!%p208_p7)  }
   0xd   : > { %v1381_v2 = vmov (!%p208_p7), 0   ;;  %429 = vmatprep.subr.bf16.mxu0 (!%p208_p7), %v1305_v0  ;;  %v1308_v3 = vld [vmem:[%s1810_s1 + $0x14] ss:$8 sps:$4 sm:$0xff] (!%p208_p7)   ;;  %1247 = vmatprep.subr.bf16.mxu1 (!%p208_p7), %v1305_v0  ;;  %v1310_v4 = vld [vmem:[%s1810_s1 + $0x10] ss:$8 sps:$4 sm:$0xff] (!%p208_p7)   ;;  %s242_s5 = sand.u32 (!%p208_p7), 1, %s1363_s15  }
   0xe   : > { %461 = vmatprep.mubr.bf16.mxu0 (!%p208_p7), %v1381_v2  ;;  %501 = vmatprep.mubr.bf16.mxu1 (!%p208_p7), %v1381_v2  ;;  %v1311_v5 = vld [vmem:[%s1810_s1 + $0x24] ss:$8 sps:$4 sm:$0xff] (!%p208_p7)   ;;  %v1313_v6 = vld [vmem:[%s1810_s1 + $0x20] ss:$8 sps:$4 sm:$0xff] (!%p208_p7)   ;;  %v1314_v7 = vld [vmem:[%s1810_s1 + $0x34] ss:$8 sps:$4 sm:$0xff] (!%p208_p7)  }
   0xf   : > { %430 = vmatpush1.bf16.msra.mxu0 (!%p208_p7), %v1307_v1  ;;  %1255 = vmatpush1.bf16.msra.mxu1 (!%p208_p7), %v1307_v1  ;;  %v1316_v8 = vld [vmem:[%s1810_s1 + $0x30] ss:$8 sps:$4 sm:$0xff] (!%p208_p7)   ;;  %v1317_v9 = vld [vmem:[%s1810_s1 + $0x44] ss:$8 sps:$4 sm:$0xff] (!%p208_p7)   ;;  %v1319_v10 = vld [vmem:[%s1810_s1 + $0x40] ss:$8 sps:$4 sm:$0xff] (!%p208_p7)  }
  0x10   : > { %431 = vmatprep.subr.bf16.mxu0 (!%p208_p7), %v1308_v3  ;;  %1248 = vmatprep.subr.bf16.mxu1 (!%p208_p7), %v1308_v3  ;;  %v1320_v11 = vld [vmem:[%s1810_s1 + $0x54] ss:$8 sps:$4 sm:$0xff] (!%p208_p7)   ;;  %v1322_v12 = vld [vmem:[%s1810_s1 + $0x50] ss:$8 sps:$4 sm:$0xff] (!%p208_p7)   ;;  %v1323_v13 = vld [vmem:[%s1810_s1 + $0x64] ss:$8 sps:$4 sm:$0xff] (!%p208_p7)  }
  0x11   : > { %v1325_v14 = vld [vmem:[%s1810_s1 + $0x60] ss:$8 sps:$4 sm:$0xff] (!%p208_p7)   ;;  %v1326_v15 = vld [vmem:[%s1810_s1 + $0x74] ss:$8 sps:$4 sm:$0xff] (!%p208_p7)   ;;  %v1328_v16 = vld [vmem:[%s1810_s1 + $0x70] ss:$8 sps:$4 sm:$0xff] (!%p208_p7)  }
  0x13   : > { %s246_s6 = scalar_select %p245_p8, %s1371_s17, 3  ;;  %432 = vmatpush1.bf16.msra.mxu0 %v1310_v4  ;;  %1256 = vmatpush1.bf16.msra.mxu1 %v1310_v4 }
  0x14   : > { %433 = vmatprep.subr.bf16.mxu0 %v1311_v5  ;;  %1249 = vmatprep.subr.bf16.mxu1 %v1311_v5  ;;  %s1246_s7 = sshll.u32 (%p1440_p3), %s1371_s17, 3 }
  0x15   : > { %s1229_s11 = sshll.u32 %s246_s6, 6  ;;  %s1181_s6 = sshll.u32 %s242_s5, 7 }
  0x16   : > { %s1479_s26 = scalar_lea.vmem %s1809_s0, %s1229_s11  ;;  %s1754_s15 = scalar_lea.vmem [#allocation2], %s1181_s6 }
  0x17   : > { %434 = vmatpush1.bf16.msra.mxu0 %v1313_v6  ;;  %1257 = vmatpush1.bf16.msra.mxu1 %v1313_v6  ;;  %v1329_v17 = vld [vmem:[%s1479_s26] sm:$0xff]   ;;  %v1330_v19 = vld [vmem:[%s1479_s26 + $0x8] sm:$0xff]   ;;  %v1332_v21 = vld [vmem:[%s1479_s26 + $0x10] sm:$0xff]   ;;  %s981_s10 = scalar_lea.vmem (%p1440_p3), %s1813_s4, %s1246_s7 }
  0x18   : > { %435 = vmatprep.subr.bf16.mxu0 %v1314_v7  ;;  %1250 = vmatprep.subr.bf16.mxu1 %v1314_v7  ;;  %v1331_v18 = vld [vmem:[%s1479_s26 + $0x20] sm:$0xff]   ;;  %v1333_v20 = vld [vmem:[%s1479_s26 + $0x28] sm:$0xff]   ;;  %v1335_v22 = vld [vmem:[%s1479_s26 + $0x30] sm:$0xff]  }
  0x19   : > { %v1334_v23 = vld [vmem:[%s1479_s26 + $0x18] sm:$0xff]  }
  0x1a   : > { %v1336_v24 = vld [vmem:[%s1479_s26 + $0x38] sm:$0xff]  }
  0x1b   : > { %436 = vmatpush1.bf16.msra.mxu0 %v1316_v8  ;;  %1258 = vmatpush1.bf16.msra.mxu1 %v1316_v8 }
  0x1c   : > { %437 = vmatprep.subr.bf16.mxu0 %v1317_v9  ;;  %1251 = vmatprep.subr.bf16.mxu1 %v1317_v9 }
  0x1f   : > { %438 = vmatpush1.bf16.msra.mxu0 %v1319_v10  ;;  %1259 = vmatpush1.bf16.msra.mxu1 %v1319_v10 }
  0x20   : > { %439 = vmatprep.subr.bf16.mxu0 %v1320_v11  ;;  %1252 = vmatprep.subr.bf16.mxu1 %v1320_v11 }
  0x23   : > { %440 = vmatpush1.bf16.msra.mxu0 %v1322_v12  ;;  %1260 = vmatpush1.bf16.msra.mxu1 %v1322_v12 }
  0x24   : > { %441 = vmatprep.subr.bf16.mxu0 %v1323_v13  ;;  %1253 = vmatprep.subr.bf16.mxu1 %v1323_v13 }
  0x27   : > { %442 = vmatpush1.bf16.msra.mxu0 %v1325_v14  ;;  %1261 = vmatpush1.bf16.msra.mxu1 %v1325_v14 }
  0x28   : > { %443 = vmatprep.subr.bf16.mxu0 %v1326_v15  ;;  %1254 = vmatprep.subr.bf16.mxu1 %v1326_v15 }
  0x2b   : > { %444 = vmatpush1.bf16.msra.mxu0 %v1328_v16  ;;  %1262 = vmatpush1.bf16.msra.mxu1 %v1328_v16 }
  0x2e   : > { %462 = vmatmul.mubr.bf16.vlgmr.msra.gmra.mrb[0].mxu0 %v1329_v17  ;;  %502 = vmatmul.mubr.bf16.vlgmr.msra.gmra.mrb[0].mxu1 %v1331_v18 }
  0x2f   : > { %471 = vmatprep.mubr.bf16.mxu0 %v1381_v2  ;;  %511 = vmatprep.mubr.bf16.mxu1 %v1381_v2 }
  0x36   : > { %472 = vmatmul.mubr.bf16.gmra.mrb[4].mxu0 %v1330_v19  ;;  %512 = vmatmul.mubr.bf16.gmra.mrb[4].mxu1 %v1333_v20 }
  0x37   : > { %481 = vmatprep.mubr.bf16.mxu0 %v1381_v2  ;;  %521 = vmatprep.mubr.bf16.mxu1 %v1381_v2 }
  0x3e   : > { %482 = vmatmul.mubr.bf16.gmra.mrb[8].mxu0 %v1332_v21  ;;  %522 = vmatmul.mubr.bf16.gmra.mrb[8].mxu1 %v1335_v22 }
  0x3f   : > { %491 = vmatprep.mubr.bf16.mxu0 %v1381_v2  ;;  %531 = vmatprep.mubr.bf16.mxu1 %v1381_v2 }
  0x46   : > { %492 = vmatmul.mubr.bf16.gmra.mrb[12].mxu0 %v1334_v23  ;;  %532 = vmatmul.mubr.bf16.gmra.mrb[12].mxu1 %v1336_v24 }
 0x101   : > { %v1522_v25 = vpop.f32.mrb[0].mxu0  ;;  %v1524_v26 = vpop.f32.mrb[0].mxu1 }
 0x102   : > { %v1526_v27 = vpop.f32.mrb[1].mxu0  ;;  %v1528_v28 = vpop.f32.mrb[1].mxu1 }
 0x103   : > { %v1530_v29 = vpop.f32.mrb[2].mxu0  ;;  %v1532_v30 = vpop.f32.mrb[2].mxu1 }
 0x104   : > { %v542_v31 = vadd.f32 %v1530_v29, %v1522_v25  ;;  %v1536_v32 = vpop.f32.mrb[3].mxu0  ;;  %v1538_v33 = vpop.f32.mrb[3].mxu1 }
 0x105   : > { %v563_v34 = vadd.f32 %v1536_v32, %v1526_v27 }
 0x109   : > { %v1542_v35 = vpop.f32.mrb[4].mxu0  ;;  %v1544_v36 = vpop.f32.mrb[4].mxu1 }
 0x10a   : > { %v543_v37 = vadd.f32 %v542_v31, %v1542_v35  ;;  %v1547_v38 = vpop.f32.mrb[5].mxu0  ;;  %v1549_v39 = vpop.f32.mrb[5].mxu1 }
 0x10b   : > { %v564_v40 = vadd.f32 %v563_v34, %v1547_v38  ;;  %v1552_v41 = vpop.f32.mrb[6].mxu0  ;;  %v1554_v42 = vpop.f32.mrb[6].mxu1 }
 0x10c   : > { %v544_v43 = vadd.f32 %v543_v37, %v1552_v41  ;;  %v1557_v44 = vpop.f32.mrb[7].mxu0  ;;  %v1559_v45 = vpop.f32.mrb[7].mxu1 }
 0x10d   : > { %v565_v46 = vadd.f32 %v564_v40, %v1557_v44 }
 0x111   : > { %v1562_v47 = vpop.f32.mrb[8].mxu0  ;;  %v1564_v48 = vpop.f32.mrb[8].mxu1 }
 0x112   : > { %v545_v49 = vadd.f32 %v544_v43, %v1562_v47  ;;  %v1567_v50 = vpop.f32.mrb[9].mxu0  ;;  %v1569_v51 = vpop.f32.mrb[9].mxu1 }
 0x113   : > { %v566_v52 = vadd.f32 %v565_v46, %v1567_v50  ;;  %v1572_v53 = vpop.f32.mrb[10].mxu0  ;;  %v1574_v54 = vpop.f32.mrb[10].mxu1 }
 0x114   : > { %v546_v55 = vadd.f32 %v545_v49, %v1572_v53  ;;  %v1577_v56 = vpop.f32.mrb[11].mxu0  ;;  %v1579_v57 = vpop.f32.mrb[11].mxu1 }
 0x115   : > { %v567_v58 = vadd.f32 %v566_v52, %v1577_v56 }
 0x119   : > { %v1582_v59 = vpop.f32.mrb[12].mxu0  ;;  %v1584_v60 = vpop.f32.mrb[12].mxu1 }
 0x11a   : > { %v547_v61 = vadd.f32 %v546_v55, %v1582_v59  ;;  %v1587_v62 = vpop.f32.mrb[13].mxu0  ;;  %v1589_v63 = vpop.f32.mrb[13].mxu1 }
 0x11b   : > { %v568_v0 = vadd.f32 %v567_v58, %v1587_v62  ;;  %v1592_v1 = vpop.f32.mrb[14].mxu0  ;;  %v1594_v2 = vpop.f32.mrb[14].mxu1 }
 0x11c   : > { %v548_v3 = vadd.f32 %v547_v61, %v1592_v1  ;;  %v1597_v4 = vpop.f32.mrb[15].mxu0  ;;  %v1599_v5 = vpop.f32.mrb[15].mxu1 }
 0x11d   : > { %v569_v6 = vadd.f32 %v568_v0, %v1597_v4 }
 0x11e   : > { %v549_v7 = vadd.f32 %v548_v3, %v1524_v26 }
 0x11f   : > { %v570_v8 = vadd.f32 %v569_v6, %v1528_v28 }
 0x120   : > { %v550_v9 = vadd.f32 %v549_v7, %v1532_v30 }
 0x121   : > { %v571_v10 = vadd.f32 %v570_v8, %v1538_v33 }
 0x122   : > { %v551_v11 = vadd.f32 %v550_v9, %v1544_v36 }
 0x123   : > { %v572_v12 = vadd.f32 %v571_v10, %v1549_v39 }
 0x124   : > { %v552_v13 = vadd.f32 %v551_v11, %v1554_v42 }
 0x125   : > { %v573_v14 = vadd.f32 %v572_v12, %v1559_v45 }
 0x126   : > { %v553_v15 = vadd.f32 %v552_v13, %v1564_v48 }
 0x127   : > { %v574_v16 = vadd.f32 %v573_v14, %v1569_v51 }
 0x128   : > { %v554_v17 = vadd.f32 %v553_v15, %v1574_v54 }
 0x129   : > { %v575_v18 = vadd.f32 %v574_v16, %v1579_v57 }
 0x12a   : > { %v555_v19 = vadd.f32 %v554_v17, %v1584_v60 }
 0x12b   : > { %v576_v20 = vadd.f32 %v575_v18, %v1589_v63 }
 0x12c   : > { %v556_v21 = vadd.f32 %v555_v19, %v1594_v2 }
 0x12d   : > { %v577_v22 = vadd.f32 %v576_v20, %v1599_v5 }
 0x12e   : > { %v557_v23 = vrot.slane %v556_v21, 4 }
 0x12f   : > { %v578_v24 = vrot.slane %v577_v22, 4 }
 0x130   : > { %v558_v31 = vadd.f32 %v557_v23, %v556_v21 }
 0x131   : > { %v579_v34 = vadd.f32 %v578_v24, %v577_v22 }
 0x132   : > { %v559_v37 = vrot.slane %v558_v31, 2 }
 0x133   : > { %v580_v40 = vrot.slane %v579_v34, 2 }
 0x134   : > { %v560_v43 = vadd.f32 %v559_v37, %v558_v31 }
 0x135   : > { %v581_v46 = vadd.f32 %v580_v40, %v579_v34 }
 0x136   : > { %v561_v49 = vrot.slane %v560_v43, 1 }
 0x137   : > { %v582_v55 = vrot.slane %v581_v46, 1 }
 0x138   : > { %v562_v52 = vadd.f32 %v561_v49, %v560_v43 }
 0x139   : > { %v583_v3 = vadd.f32 %v582_v55, %v581_v46 }
 0x13a   : > { %v1618_v58 = vmul.f32 0.0078125, %v562_v52 }
 0x13b   : > { %v1626_v9 = vmul.f32 0.0078125, %v583_v3 }
 0x13c   : > { %v587_v61 = vsub.f32 %v1522_v25, %v1618_v58  ;;  %v589_v0 = vsub.f32 %v1530_v29, %v1618_v58  ;;  %v591_v6 = vsub.f32 %v1542_v35, %v1618_v58  ;;  %v593_v10 = vsub.f32 %v1552_v41, %v1618_v58 }
 0x13d   : > { %v595_v11 = vsub.f32 %v1562_v47, %v1618_v58  ;;  %v588_v14 = vsub.f32 %v1526_v27, %v1626_v9  ;;  %v590_v15 = vsub.f32 %v1536_v32, %v1626_v9  ;;  %v597_v16 = vsub.f32 %v1572_v53, %v1618_v58 }
 0x13e   : > { %v619_v7 = vmul.f32 %v587_v61, %v587_v61  ;;  %v621_v8 = vmul.f32 %v589_v0, %v589_v0  ;;  %v623_v12 = vmul.f32 %v591_v6, %v591_v6  ;;  %v625_v17 = vmul.f32 %v593_v10, %v593_v10 }
 0x13f   : > { %v599_v19 = vsub.f32 %v1582_v59, %v1618_v58  ;;  %v627_v20 = vmul.f32 %v595_v11, %v595_v11  ;;  %v592_v22 = vsub.f32 %v1547_v38, %v1626_v9  ;;  %v620_v23 = vmul.f32 %v588_v14, %v588_v14 }
 0x140   : > { %v651_v13 = vadd.f32 %v621_v8, %v619_v7  ;;  %v622_v24 = vmul.f32 %v590_v15, %v590_v15  ;;  %v601_v31 = vsub.f32 %v1592_v1, %v1618_v58  ;;  %v629_v34 = vmul.f32 %v597_v16, %v597_v16 }
 0x141   : > { %v594_v40 = vsub.f32 %v1557_v44, %v1626_v9  ;;  %v603_v43 = vsub.f32 %v1524_v26, %v1618_v58  ;;  %v631_v46 = vmul.f32 %v599_v19, %v599_v19  ;;  %v596_v52 = vsub.f32 %v1567_v50, %v1626_v9 }
 0x142   : > { %v652_v18 = vadd.f32 %v651_v13, %v623_v12  ;;  %v624_v55 = vmul.f32 %v592_v22, %v592_v22  ;;  %v672_v61 = vadd.f32 %v622_v24, %v620_v23  ;;  %v605_v0 = vsub.f32 %v1532_v30, %v1618_v58 }
 0x143   : > { %v633_v3 = vmul.f32 %v601_v31, %v601_v31  ;;  %v598_v7 = vsub.f32 %v1577_v56, %v1626_v9  ;;  %v626_v8 = vmul.f32 %v594_v40, %v594_v40  ;;  %v607_v11 = vsub.f32 %v1544_v36, %v1618_v58 }
 0x144   : > { %v653_v21 = vadd.f32 %v652_v18, %v625_v17  ;;  %v673_v10 = vadd.f32 %v672_v61, %v624_v55  ;;  %v635_v12 = vmul.f32 %v603_v43, %v603_v43  ;;  %v600_v14 = vsub.f32 %v1587_v62, %v1626_v9 }
 0x145   : > { %v628_v15 = vmul.f32 %v596_v52, %v596_v52  ;;  %v609_v17 = vsub.f32 %v1554_v42, %v1618_v58  ;;  %v637_v18 = vmul.f32 %v605_v0, %v605_v0  ;;  %v611_v23 = vsub.f32 %v1564_v48, %v1618_v58 }
 0x146   : > { %v654_v37 = vadd.f32 %v653_v21, %v627_v20  ;;  %v674_v16 = vadd.f32 %v673_v10, %v626_v8  ;;  %v602_v20 = vsub.f32 %v1597_v4, %v1626_v9  ;;  %v630_v21 = vmul.f32 %v598_v7, %v598_v7 }
 0x147   : > { %v639_v24 = vmul.f32 %v607_v11, %v607_v11  ;;  %v613_v43 = vsub.f32 %v1574_v54, %v1618_v58  ;;  %v606_v52 = vsub.f32 %v1538_v33, %v1626_v9  ;;  %v615_v0 = vsub.f32 %v1584_v60, %v1618_v58 }
 0x148   : > { %v655_v49 = vadd.f32 %v654_v37, %v629_v34  ;;  %v675_v22 = vadd.f32 %v674_v16, %v628_v15  ;;  %v604_v34 = vsub.f32 %v1528_v28, %v1626_v9  ;;  %v632_v37 = vmul.f32 %v600_v14, %v600_v14 }
 0x149   : > { %v634_v55 = vmul.f32 %v602_v20, %v602_v20  ;;  %v608_v7 = vsub.f32 %v1549_v39, %v1626_v9  ;;  %v617_v11 = vsub.f32 %v1594_v2, %v1618_v58  ;;  %v610_v14 = vsub.f32 %v1559_v45, %v1626_v9 }
 0x14a   : > { %v656_v6 = vadd.f32 %v655_v49, %v631_v46  ;;  %v676_v40 = vadd.f32 %v675_v22, %v630_v21  ;;  %v641_v46 = vmul.f32 %v609_v17, %v609_v17  ;;  %v636_v8 = vmul.f32 %v604_v34, %v604_v34 }
 0x14b   : > { %v638_v15 = vmul.f32 %v606_v52, %v606_v52  ;;  %v647_v17 = vmul.f32 %v615_v0, %v615_v0  ;;  %v640_v20 = vmul.f32 %v608_v7, %v608_v7  ;;  %v649_v22 = vmul.f32 %v617_v11, %v617_v11 }
 0x14c   : > { %v657_v13 = vadd.f32 %v656_v6, %v633_v3  ;;  %v677_v61 = vadd.f32 %v676_v40, %v632_v37  ;;  %v643_v3 = vmul.f32 %v611_v23, %v611_v23  ;;  %v616_v40 = vsub.f32 %v1589_v63, %v1626_v9 }
 0x14d   : > { %v618_v52 = vsub.f32 %v1599_v5, %v1626_v9 }
 0x14e   : > { %v658_v19 = vadd.f32 %v657_v13, %v635_v12  ;;  %v678_v10 = vadd.f32 %v677_v61, %v634_v55  ;;  %v645_v12 = vmul.f32 %v613_v43, %v613_v43 }
 0x150   : > { %v659_v31 = vadd.f32 %v658_v19, %v637_v18  ;;  %v679_v16 = vadd.f32 %v678_v10, %v636_v8  ;;  %v612_v19 = vsub.f32 %v1569_v51, %v1626_v9  ;;  %v650_v8 = vmul.f32 %v618_v52, %v618_v52 }
 0x152   : > { %v660_v49 = vadd.f32 %v659_v31, %v639_v24  ;;  %v680_v21 = vadd.f32 %v679_v16, %v638_v15  ;;  %v614_v24 = vsub.f32 %v1579_v57, %v1626_v9  ;;  %v642_v31 = vmul.f32 %v610_v14, %v610_v14 }
 0x153   : > { %v644_v43 = vmul.f32 %v612_v19, %v612_v19 }
 0x154   : > { %v661_v6 = vadd.f32 %v660_v49, %v641_v46  ;;  %v681_v34 = vadd.f32 %v680_v21, %v640_v20  ;;  %v646_v55 = vmul.f32 %v614_v24, %v614_v24 }
 0x156   : > { %v662_v13 = vadd.f32 %v661_v6, %v643_v3  ;;  %v682_v46 = vadd.f32 %v681_v34, %v642_v31  ;;  %v648_v3 = vmul.f32 %v616_v40, %v616_v40  ;;  %v1382_v31 = vmov 1966171168  }
 0x157   : > { %v704_v34 = vunpack.c.l.s4 %v1382_v31 }
 0x158   : > { %v663_v18 = vadd.f32 %v662_v13, %v645_v12  ;;  %v683_v61 = vadd.f32 %v682_v46, %v644_v43 }
 0x159   : > { %v705_v40 = vunpack.c.0.s8 %v704_v34 }
 0x15a   : > { %v664_v23 = vadd.f32 %v663_v18, %v647_v17  ;;  %v684_v6 = vadd.f32 %v683_v61, %v646_v55 }
 0x15c   : > { %v665_v37 = vadd.f32 %v664_v23, %v649_v22  ;;  %v685_v10 = vadd.f32 %v684_v6, %v648_v3 }
 0x15e   : > { %v666_v49 = vrot.slane %v665_v37, 4  ;;  %v686_v12 = vadd.f32 %v685_v10, %v650_v8 }
 0x160   : > { %v667_v0 = vadd.f32 %v666_v49, %v665_v37  ;;  %v687_v14 = vrot.slane %v686_v12, 4  ;;  %v706_v37 = vlaneseq }
 0x162   : > { %v668_v7 = vrot.slane %v667_v0, 2  ;;  %v688_v16 = vadd.f32 %v687_v14, %v686_v12  ;;  %v707_v43 = vshrl.u32 %v706_v37, 7 }
 0x164   : > { %v669_v11 = vadd.f32 %v668_v7, %v667_v0  ;;  %v689_v17 = vrot.slane %v688_v16, 2  ;;  %v708_v49 = vsub.s32 %v705_v40, %v707_v43  ;;  %v695_v0 = vld [vmem:[%s1811_s2] sm:$0x3]  ;;  %v723_v6 = vsub.s32 0, %v707_v43 }
 0x165   : > { %v727_v7 = vsub.s32 1, %v707_v43 }
 0x166   : > { %v670_v13 = vrot.slane %v669_v11, 1  ;;  %v690_v19 = vadd.f32 %v689_v17, %v688_v16 }
 0x168   : > { %v671_v15 = vadd.f32 %v670_v13, %v669_v11  ;;  %v691_v20 = vrot.slane %v690_v19, 1 }
 0x16a   : > { %v693_v18 = vmul.f32 0.0078125, %v671_v15  ;;  %v692_v22 = vadd.f32 %v691_v20, %v690_v19 }
 0x16c   : > { %v696_v21 = vadd.f32 1e-05, %v693_v18  ;;  %v694_v23 = vmul.f32 0.0078125, %v692_v22 }
 0x16e   : > { %1337 = vrsqrt.f32 %v696_v21  ;;  %v697_v24 = vadd.f32 1e-05, %v694_v23 }
 0x170   : > { %1339 = vrsqrt.f32 %v697_v24 }
 0x178   : > { %v1338_v46 = vpop.eup %1337 }
 0x17a   : > { %v1340_v52 = vpop.eup %1339 }
 0x17b   : > { %v702_v55 = vcombine.low %v1338_v46, %v1340_v52 }
 0x17d   : > { %v709_v61 = vrot.slane %v702_v55, %v708_v49 }
 0x17f   : > { %v716_v3 = vrot.slane %v709_v61, %v708_v49 }
 0x181   : > { %v718_v8 = vmul.f32 %v716_v3, %v695_v0 }
 0x183   : > { %v724_v10 = vrot.slane %v718_v8, %v723_v6  ;;  %v728_v11 = vrot.slane %v718_v8, %v727_v7 }
 0x185   : > { %v731_v12 = vmul.f32 %v724_v10, %v1618_v58  ;;  %v732_v13 = vmul.f32 %v728_v11, %v1626_v9  ;;  %v752_v14 = vmul.f32 %v724_v10, %v1522_v25  ;;  %v753_v15 = vmul.f32 %v728_v11, %v1526_v27 }
 0x186   : > { %v754_v16 = vmul.f32 %v724_v10, %v1530_v29  ;;  %v755_v17 = vmul.f32 %v728_v11, %v1536_v32  ;;  %v756_v18 = vmul.f32 %v724_v10, %v1542_v35  ;;  %v757_v19 = vmul.f32 %v728_v11, %v1547_v38 }
 0x187   : > { %v735_v20 = vcombine.low %v731_v12, %v732_v13  ;;  %v758_v21 = vmul.f32 %v724_v10, %v1552_v41  ;;  %v759_v22 = vmul.f32 %v728_v11, %v1557_v44  ;;  %v760_v58 = vmul.f32 %v724_v10, %v1562_v47  ;;  %v719_v41 = vld [vmem:[%s1812_s3] sm:$0x3] }
 0x188   : > { %v761_v9 = vmul.f32 %v728_v11, %v1567_v50  ;;  %v762_v25 = vmul.f32 %v724_v10, %v1572_v53  ;;  %v763_v27 = vmul.f32 %v728_v11, %v1577_v56  ;;  %v764_v29 = vmul.f32 %v724_v10, %v1582_v59 }
 0x189   : > { %v742_v32 = vrot.slane %v735_v20, %v708_v49  ;;  %v765_v35 = vmul.f32 %v728_v11, %v1587_v62  ;;  %v766_v38 = vmul.f32 %v724_v10, %v1592_v1  ;;  %v767_v23 = vmul.f32 %v728_v11, %v1597_v4 }
 0x18a   : > { %v768_v44 = vmul.f32 %v724_v10, %v1524_v26  ;;  %v769_v47 = vmul.f32 %v728_v11, %v1528_v28  ;;  %v770_v50 = vmul.f32 %v724_v10, %v1532_v30  ;;  %v771_v53 = vmul.f32 %v728_v11, %v1538_v33 }
 0x18b   : > { %v749_v56 = vrot.slane %v742_v32, %v708_v49  ;;  %v772_v59 = vmul.f32 %v724_v10, %v1544_v36  ;;  %v773_v62 = vmul.f32 %v728_v11, %v1549_v39  ;;  %v774_v1 = vmul.f32 %v724_v10, %v1554_v42 }
 0x18c   : > { %v775_v4 = vmul.f32 %v728_v11, %v1559_v45  ;;  %v776_v24 = vmul.f32 %v724_v10, %v1564_v48  ;;  %v777_v31 = vmul.f32 %v728_v11, %v1569_v51  ;;  %v778_v26 = vmul.f32 %v724_v10, %v1574_v54 }
 0x18d   : > { %v751_v28 = vsub.f32 %v719_v41, %v749_v56  ;;  %v779_v30 = vmul.f32 %v728_v11, %v1579_v57  ;;  %v780_v33 = vmul.f32 %v724_v10, %v1584_v60  ;;  %v781_v34 = vmul.f32 %v728_v11, %v1589_v63 }
 0x18e   : > { %v782_v36 = vmul.f32 %v724_v10, %v1594_v2  ;;  %v783_v39 = vmul.f32 %v728_v11, %v1599_v5 }
 0x18f   : > { %v788_v42 = vrot.slane %v751_v28, %v723_v6  ;;  %v792_v37 = vrot.slane %v751_v28, %v727_v7 }
 0x191   : > { %v1726_v45 = vadd.f32 %v788_v42, %v752_v14  ;;  %v1728_v48 = vadd.f32 %v792_v37, %v753_v15  ;;  %v1730_v51 = vadd.f32 %v788_v42, %v754_v16  ;;  %v1732_v54 = vadd.f32 %v792_v37, %v755_v17 }
 0x192   : > { %v1734_v40 = vadd.f32 %v788_v42, %v756_v18  ;;  %v1736_v57 = vadd.f32 %v792_v37, %v757_v19  ;;  %v1738_v60 = vadd.f32 %v788_v42, %v758_v21  ;;  %v1740_v63 = vadd.f32 %v792_v37, %v759_v22 }
 0x193   : > { %v1742_v2 = vadd.f32 %v788_v42, %v760_v58  ;;  %v804_v5 = vadd.f32 %v792_v37, %v761_v9  ;;  %v805_v43 = vadd.f32 %v788_v42, %v762_v25  ;;  %v806_v46 = vadd.f32 %v792_v37, %v763_v27 }
 0x194   : > { %v807_v49 = vadd.f32 %v788_v42, %v764_v29  ;;  %v808_v52 = vadd.f32 %v792_v37, %v765_v35  ;;  %v809_v55 = vadd.f32 %v788_v42, %v766_v38  ;;  %v810_v61 = vadd.f32 %v792_v37, %v767_v23 }
 0x195   : > { %v811_v0 = vadd.f32 %v788_v42, %v768_v44  ;;  %v812_v3 = vadd.f32 %v792_v37, %v769_v47  ;;  %v813_v6 = vadd.f32 %v788_v42, %v770_v50  ;;  %v814_v7 = vadd.f32 %v792_v37, %v771_v53 }
 0x196   : > { %v815_v8 = vadd.f32 %v788_v42, %v772_v59  ;;  %v816_v10 = vadd.f32 %v792_v37, %v773_v62  ;;  %v817_v11 = vadd.f32 %v788_v42, %v774_v1  ;;  %v818_v12 = vadd.f32 %v792_v37, %v775_v4 }
 0x197   : > { %v819_v13 = vadd.f32 %v788_v42, %v776_v24  ;;  %v820_v14 = vadd.f32 %v792_v37, %v777_v31  ;;  %v821_v15 = vadd.f32 %v788_v42, %v778_v26  ;;  %v822_v16 = vadd.f32 %v792_v37, %v779_v30 }
 0x198   : > { %v823_v17 = vadd.f32 %v788_v42, %v780_v33  ;;  %v824_v18 = vadd.f32 %v792_v37, %v781_v34  ;;  %v825_v19 = vadd.f32 %v788_v42, %v782_v36  ;;  %v826_v20 = vadd.f32 %v792_v37, %v783_v39 }
 0x199   : > { %v827_v21 = vmax.f32 %v1726_v45, 0.0  ;;  %v828_v22 = vmax.f32 %v1728_v48, 0.0  ;;  %v829_v58 = vmax.f32 %v1730_v51, 0.0  ;;  %v830_v9 = vmax.f32 %v1732_v54, 0.0 }
 0x19a   : > { %v831_v25 = vmax.f32 %v1734_v40, 0.0  ;;  %v832_v27 = vmax.f32 %v1736_v57, 0.0  ;;  %v833_v29 = vmax.f32 %v1738_v60, 0.0  ;;  %v834_v32 = vmax.f32 %v1740_v63, 0.0 }
 0x19b   : > { %v835_v35 = vmax.f32 %v1742_v2, 0.0  ;;  %v836_v38 = vmax.f32 %v804_v5, 0.0  ;;  %v837_v23 = vmax.f32 %v805_v43, 0.0  ;;  %v838_v41 = vmax.f32 %v806_v46, 0.0 }
 0x19c   : > { %v839_v44 = vmax.f32 %v807_v49, 0.0  ;;  %v840_v47 = vmax.f32 %v808_v52, 0.0  ;;  %v841_v50 = vmax.f32 %v809_v55, 0.0  ;;  %v842_v53 = vmax.f32 %v810_v61, 0.0 }
 0x19d   : > { %v843_v56 = vmax.f32 %v811_v0, 0.0  ;;  %v844_v59 = vmax.f32 %v812_v3, 0.0  ;;  %v845_v62 = vmax.f32 %v813_v6, 0.0  ;;  %v846_v1 = vmax.f32 %v814_v7, 0.0 }
 0x19e   : > { %v847_v4 = vmax.f32 %v815_v8, 0.0  ;;  %v848_v24 = vmax.f32 %v816_v10, 0.0  ;;  %v849_v31 = vmax.f32 %v817_v11, 0.0  ;;  %v850_v26 = vmax.f32 %v818_v12, 0.0 }
 0x19f   : > { %v851_v28 = vmax.f32 %v819_v13, 0.0  ;;  %v852_v30 = vmax.f32 %v820_v14, 0.0  ;;  %v853_v33 = vmax.f32 %v821_v15, 0.0  ;;  %v854_v34 = vmax.f32 %v822_v16, 0.0 }
 0x1a0   : > { %v855_v36 = vmax.f32 %v823_v17, 0.0  ;;  %v856_v39 = vmax.f32 %v824_v18, 0.0  ;;  %v857_v42 = vmax.f32 %v825_v19, 0.0  ;;  %v858_v37 = vmax.f32 %v826_v20, 0.0 }
 0x1a1   : > { %v1230_v45 = vpack.c.bf16 %v828_v22, %v827_v21  ;;  %v1231_v48 = vpack.c.bf16 %v830_v9, %v829_v58  ;;  %v1232_v51 = vpack.c.bf16 %v832_v27, %v831_v25  ;;  %v1233_v54 = vpack.c.bf16 %v834_v32, %v833_v29 }
 0x1a2   : > { %v1234_v40 = vpack.c.bf16 %v836_v38, %v835_v35  ;;  %v1235_v57 = vpack.c.bf16 %v838_v41, %v837_v23  ;;  %v1236_v60 = vpack.c.bf16 %v840_v47, %v839_v44  ;;  %v1237_v63 = vpack.c.bf16 %v842_v53, %v841_v50 }
 0x1a3   : > { %v1238_v2 = vpack.c.bf16 %v844_v59, %v843_v56  ;;  %v1239_v5 = vpack.c.bf16 %v846_v1, %v845_v62  ;;  %v1240_v43 = vpack.c.bf16 %v848_v24, %v847_v4  ;;  %v1241_v46 = vpack.c.bf16 %v850_v26, %v849_v31  ;;  %955 = vst [vmem:[%s1754_s15] sm:$0xff] %v1230_v45 }
 0x1a4   : > { %956 = vst [vmem:[%s1754_s15 + $0x8] sm:$0xff] %v1231_v48  ;;  %957 = vst [vmem:[%s1754_s15 + $0x10] sm:$0xff] %v1232_v51  ;;  %v1242_v49 = vpack.c.bf16 %v852_v30, %v851_v28  ;;  %v1243_v52 = vpack.c.bf16 %v854_v34, %v853_v33  ;;  %v1244_v55 = vpack.c.bf16 %v856_v39, %v855_v36 }
 0x1a5   : > { %958 = vst [vmem:[%s1754_s15 + $0x18] sm:$0xff] %v1233_v54  ;;  %v1245_v61 = vpack.c.bf16 %v858_v37, %v857_v42  ;;  %959 = vst [vmem:[%s1754_s15 + $0x20] sm:$0xff] %v1234_v40  ;;  %977 = sbr.rel (!%p1440_p3) target bundleno = 436 (0x1b4), region = 40 }
 0x1a6   : > { %960 = vst [vmem:[%s1754_s15 + $0x28] sm:$0xff] %v1235_v57  ;;  %961 = vst [vmem:[%s1754_s15 + $0x30] sm:$0xff] %v1236_v60 }
 0x1a7   : > { %962 = vst [vmem:[%s1754_s15 + $0x38] sm:$0xff] %v1237_v63  ;;  %963 = vst [vmem:[%s1754_s15 + $0x40] sm:$0xff] %v1238_v2 }
 0x1a8   : > { %964 = vst [vmem:[%s1754_s15 + $0x48] sm:$0xff] %v1239_v5  ;;  %965 = vst [vmem:[%s1754_s15 + $0x50] sm:$0xff] %v1240_v43 }
 0x1a9   : > { %966 = vst [vmem:[%s1754_s15 + $0x58] sm:$0xff] %v1241_v46  ;;  %967 = vst [vmem:[%s1754_s15 + $0x60] sm:$0xff] %v1242_v49 }
 0x1aa   : > { %968 = vst [vmem:[%s1754_s15 + $0x68] sm:$0xff] %v1243_v52  ;;  %969 = vst [vmem:[%s1754_s15 + $0x70] sm:$0xff] %v1244_v55  ;;  %v1039_v0 = vld [vmem:[%s1754_s15] sm:$0xff] (%p1440_p3) }
 0x1ab   : > { %970 = vst [vmem:[%s1754_s15 + $0x78] sm:$0xff] %v1245_v61  ;;  %v1041_v3 = vld [vmem:[%s1754_s15 + $0x8] sm:$0xff] (%p1440_p3)  ;;  %v1043_v6 = vld [vmem:[%s1754_s15 + $0x10] sm:$0xff] (%p1440_p3)  ;;  %1040 = vst [vmem:[%s981_s10] sm:$0xff] (%p1440_p3), %v1039_v0 }
 0x1ac   : > { %v1045_v7 = vld [vmem:[%s1754_s15 + $0x18] sm:$0xff]  ;;  %v1047_v8 = vld [vmem:[%s1754_s15 + $0x20] sm:$0xff]  ;;  %1042 = vst [vmem:[%s981_s10 + $0x20] sm:$0xff] %v1041_v3  ;;  %1044 = vst [vmem:[%s981_s10 + $0x40] sm:$0xff] %v1043_v6 }
 0x1ad   : > { %v1049_v10 = vld [vmem:[%s1754_s15 + $0x28] sm:$0xff]  ;;  %1046 = vst [vmem:[%s981_s10 + $0x60] sm:$0xff] %v1045_v7  ;;  %1048 = vst [vmem:[%s981_s10 + $0x80] sm:$0xff] %v1047_v8  ;;  %v1051_v11 = vld [vmem:[%s1754_s15 + $0x30] sm:$0xff] }
 0x1ae   : > { %1050 = vst [vmem:[%s981_s10 + $0xa0] sm:$0xff] %v1049_v10  ;;  %v1053_v12 = vld [vmem:[%s1754_s15 + $0x38] sm:$0xff]  ;;  %v1055_v13 = vld [vmem:[%s1754_s15 + $0x40] sm:$0xff]  ;;  %1052 = vst [vmem:[%s981_s10 + $0xc0] sm:$0xff] %v1051_v11 }
 0x1af   : > { %1054 = vst [vmem:[%s981_s10 + $0xe0] sm:$0xff] %v1053_v12  ;;  %1056 = vst [vmem:[%s981_s10 + $0x100] sm:$0xff] %v1055_v13  ;;  %v1057_v14 = vld [vmem:[%s1754_s15 + $0x48] sm:$0xff]  ;;  %v1059_v15 = vld [vmem:[%s1754_s15 + $0x50] sm:$0xff] }
 0x1b0   : > { %v1061_v16 = vld [vmem:[%s1754_s15 + $0x58] sm:$0xff]  ;;  %1058 = vst [vmem:[%s981_s10 + $0x120] sm:$0xff] %v1057_v14  ;;  %1060 = vst [vmem:[%s981_s10 + $0x140] sm:$0xff] %v1059_v15  ;;  %v1063_v17 = vld [vmem:[%s1754_s15 + $0x60] sm:$0xff] }
 0x1b1   : > { %1062 = vst [vmem:[%s981_s10 + $0x160] sm:$0xff] %v1061_v16  ;;  %v1065_v18 = vld [vmem:[%s1754_s15 + $0x68] sm:$0xff]  ;;  %v1067_v19 = vld [vmem:[%s1754_s15 + $0x70] sm:$0xff]  ;;  %1064 = vst [vmem:[%s981_s10 + $0x180] sm:$0xff] %v1063_v17 }
 0x1b2   : > { %1066 = vst [vmem:[%s981_s10 + $0x1a0] sm:$0xff] %v1065_v18  ;;  %1068 = vst [vmem:[%s981_s10 + $0x1c0] sm:$0xff] %v1067_v19  ;;  %v1069_v20 = vld [vmem:[%s1754_s15 + $0x78] sm:$0xff] }
 0x1b3   : > { %1070 = vst [vmem:[%s981_s10 + $0x1e0] sm:$0xff] %v1069_v20 }
 0x1b4 PF: > { %s14_s19 = sadd.s32 1, %s1379_s19   ;;  %s1815_s15 = smov %s1367_s16 }
 0x1b5   : > { %p11_p9 = scmp.ge.s32.totalorder %s14_s19, 6   ;;  %s1816_s16 = smov %s1449_s25 }
 0x1b6   : > { %s1817_s17 = smov %s1375_s18  ;;  %s1818_s18 = smov %s1820_s21 }
 0x1b7   :  { %13 = sbr.rel (!%p11_p9) target bundleno = 3 (0x3), region = 113 }

// kernel: mmnet_forward.5
= control target key start
LH: loop header
LB: loop body
LE: loop exit
PB: predicated region body
PF: predicated region fallthrough
CT: control target
= control target key end

     0   :  { %9 = vsyncpa [#allocation4], 0  ;;  %s4472_s0 = inlined_call_operand.vmem [shape: bf16[128,1024], index: 0, kind: input, shape index: {}]   ;;  %s4473_s1 = inlined_call_operand.vmem [shape: bf16[1024,1024], index: 1, kind: input, shape index: {}]   ;;  %s4474_s2 = inlined_call_operand.vmem [shape: f32[1,1024], index: 2, kind: input, shape index: {}]   ;;  %s4475_s3 = inlined_call_operand.vmem [shape: f32[1,1024], index: 3, kind: input, shape index: {}]   ;;  %s4476_s4 = inlined_call_operand.hbm [shape: f32[128,1024], index: 4, kind: output, shape index: {}]  }
   0x1   :  { %11 = vsyncpa [#allocation4 + $0x1], 0  ;;  %s3471_s15 = smov 0   ;;  %s3473_s16 = smov 0  }
   0x2   :  { %s3475_s17 = smov 0   ;;  %s3477_s18 = smov 0  }
   0x3 LB: > { %s3492_s19 = sadd.s32 4294967295, %s3439_s18   ;;  %s2832_s20 = sadd.s32 4294967294, %s3439_s18   ;;  %s3439_s18 = sphi %s3477_s18, %s4482_s18   ;;  %s3435_s17 = sphi %s3475_s17, %s4481_s17   ;;  %s3431_s16 = sphi %s3473_s16, %s4480_s16   ;;  %s3427_s15 = sphi %s3471_s15, %s4479_s15  }
   0x4   : > { %s3496_s21 = sadd.s32 1, %s3439_s18   ;;  %s45_s22 = sadd.s32 1, %s3435_s17 }
   0x5   : > { %s42_s23 = ssub.s32 %s3439_s18, %s3496_s21  ;;  %p52_p0 = scmp.ne.s32.totalorder %s3435_s17, %s3431_s16 }
   0x6   : > { %p43_p1 = scmp.eq.s32.totalorder %s42_s23, 0  ;;  %p53_p2 = scmp.eq.s32.totalorder %s3439_s18, 0 }
   0x7   : > { %p134_p3 = scmp.eq.s32.totalorder %s3492_s19, 3  ;;  %p139_p4 = scmp.ne.s32.totalorder %s3431_s16, %s3427_s15 }
   0x8   : > { %s3508_s24 = scalar_select %p43_p1, %s3435_s17, %s45_s22  }
   0x9   : > { %p54_p5 = por %p53_p2, %p52_p0  ;;  %p3510_p6 = por %p134_p3, %p52_p0 }
   0xa   : > { %p140_p7 = scmp.eq.s32.totalorder %s2832_s20, 3  ;;  %p2834_p9 = scmp.ge.s32.totalorder %s3439_s18, 4 }
   0xc   : > { %p3514_p8 = por %p140_p7, %p139_p4  ;;  %159 = sbr.rel (%p2834_p9) target bundleno = 151 (0x97), region = 20 }
  0x13   : > { %162 = sbr.rel (!%p54_p5) target bundleno = 151 (0x97), region = 24  ;;  %s164_s27 = sand.u32 (%p54_p5), 1, %s3435_s17  }
  0x14   : > { %s3040_s28 = sshll.u32 (%p54_p5), %s3439_s18, 3  ;;  %s2835_s29 = sshll.u32 (%p54_p5), %s164_s27, 10 }
  0x15   : > { %s3524_s6 = scalar_lea.vmem (%p54_p5), %s4473_s1, %s3040_s28  ;;  %s3529_s7 = scalar_lea.vmem (%p54_p5), [#allocation2], %s2835_s29 }
  0x16   : > { %v451_v0 = vld [vmem:[%s3524_s6] sm:$0xff] (%p54_p5) }
  0x17   : > { %v453_v1 = vld [vmem:[%s3524_s6 + $0x20] sm:$0xff] (%p54_p5)  ;;  %452 = vst [vmem:[%s3529_s7] sm:$0xff] (%p54_p5), %v451_v0 }
  0x18   : > { %v455_v2 = vld [vmem:[%s3524_s6 + $0x40] sm:$0xff] (%p54_p5)  ;;  %454 = vst [vmem:[%s3529_s7 + $0x8] sm:$0xff] (%p54_p5), %v453_v1 }
  0x19   : > { %456 = vst [vmem:[%s3529_s7 + $0x10] sm:$0xff] (%p54_p5), %v455_v2  ;;  %v457_v3 = vld [vmem:[%s3524_s6 + $0x60] sm:$0xff] (%p54_p5) }
  0x1a   : > { %v459_v4 = vld [vmem:[%s3524_s6 + $0x80] sm:$0xff]  ;;  %458 = vst [vmem:[%s3529_s7 + $0x18] sm:$0xff] %v457_v3 }
  0x1b   : > { %v461_v5 = vld [vmem:[%s3524_s6 + $0xa0] sm:$0xff]  ;;  %460 = vst [vmem:[%s3529_s7 + $0x20] sm:$0xff] %v459_v4 }
  0x1c   : > { %462 = vst [vmem:[%s3529_s7 + $0x28] sm:$0xff] %v461_v5  ;;  %v463_v6 = vld [vmem:[%s3524_s6 + $0xc0] sm:$0xff] }
  0x1d   : > { %v465_v7 = vld [vmem:[%s3524_s6 + $0xe0] sm:$0xff]  ;;  %464 = vst [vmem:[%s3529_s7 + $0x30] sm:$0xff] %v463_v6 }
  0x1e   : > { %v467_v8 = vld [vmem:[%s3524_s6 + $0x100] sm:$0xff]  ;;  %466 = vst [vmem:[%s3529_s7 + $0x38] sm:$0xff] %v465_v7 }
  0x1f   : > { %468 = vst [vmem:[%s3529_s7 + $0x40] sm:$0xff] %v467_v8  ;;  %v469_v9 = vld [vmem:[%s3524_s6 + $0x120] sm:$0xff] }
  0x20   : > { %v471_v10 = vld [vmem:[%s3524_s6 + $0x140] sm:$0xff]  ;;  %470 = vst [vmem:[%s3529_s7 + $0x48] sm:$0xff] %v469_v9 }
  0x21   : > { %v473_v11 = vld [vmem:[%s3524_s6 + $0x160] sm:$0xff]  ;;  %472 = vst [vmem:[%s3529_s7 + $0x50] sm:$0xff] %v471_v10 }
  0x22   : > { %474 = vst [vmem:[%s3529_s7 + $0x58] sm:$0xff] %v473_v11  ;;  %v475_v12 = vld [vmem:[%s3524_s6 + $0x180] sm:$0xff] }
  0x23   : > { %v477_v13 = vld [vmem:[%s3524_s6 + $0x1a0] sm:$0xff]  ;;  %476 = vst [vmem:[%s3529_s7 + $0x60] sm:$0xff] %v475_v12 }
  0x24   : > { %v479_v14 = vld [vmem:[%s3524_s6 + $0x1c0] sm:$0xff]  ;;  %478 = vst [vmem:[%s3529_s7 + $0x68] sm:$0xff] %v477_v13 }
  0x25   : > { %480 = vst [vmem:[%s3529_s7 + $0x70] sm:$0xff] %v479_v14  ;;  %v481_v15 = vld [vmem:[%s3524_s6 + $0x1e0] sm:$0xff] }
  0x26   : > { %v483_v16 = vld [vmem:[%s3524_s6 + $0x200] sm:$0xff]  ;;  %482 = vst [vmem:[%s3529_s7 + $0x78] sm:$0xff] %v481_v15 }
  0x27   : > { %v485_v17 = vld [vmem:[%s3524_s6 + $0x220] sm:$0xff]  ;;  %484 = vst [vmem:[%s3529_s7 + $0x80] sm:$0xff] %v483_v16 }
  0x28   : > { %486 = vst [vmem:[%s3529_s7 + $0x88] sm:$0xff] %v485_v17  ;;  %v487_v18 = vld [vmem:[%s3524_s6 + $0x240] sm:$0xff] }
  0x29   : > { %v489_v19 = vld [vmem:[%s3524_s6 + $0x260] sm:$0xff]  ;;  %488 = vst [vmem:[%s3529_s7 + $0x90] sm:$0xff] %v487_v18 }
  0x2a   : > { %v491_v20 = vld [vmem:[%s3524_s6 + $0x280] sm:$0xff]  ;;  %490 = vst [vmem:[%s3529_s7 + $0x98] sm:$0xff] %v489_v19 }
  0x2b   : > { %492 = vst [vmem:[%s3529_s7 + $0xa0] sm:$0xff] %v491_v20  ;;  %v493_v21 = vld [vmem:[%s3524_s6 + $0x2a0] sm:$0xff] }
  0x2c   : > { %v495_v22 = vld [vmem:[%s3524_s6 + $0x2c0] sm:$0xff]  ;;  %494 = vst [vmem:[%s3529_s7 + $0xa8] sm:$0xff] %v493_v21 }
  0x2d   : > { %v497_v23 = vld [vmem:[%s3524_s6 + $0x2e0] sm:$0xff]  ;;  %496 = vst [vmem:[%s3529_s7 + $0xb0] sm:$0xff] %v495_v22 }
  0x2e   : > { %498 = vst [vmem:[%s3529_s7 + $0xb8] sm:$0xff] %v497_v23  ;;  %v499_v24 = vld [vmem:[%s3524_s6 + $0x300] sm:$0xff] }
  0x2f   : > { %v501_v25 = vld [vmem:[%s3524_s6 + $0x320] sm:$0xff]  ;;  %500 = vst [vmem:[%s3529_s7 + $0xc0] sm:$0xff] %v499_v24 }
  0x30   : > { %v503_v26 = vld [vmem:[%s3524_s6 + $0x340] sm:$0xff]  ;;  %502 = vst [vmem:[%s3529_s7 + $0xc8] sm:$0xff] %v501_v25 }
  0x31   : > { %504 = vst [vmem:[%s3529_s7 + $0xd0] sm:$0xff] %v503_v26  ;;  %v505_v27 = vld [vmem:[%s3524_s6 + $0x360] sm:$0xff] }
  0x32   : > { %v507_v28 = vld [vmem:[%s3524_s6 + $0x380] sm:$0xff]  ;;  %506 = vst [vmem:[%s3529_s7 + $0xd8] sm:$0xff] %v505_v27 }
  0x33   : > { %v509_v29 = vld [vmem:[%s3524_s6 + $0x3a0] sm:$0xff]  ;;  %508 = vst [vmem:[%s3529_s7 + $0xe0] sm:$0xff] %v507_v28 }
  0x34   : > { %510 = vst [vmem:[%s3529_s7 + $0xe8] sm:$0xff] %v509_v29  ;;  %v511_v30 = vld [vmem:[%s3524_s6 + $0x3c0] sm:$0xff] }
  0x35   : > { %v513_v31 = vld [vmem:[%s3524_s6 + $0x3e0] sm:$0xff]  ;;  %512 = vst [vmem:[%s3529_s7 + $0xf0] sm:$0xff] %v511_v30 }
  0x36   : > { %v515_v32 = vld [vmem:[%s3524_s6 + $0x400] sm:$0xff]  ;;  %514 = vst [vmem:[%s3529_s7 + $0xf8] sm:$0xff] %v513_v31 }
  0x37   : > { %516 = vst [vmem:[%s3529_s7 + $0x100] sm:$0xff] %v515_v32  ;;  %v517_v33 = vld [vmem:[%s3524_s6 + $0x420] sm:$0xff] }
  0x38   : > { %v519_v34 = vld [vmem:[%s3524_s6 + $0x440] sm:$0xff]  ;;  %518 = vst [vmem:[%s3529_s7 + $0x108] sm:$0xff] %v517_v33 }
  0x39   : > { %v521_v35 = vld [vmem:[%s3524_s6 + $0x460] sm:$0xff]  ;;  %520 = vst [vmem:[%s3529_s7 + $0x110] sm:$0xff] %v519_v34 }
  0x3a   : > { %522 = vst [vmem:[%s3529_s7 + $0x118] sm:$0xff] %v521_v35  ;;  %v523_v36 = vld [vmem:[%s3524_s6 + $0x480] sm:$0xff] }
  0x3b   : > { %v525_v37 = vld [vmem:[%s3524_s6 + $0x4a0] sm:$0xff]  ;;  %524 = vst [vmem:[%s3529_s7 + $0x120] sm:$0xff] %v523_v36 }
  0x3c   : > { %v527_v38 = vld [vmem:[%s3524_s6 + $0x4c0] sm:$0xff]  ;;  %526 = vst [vmem:[%s3529_s7 + $0x128] sm:$0xff] %v525_v37 }
  0x3d   : > { %528 = vst [vmem:[%s3529_s7 + $0x130] sm:$0xff] %v527_v38  ;;  %v529_v39 = vld [vmem:[%s3524_s6 + $0x4e0] sm:$0xff] }
  0x3e   : > { %v531_v40 = vld [vmem:[%s3524_s6 + $0x500] sm:$0xff]  ;;  %530 = vst [vmem:[%s3529_s7 + $0x138] sm:$0xff] %v529_v39 }
  0x3f   : > { %v533_v41 = vld [vmem:[%s3524_s6 + $0x520] sm:$0xff]  ;;  %532 = vst [vmem:[%s3529_s7 + $0x140] sm:$0xff] %v531_v40 }
  0x40   : > { %534 = vst [vmem:[%s3529_s7 + $0x148] sm:$0xff] %v533_v41  ;;  %v535_v42 = vld [vmem:[%s3524_s6 + $0x540] sm:$0xff] }
  0x41   : > { %v537_v43 = vld [vmem:[%s3524_s6 + $0x560] sm:$0xff]  ;;  %536 = vst [vmem:[%s3529_s7 + $0x150] sm:$0xff] %v535_v42 }
  0x42   : > { %v539_v44 = vld [vmem:[%s3524_s6 + $0x580] sm:$0xff]  ;;  %538 = vst [vmem:[%s3529_s7 + $0x158] sm:$0xff] %v537_v43 }
  0x43   : > { %540 = vst [vmem:[%s3529_s7 + $0x160] sm:$0xff] %v539_v44  ;;  %v541_v45 = vld [vmem:[%s3524_s6 + $0x5a0] sm:$0xff] }
  0x44   : > { %v543_v46 = vld [vmem:[%s3524_s6 + $0x5c0] sm:$0xff]  ;;  %542 = vst [vmem:[%s3529_s7 + $0x168] sm:$0xff] %v541_v45 }
  0x45   : > { %v545_v47 = vld [vmem:[%s3524_s6 + $0x5e0] sm:$0xff]  ;;  %544 = vst [vmem:[%s3529_s7 + $0x170] sm:$0xff] %v543_v46 }
  0x46   : > { %546 = vst [vmem:[%s3529_s7 + $0x178] sm:$0xff] %v545_v47  ;;  %v547_v48 = vld [vmem:[%s3524_s6 + $0x600] sm:$0xff] }
  0x47   : > { %v549_v49 = vld [vmem:[%s3524_s6 + $0x620] sm:$0xff]  ;;  %548 = vst [vmem:[%s3529_s7 + $0x180] sm:$0xff] %v547_v48 }
  0x48   : > { %v551_v50 = vld [vmem:[%s3524_s6 + $0x640] sm:$0xff]  ;;  %550 = vst [vmem:[%s3529_s7 + $0x188] sm:$0xff] %v549_v49 }
  0x49   : > { %552 = vst [vmem:[%s3529_s7 + $0x190] sm:$0xff] %v551_v50  ;;  %v553_v51 = vld [vmem:[%s3524_s6 + $0x660] sm:$0xff] }
  0x4a   : > { %v555_v52 = vld [vmem:[%s3524_s6 + $0x680] sm:$0xff]  ;;  %554 = vst [vmem:[%s3529_s7 + $0x198] sm:$0xff] %v553_v51 }
  0x4b   : > { %v557_v53 = vld [vmem:[%s3524_s6 + $0x6a0] sm:$0xff]  ;;  %556 = vst [vmem:[%s3529_s7 + $0x1a0] sm:$0xff] %v555_v52 }
  0x4c   : > { %558 = vst [vmem:[%s3529_s7 + $0x1a8] sm:$0xff] %v557_v53  ;;  %v559_v54 = vld [vmem:[%s3524_s6 + $0x6c0] sm:$0xff] }
  0x4d   : > { %v561_v55 = vld [vmem:[%s3524_s6 + $0x6e0] sm:$0xff]  ;;  %560 = vst [vmem:[%s3529_s7 + $0x1b0] sm:$0xff] %v559_v54 }
  0x4e   : > { %v563_v56 = vld [vmem:[%s3524_s6 + $0x700] sm:$0xff]  ;;  %562 = vst [vmem:[%s3529_s7 + $0x1b8] sm:$0xff] %v561_v55 }
  0x4f   : > { %564 = vst [vmem:[%s3529_s7 + $0x1c0] sm:$0xff] %v563_v56  ;;  %v565_v57 = vld [vmem:[%s3524_s6 + $0x720] sm:$0xff] }
  0x50   : > { %v567_v58 = vld [vmem:[%s3524_s6 + $0x740] sm:$0xff]  ;;  %566 = vst [vmem:[%s3529_s7 + $0x1c8] sm:$0xff] %v565_v57 }
  0x51   : > { %v569_v59 = vld [vmem:[%s3524_s6 + $0x760] sm:$0xff]  ;;  %568 = vst [vmem:[%s3529_s7 + $0x1d0] sm:$0xff] %v567_v58 }
  0x52   : > { %570 = vst [vmem:[%s3529_s7 + $0x1d8] sm:$0xff] %v569_v59  ;;  %v571_v60 = vld [vmem:[%s3524_s6 + $0x780] sm:$0xff] }
  0x53   : > { %v573_v61 = vld [vmem:[%s3524_s6 + $0x7a0] sm:$0xff]  ;;  %572 = vst [vmem:[%s3529_s7 + $0x1e0] sm:$0xff] %v571_v60 }
  0x54   : > { %v575_v62 = vld [vmem:[%s3524_s6 + $0x7c0] sm:$0xff]  ;;  %574 = vst [vmem:[%s3529_s7 + $0x1e8] sm:$0xff] %v573_v61 }
  0x55   : > { %576 = vst [vmem:[%s3529_s7 + $0x1f0] sm:$0xff] %v575_v62  ;;  %v577_v63 = vld [vmem:[%s3524_s6 + $0x7e0] sm:$0xff] }
  0x56   : > { %v579_v0 = vld [vmem:[%s3524_s6 + $0x800] sm:$0xff]  ;;  %578 = vst [vmem:[%s3529_s7 + $0x1f8] sm:$0xff] %v577_v63 }
  0x57   : > { %v581_v1 = vld [vmem:[%s3524_s6 + $0x820] sm:$0xff]  ;;  %580 = vst [vmem:[%s3529_s7 + $0x200] sm:$0xff] %v579_v0 }
  0x58   : > { %582 = vst [vmem:[%s3529_s7 + $0x208] sm:$0xff] %v581_v1  ;;  %v583_v2 = vld [vmem:[%s3524_s6 + $0x840] sm:$0xff] }
  0x59   : > { %v585_v3 = vld [vmem:[%s3524_s6 + $0x860] sm:$0xff]  ;;  %584 = vst [vmem:[%s3529_s7 + $0x210] sm:$0xff] %v583_v2 }
  0x5a   : > { %v587_v4 = vld [vmem:[%s3524_s6 + $0x880] sm:$0xff]  ;;  %586 = vst [vmem:[%s3529_s7 + $0x218] sm:$0xff] %v585_v3 }
  0x5b   : > { %588 = vst [vmem:[%s3529_s7 + $0x220] sm:$0xff] %v587_v4  ;;  %v589_v5 = vld [vmem:[%s3524_s6 + $0x8a0] sm:$0xff] }
  0x5c   : > { %v591_v6 = vld [vmem:[%s3524_s6 + $0x8c0] sm:$0xff]  ;;  %590 = vst [vmem:[%s3529_s7 + $0x228] sm:$0xff] %v589_v5 }
  0x5d   : > { %v593_v7 = vld [vmem:[%s3524_s6 + $0x8e0] sm:$0xff]  ;;  %592 = vst [vmem:[%s3529_s7 + $0x230] sm:$0xff] %v591_v6 }
  0x5e   : > { %594 = vst [vmem:[%s3529_s7 + $0x238] sm:$0xff] %v593_v7  ;;  %v595_v8 = vld [vmem:[%s3524_s6 + $0x900] sm:$0xff] }
  0x5f   : > { %v597_v9 = vld [vmem:[%s3524_s6 + $0x920] sm:$0xff]  ;;  %596 = vst [vmem:[%s3529_s7 + $0x240] sm:$0xff] %v595_v8 }
  0x60   : > { %v599_v10 = vld [vmem:[%s3524_s6 + $0x940] sm:$0xff]  ;;  %598 = vst [vmem:[%s3529_s7 + $0x248] sm:$0xff] %v597_v9 }
  0x61   : > { %600 = vst [vmem:[%s3529_s7 + $0x250] sm:$0xff] %v599_v10  ;;  %v601_v11 = vld [vmem:[%s3524_s6 + $0x960] sm:$0xff] }
  0x62   : > { %v603_v12 = vld [vmem:[%s3524_s6 + $0x980] sm:$0xff]  ;;  %602 = vst [vmem:[%s3529_s7 + $0x258] sm:$0xff] %v601_v11 }
  0x63   : > { %v605_v13 = vld [vmem:[%s3524_s6 + $0x9a0] sm:$0xff]  ;;  %604 = vst [vmem:[%s3529_s7 + $0x260] sm:$0xff] %v603_v12 }
  0x64   : > { %606 = vst [vmem:[%s3529_s7 + $0x268] sm:$0xff] %v605_v13  ;;  %v607_v14 = vld [vmem:[%s3524_s6 + $0x9c0] sm:$0xff] }
  0x65   : > { %v609_v15 = vld [vmem:[%s3524_s6 + $0x9e0] sm:$0xff]  ;;  %608 = vst [vmem:[%s3529_s7 + $0x270] sm:$0xff] %v607_v14 }
  0x66   : > { %v611_v16 = vld [vmem:[%s3524_s6 + $0xa00] sm:$0xff]  ;;  %610 = vst [vmem:[%s3529_s7 + $0x278] sm:$0xff] %v609_v15 }
  0x67   : > { %612 = vst [vmem:[%s3529_s7 + $0x280] sm:$0xff] %v611_v16  ;;  %v613_v17 = vld [vmem:[%s3524_s6 + $0xa20] sm:$0xff] }
  0x68   : > { %v615_v18 = vld [vmem:[%s3524_s6 + $0xa40] sm:$0xff]  ;;  %614 = vst [vmem:[%s3529_s7 + $0x288] sm:$0xff] %v613_v17 }
  0x69   : > { %v617_v19 = vld [vmem:[%s3524_s6 + $0xa60] sm:$0xff]  ;;  %616 = vst [vmem:[%s3529_s7 + $0x290] sm:$0xff] %v615_v18 }
  0x6a   : > { %618 = vst [vmem:[%s3529_s7 + $0x298] sm:$0xff] %v617_v19  ;;  %v619_v20 = vld [vmem:[%s3524_s6 + $0xa80] sm:$0xff] }
  0x6b   : > { %v621_v21 = vld [vmem:[%s3524_s6 + $0xaa0] sm:$0xff]  ;;  %620 = vst [vmem:[%s3529_s7 + $0x2a0] sm:$0xff] %v619_v20 }
  0x6c   : > { %v623_v22 = vld [vmem:[%s3524_s6 + $0xac0] sm:$0xff]  ;;  %622 = vst [vmem:[%s3529_s7 + $0x2a8] sm:$0xff] %v621_v21 }
  0x6d   : > { %624 = vst [vmem:[%s3529_s7 + $0x2b0] sm:$0xff] %v623_v22  ;;  %v625_v23 = vld [vmem:[%s3524_s6 + $0xae0] sm:$0xff] }
  0x6e   : > { %v627_v24 = vld [vmem:[%s3524_s6 + $0xb00] sm:$0xff]  ;;  %626 = vst [vmem:[%s3529_s7 + $0x2b8] sm:$0xff] %v625_v23 }
  0x6f   : > { %v629_v25 = vld [vmem:[%s3524_s6 + $0xb20] sm:$0xff]  ;;  %628 = vst [vmem:[%s3529_s7 + $0x2c0] sm:$0xff] %v627_v24 }
  0x70   : > { %630 = vst [vmem:[%s3529_s7 + $0x2c8] sm:$0xff] %v629_v25  ;;  %v631_v26 = vld [vmem:[%s3524_s6 + $0xb40] sm:$0xff] }
  0x71   : > { %v633_v27 = vld [vmem:[%s3524_s6 + $0xb60] sm:$0xff]  ;;  %632 = vst [vmem:[%s3529_s7 + $0x2d0] sm:$0xff] %v631_v26 }
  0x72   : > { %v635_v28 = vld [vmem:[%s3524_s6 + $0xb80] sm:$0xff]  ;;  %634 = vst [vmem:[%s3529_s7 + $0x2d8] sm:$0xff] %v633_v27 }
  0x73   : > { %636 = vst [vmem:[%s3529_s7 + $0x2e0] sm:$0xff] %v635_v28  ;;  %v637_v29 = vld [vmem:[%s3524_s6 + $0xba0] sm:$0xff] }
  0x74   : > { %v639_v30 = vld [vmem:[%s3524_s6 + $0xbc0] sm:$0xff]  ;;  %638 = vst [vmem:[%s3529_s7 + $0x2e8] sm:$0xff] %v637_v29 }
  0x75   : > { %v641_v31 = vld [vmem:[%s3524_s6 + $0xbe0] sm:$0xff]  ;;  %640 = vst [vmem:[%s3529_s7 + $0x2f0] sm:$0xff] %v639_v30 }
  0x76   : > { %642 = vst [vmem:[%s3529_s7 + $0x2f8] sm:$0xff] %v641_v31  ;;  %v643_v32 = vld [vmem:[%s3524_s6 + $0xc00] sm:$0xff] }
  0x77   : > { %v645_v33 = vld [vmem:[%s3524_s6 + $0xc20] sm:$0xff]  ;;  %644 = vst [vmem:[%s3529_s7 + $0x300] sm:$0xff] %v643_v32 }
  0x78   : > { %v647_v34 = vld [vmem:[%s3524_s6 + $0xc40] sm:$0xff]  ;;  %646 = vst [vmem:[%s3529_s7 + $0x308] sm:$0xff] %v645_v33 }
  0x79   : > { %648 = vst [vmem:[%s3529_s7 + $0x310] sm:$0xff] %v647_v34  ;;  %v649_v35 = vld [vmem:[%s3524_s6 + $0xc60] sm:$0xff] }
  0x7a   : > { %v651_v36 = vld [vmem:[%s3524_s6 + $0xc80] sm:$0xff]  ;;  %650 = vst [vmem:[%s3529_s7 + $0x318] sm:$0xff] %v649_v35 }
  0x7b   : > { %v653_v37 = vld [vmem:[%s3524_s6 + $0xca0] sm:$0xff]  ;;  %652 = vst [vmem:[%s3529_s7 + $0x320] sm:$0xff] %v651_v36 }
  0x7c   : > { %654 = vst [vmem:[%s3529_s7 + $0x328] sm:$0xff] %v653_v37  ;;  %v655_v38 = vld [vmem:[%s3524_s6 + $0xcc0] sm:$0xff] }
  0x7d   : > { %v657_v39 = vld [vmem:[%s3524_s6 + $0xce0] sm:$0xff]  ;;  %656 = vst [vmem:[%s3529_s7 + $0x330] sm:$0xff] %v655_v38 }
  0x7e   : > { %v659_v40 = vld [vmem:[%s3524_s6 + $0xd00] sm:$0xff]  ;;  %658 = vst [vmem:[%s3529_s7 + $0x338] sm:$0xff] %v657_v39 }
  0x7f   : > { %660 = vst [vmem:[%s3529_s7 + $0x340] sm:$0xff] %v659_v40  ;;  %v661_v41 = vld [vmem:[%s3524_s6 + $0xd20] sm:$0xff] }
  0x80   : > { %v663_v42 = vld [vmem:[%s3524_s6 + $0xd40] sm:$0xff]  ;;  %662 = vst [vmem:[%s3529_s7 + $0x348] sm:$0xff] %v661_v41 }
  0x81   : > { %v665_v43 = vld [vmem:[%s3524_s6 + $0xd60] sm:$0xff]  ;;  %664 = vst [vmem:[%s3529_s7 + $0x350] sm:$0xff] %v663_v42 }
  0x82   : > { %666 = vst [vmem:[%s3529_s7 + $0x358] sm:$0xff] %v665_v43  ;;  %v667_v44 = vld [vmem:[%s3524_s6 + $0xd80] sm:$0xff] }
  0x83   : > { %v669_v45 = vld [vmem:[%s3524_s6 + $0xda0] sm:$0xff]  ;;  %668 = vst [vmem:[%s3529_s7 + $0x360] sm:$0xff] %v667_v44 }
  0x84   : > { %v671_v46 = vld [vmem:[%s3524_s6 + $0xdc0] sm:$0xff]  ;;  %670 = vst [vmem:[%s3529_s7 + $0x368] sm:$0xff] %v669_v45 }
  0x85   : > { %672 = vst [vmem:[%s3529_s7 + $0x370] sm:$0xff] %v671_v46  ;;  %v673_v47 = vld [vmem:[%s3524_s6 + $0xde0] sm:$0xff] }
  0x86   : > { %v675_v48 = vld [vmem:[%s3524_s6 + $0xe00] sm:$0xff]  ;;  %674 = vst [vmem:[%s3529_s7 + $0x378] sm:$0xff] %v673_v47 }
  0x87   : > { %v677_v49 = vld [vmem:[%s3524_s6 + $0xe20] sm:$0xff]  ;;  %676 = vst [vmem:[%s3529_s7 + $0x380] sm:$0xff] %v675_v48 }
  0x88   : > { %678 = vst [vmem:[%s3529_s7 + $0x388] sm:$0xff] %v677_v49  ;;  %v679_v50 = vld [vmem:[%s3524_s6 + $0xe40] sm:$0xff] }
  0x89   : > { %v681_v51 = vld [vmem:[%s3524_s6 + $0xe60] sm:$0xff]  ;;  %680 = vst [vmem:[%s3529_s7 + $0x390] sm:$0xff] %v679_v50 }
  0x8a   : > { %v683_v52 = vld [vmem:[%s3524_s6 + $0xe80] sm:$0xff]  ;;  %682 = vst [vmem:[%s3529_s7 + $0x398] sm:$0xff] %v681_v51 }
  0x8b   : > { %684 = vst [vmem:[%s3529_s7 + $0x3a0] sm:$0xff] %v683_v52  ;;  %v685_v53 = vld [vmem:[%s3524_s6 + $0xea0] sm:$0xff] }
  0x8c   : > { %v687_v54 = vld [vmem:[%s3524_s6 + $0xec0] sm:$0xff]  ;;  %686 = vst [vmem:[%s3529_s7 + $0x3a8] sm:$0xff] %v685_v53 }
  0x8d   : > { %v689_v55 = vld [vmem:[%s3524_s6 + $0xee0] sm:$0xff]  ;;  %688 = vst [vmem:[%s3529_s7 + $0x3b0] sm:$0xff] %v687_v54 }
  0x8e   : > { %690 = vst [vmem:[%s3529_s7 + $0x3b8] sm:$0xff] %v689_v55  ;;  %v691_v56 = vld [vmem:[%s3524_s6 + $0xf00] sm:$0xff] }
  0x8f   : > { %v693_v57 = vld [vmem:[%s3524_s6 + $0xf20] sm:$0xff]  ;;  %692 = vst [vmem:[%s3529_s7 + $0x3c0] sm:$0xff] %v691_v56 }
  0x90   : > { %v695_v58 = vld [vmem:[%s3524_s6 + $0xf40] sm:$0xff]  ;;  %694 = vst [vmem:[%s3529_s7 + $0x3c8] sm:$0xff] %v693_v57 }
  0x91   : > { %696 = vst [vmem:[%s3529_s7 + $0x3d0] sm:$0xff] %v695_v58  ;;  %v697_v59 = vld [vmem:[%s3524_s6 + $0xf60] sm:$0xff] }
  0x92   : > { %v699_v60 = vld [vmem:[%s3524_s6 + $0xf80] sm:$0xff]  ;;  %698 = vst [vmem:[%s3529_s7 + $0x3d8] sm:$0xff] %v697_v59 }
  0x93   : > { %v701_v61 = vld [vmem:[%s3524_s6 + $0xfa0] sm:$0xff]  ;;  %700 = vst [vmem:[%s3529_s7 + $0x3e0] sm:$0xff] %v699_v60 }
  0x94   : > { %702 = vst [vmem:[%s3529_s7 + $0x3e8] sm:$0xff] %v701_v61  ;;  %v703_v62 = vld [vmem:[%s3524_s6 + $0xfc0] sm:$0xff] }
  0x95   : > { %v705_v63 = vld [vmem:[%s3524_s6 + $0xfe0] sm:$0xff]  ;;  %704 = vst [vmem:[%s3529_s7 + $0x3f0] sm:$0xff] %v703_v62 }
  0x96   : > { %706 = vst [vmem:[%s3529_s7 + $0x3f8] sm:$0xff] %v705_v63 }
  0x97 PF: > { %p2838_p10 = scmp.ge.s32.totalorder %s3439_s18, 1  ;;  %p727_p11 = scmp.lt.s32.totalorder %s3439_s18, 5 }
  0x99   : > { %p728_p12 = pnand %p2838_p10, %p727_p11 }
  0x9a   : > { %s3787_s8 = sand.u32 (!%p728_p12), 1, %s3431_s16   ;;  %v3792_v0 = vld [vmem:[%s4472_s0] sm:$0xff] (!%p728_p12)  ;;  %v3802_v2 = vld [vmem:[%s4472_s0 + $0x10] sm:$0xff] (!%p728_p12)  ;;  %s3041_s7 = sshll.u32 (!%p728_p12), %s3492_s19, 8 }
  0x9b   : > { %731 = sbr.rel (%p728_p12) target bundleno = 701 (0x2bd), region = 70  ;;  %v3797_v1 = vld [vmem:[%s4472_s0 + $0x20] sm:$0xff] (!%p728_p12)  ;;  %s2839_s20 = sshll.u32 (!%p728_p12), %s3787_s8, 10  ;;  %v3812_v5 = vld [vmem:[%s4472_s0 + $0x30] sm:$0xff] (!%p728_p12) }
  0x9c   : > { %v2843_v3 = vcombine.low (!%p728_p12), %v3792_v0, %v3797_v1  ;;  %v2844_v4 = vcombine.high (!%p728_p12), %v3792_v0, %v3797_v1  ;;  %v2847_v6 = vcombine.low (!%p728_p12), %v3802_v2, %v3812_v5  ;;  %v2848_v7 = vcombine.high (!%p728_p12), %v3802_v2, %v3812_v5  ;;  %s3818_s27 = scalar_lea.vmem (!%p728_p12), [#allocation2], %s2839_s20  ;;  %v795_v0 = vld [vmem:[%s4472_s0 + $0x80] sm:$0xff] (!%p728_p12)  ;;  %v797_v5 = vld [vmem:[%s4472_s0 + $0x90] sm:$0xff] (!%p728_p12)  ;;  %s2840_s5 = sshll.u32 (!%p728_p12), %s3787_s8, 8 }
  0x9d   : > { %v3181_v8 = vld [vmem:[%s3818_s27 + $0x4] ss:$8 sps:$4 sm:$0xff] (!%p728_p12)   ;;  %v3185_v10 = vld [vmem:[%s3818_s27] ss:$8 sps:$4 sm:$0xff] (!%p728_p12)   ;;  %v3187_v12 = vld [vmem:[%s3818_s27 + $0x14] ss:$8 sps:$4 sm:$0xff] (!%p728_p12)   ;;  %s4403_s11 = scalar_lea.hbm (!%p728_p12), %s4476_s4, %s3041_s7 }
  0x9e   : > { %1963 = vmatprep.mubr.bf16.mxu1 (!%p728_p12), %v2844_v4  ;;  %v3183_v9 = vld [vmem:[%s3818_s27 + $0x204] ss:$8 sps:$4 sm:$0xff] (!%p728_p12)   ;;  %2189 = vmatprep.mubr.bf16.mxu0 (!%p728_p12), %v2848_v7  ;;  %v3186_v11 = vld [vmem:[%s3818_s27 + $0x200] ss:$8 sps:$4 sm:$0xff] (!%p728_p12)   ;;  %v3189_v13 = vld [vmem:[%s3818_s27 + $0x214] ss:$8 sps:$4 sm:$0xff] (!%p728_p12)  }
  0x9f   : > { %1931 = vmatprep.subr.bf16.mxu1 (!%p728_p12), %v3181_v8  ;;  %2157 = vmatprep.subr.bf16.mxu0 (!%p728_p12), %v3183_v9  ;;  %v3191_v14 = vld [vmem:[%s3818_s27 + $0x10] ss:$8 sps:$4 sm:$0xff] (!%p728_p12)   ;;  %v3193_v16 = vld [vmem:[%s3818_s27 + $0x24] ss:$8 sps:$4 sm:$0xff] (!%p728_p12)   ;;  %v3197_v18 = vld [vmem:[%s3818_s27 + $0x20] ss:$8 sps:$4 sm:$0xff] (!%p728_p12)  }
  0xa0   : > { %1932 = vmatpush1.bf16.msra.mxu1 (!%p728_p12), %v3185_v10  ;;  %2158 = vmatpush1.bf16.msra.mxu0 (!%p728_p12), %v3186_v11  ;;  %v3192_v15 = vld [vmem:[%s3818_s27 + $0x210] ss:$8 sps:$4 sm:$0xff] (!%p728_p12)   ;;  %v3195_v17 = vld [vmem:[%s3818_s27 + $0x224] ss:$8 sps:$4 sm:$0xff] (!%p728_p12)   ;;  %v3198_v19 = vld [vmem:[%s3818_s27 + $0x220] ss:$8 sps:$4 sm:$0xff] (!%p728_p12)  }
  0xa1   : > { %1933 = vmatprep.subr.bf16.mxu1 (!%p728_p12), %v3187_v12  ;;  %2159 = vmatprep.subr.bf16.mxu0 (!%p728_p12), %v3189_v13  ;;  %v3199_v20 = vld [vmem:[%s3818_s27 + $0x34] ss:$8 sps:$4 sm:$0xff] (!%p728_p12)   ;;  %v3203_v22 = vld [vmem:[%s3818_s27 + $0x30] ss:$8 sps:$4 sm:$0xff] (!%p728_p12)   ;;  %v3205_v24 = vld [vmem:[%s3818_s27 + $0x44] ss:$8 sps:$4 sm:$0xff] (!%p728_p12)  }
  0xa2   : > { %v3201_v21 = vld [vmem:[%s3818_s27 + $0x234] ss:$8 sps:$4 sm:$0xff]   ;;  %v3204_v23 = vld [vmem:[%s3818_s27 + $0x230] ss:$8 sps:$4 sm:$0xff]   ;;  %v3207_v25 = vld [vmem:[%s3818_s27 + $0x244] ss:$8 sps:$4 sm:$0xff]  }
  0xa3   : > { %v3209_v26 = vld [vmem:[%s3818_s27 + $0x40] ss:$8 sps:$4 sm:$0xff]   ;;  %v3211_v28 = vld [vmem:[%s3818_s27 + $0x54] ss:$8 sps:$4 sm:$0xff]   ;;  %v3215_v30 = vld [vmem:[%s3818_s27 + $0x50] ss:$8 sps:$4 sm:$0xff]  }
  0xa4   : > { %1934 = vmatpush1.bf16.msra.mxu1 %v3191_v14  ;;  %2160 = vmatpush1.bf16.msra.mxu0 %v3192_v15  ;;  %v3210_v27 = vld [vmem:[%s3818_s27 + $0x240] ss:$8 sps:$4 sm:$0xff]   ;;  %v3213_v29 = vld [vmem:[%s3818_s27 + $0x254] ss:$8 sps:$4 sm:$0xff]   ;;  %v3216_v31 = vld [vmem:[%s3818_s27 + $0x250] ss:$8 sps:$4 sm:$0xff]  }
  0xa5   : > { %1935 = vmatprep.subr.bf16.mxu1 %v3193_v16  ;;  %2161 = vmatprep.subr.bf16.mxu0 %v3195_v17  ;;  %v3217_v32 = vld [vmem:[%s3818_s27 + $0x64] ss:$8 sps:$4 sm:$0xff]   ;;  %v3221_v34 = vld [vmem:[%s3818_s27 + $0x60] ss:$8 sps:$4 sm:$0xff]   ;;  %v3223_v36 = vld [vmem:[%s3818_s27 + $0x74] ss:$8 sps:$4 sm:$0xff]  }
  0xa6   : > { %v3219_v33 = vld [vmem:[%s3818_s27 + $0x264] ss:$8 sps:$4 sm:$0xff]   ;;  %v3222_v35 = vld [vmem:[%s3818_s27 + $0x260] ss:$8 sps:$4 sm:$0xff]   ;;  %v3225_v37 = vld [vmem:[%s3818_s27 + $0x274] ss:$8 sps:$4 sm:$0xff]  }
  0xa7   : > { %v3227_v38 = vld [vmem:[%s3818_s27 + $0x70] ss:$8 sps:$4 sm:$0xff]   ;;  %v3229_v40 = vld [vmem:[%s3818_s27 + $0x84] ss:$8 sps:$4 sm:$0xff]   ;;  %v3233_v42 = vld [vmem:[%s3818_s27 + $0x80] ss:$8 sps:$4 sm:$0xff]  }
  0xa8   : > { %1936 = vmatpush1.bf16.msra.mxu1 %v3197_v18  ;;  %2162 = vmatpush1.bf16.msra.mxu0 %v3198_v19  ;;  %v3228_v39 = vld [vmem:[%s3818_s27 + $0x270] ss:$8 sps:$4 sm:$0xff]   ;;  %v3231_v41 = vld [vmem:[%s3818_s27 + $0x284] ss:$8 sps:$4 sm:$0xff]   ;;  %v3234_v43 = vld [vmem:[%s3818_s27 + $0x280] ss:$8 sps:$4 sm:$0xff]  }
  0xa9   : > { %1937 = vmatprep.subr.bf16.mxu1 %v3199_v20  ;;  %2163 = vmatprep.subr.bf16.mxu0 %v3201_v21  ;;  %v3235_v44 = vld [vmem:[%s3818_s27 + $0x94] ss:$8 sps:$4 sm:$0xff]   ;;  %v3239_v46 = vld [vmem:[%s3818_s27 + $0x90] ss:$8 sps:$4 sm:$0xff]   ;;  %v3241_v48 = vld [vmem:[%s3818_s27 + $0xa4] ss:$8 sps:$4 sm:$0xff]  }
  0xaa   : > { %v3237_v45 = vld [vmem:[%s3818_s27 + $0x294] ss:$8 sps:$4 sm:$0xff]   ;;  %v3240_v47 = vld [vmem:[%s3818_s27 + $0x290] ss:$8 sps:$4 sm:$0xff]   ;;  %v3243_v49 = vld [vmem:[%s3818_s27 + $0x2a4] ss:$8 sps:$4 sm:$0xff]  }
  0xab   : > { %v3245_v50 = vld [vmem:[%s3818_s27 + $0xa0] ss:$8 sps:$4 sm:$0xff]   ;;  %v3247_v52 = vld [vmem:[%s3818_s27 + $0xb4] ss:$8 sps:$4 sm:$0xff]   ;;  %v3251_v54 = vld [vmem:[%s3818_s27 + $0xb0] ss:$8 sps:$4 sm:$0xff]  }
  0xac   : > { %1938 = vmatpush1.bf16.msra.mxu1 %v3203_v22  ;;  %2164 = vmatpush1.bf16.msra.mxu0 %v3204_v23  ;;  %v3246_v51 = vld [vmem:[%s3818_s27 + $0x2a0] ss:$8 sps:$4 sm:$0xff]   ;;  %v3249_v53 = vld [vmem:[%s3818_s27 + $0x2b4] ss:$8 sps:$4 sm:$0xff]   ;;  %v3252_v55 = vld [vmem:[%s3818_s27 + $0x2b0] ss:$8 sps:$4 sm:$0xff]  }
  0xad   : > { %1939 = vmatprep.subr.bf16.mxu1 %v3205_v24  ;;  %2165 = vmatprep.subr.bf16.mxu0 %v3207_v25  ;;  %v3253_v56 = vld [vmem:[%s3818_s27 + $0xc4] ss:$8 sps:$4 sm:$0xff]   ;;  %v3257_v58 = vld [vmem:[%s3818_s27 + $0xc0] ss:$8 sps:$4 sm:$0xff]   ;;  %v3259_v60 = vld [vmem:[%s3818_s27 + $0xd4] ss:$8 sps:$4 sm:$0xff]  }
  0xae   : > { %v3255_v57 = vld [vmem:[%s3818_s27 + $0x2c4] ss:$8 sps:$4 sm:$0xff]   ;;  %v3258_v59 = vld [vmem:[%s3818_s27 + $0x2c0] ss:$8 sps:$4 sm:$0xff]   ;;  %v3261_v61 = vld [vmem:[%s3818_s27 + $0x2d4] ss:$8 sps:$4 sm:$0xff]  }
  0xaf   : > { %v3263_v62 = vld [vmem:[%s3818_s27 + $0xd0] ss:$8 sps:$4 sm:$0xff]   ;;  %v3265_v4 = vld [vmem:[%s3818_s27 + $0xe4] ss:$8 sps:$4 sm:$0xff]   ;;  %v3269_v8 = vld [vmem:[%s3818_s27 + $0xe0] ss:$8 sps:$4 sm:$0xff]  }
  0xb0   : > { %1940 = vmatpush1.bf16.msra.mxu1 %v3209_v26  ;;  %2166 = vmatpush1.bf16.msra.mxu0 %v3210_v27  ;;  %v3264_v63 = vld [vmem:[%s3818_s27 + $0x2d0] ss:$8 sps:$4 sm:$0xff]   ;;  %v3267_v7 = vld [vmem:[%s3818_s27 + $0x2e4] ss:$8 sps:$4 sm:$0xff]   ;;  %v3270_v9 = vld [vmem:[%s3818_s27 + $0x2e0] ss:$8 sps:$4 sm:$0xff]  }
  0xb1   : > { %1941 = vmatprep.subr.bf16.mxu1 %v3211_v28  ;;  %2167 = vmatprep.subr.bf16.mxu0 %v3213_v29  ;;  %v3271_v10 = vld [vmem:[%s3818_s27 + $0xf4] ss:$8 sps:$4 sm:$0xff]   ;;  %v3275_v12 = vld [vmem:[%s3818_s27 + $0xf0] ss:$8 sps:$4 sm:$0xff]   ;;  %v3279_v14 = vld [vmem:[%s3818_s27 + $0x104] ss:$8 sps:$4 sm:$0xff]  }
  0xb2   : > { %v3273_v11 = vld [vmem:[%s3818_s27 + $0x2f4] ss:$8 sps:$4 sm:$0xff]   ;;  %v3276_v13 = vld [vmem:[%s3818_s27 + $0x2f0] ss:$8 sps:$4 sm:$0xff]   ;;  %v3282_v15 = vld [vmem:[%s3818_s27 + $0x304] ss:$8 sps:$4 sm:$0xff]  }
  0xb3   : > { %v787_v16 = vld [vmem:[%s4472_s0 + $0x40] sm:$0xff]  ;;  %v789_v18 = vld [vmem:[%s4472_s0 + $0x50] sm:$0xff]  ;;  %s4372_s6 = scalar_lea.vmem [#allocation3], %s2840_s5  ;;  %s2733_s12 = scalar_lea.sflag [#allocation4], %s3787_s8 }
  0xb4   : > { %1942 = vmatpush1.bf16.msra.mxu1 %v3215_v30  ;;  %2168 = vmatpush1.bf16.msra.mxu0 %v3216_v31  ;;  %v791_v17 = vld [vmem:[%s4472_s0 + $0x60] sm:$0xff]  ;;  %v793_v20 = vld [vmem:[%s4472_s0 + $0x70] sm:$0xff]  ;;  %s2746_s9 = sshll.u32 %s4372_s6, 4  ;;  %s3442_s14 = smov [#allocation3]   ;;  %s4413_s9 = int_to_ptr.vmem [resolvable:$true] %s2746_s9 }
  0xb5   : > { %1943 = vmatprep.subr.bf16.mxu1 %v3217_v32  ;;  %2169 = vmatprep.subr.bf16.mxu0 %v3219_v33  ;;  %v3277_v19 = vld [vmem:[%s3818_s27 + $0x100] ss:$8 sps:$4 sm:$0xff]   ;;  %v3285_v22 = vld [vmem:[%s3818_s27 + $0x114] ss:$8 sps:$4 sm:$0xff]   ;;  %v2852_v24 = vcombine.high %v787_v16, %v791_v17  ;;  %v2856_v25 = vcombine.high %v789_v18, %v793_v20  ;;  %v3283_v26 = vld [vmem:[%s3818_s27 + $0x110] ss:$8 sps:$4 sm:$0xff]   ;;  %v2851_v2 = vcombine.low %v787_v16, %v791_v17 }
  0xb6   : > { %v3280_v21 = vld [vmem:[%s3818_s27 + $0x300] ss:$8 sps:$4 sm:$0xff]   ;;  %v3288_v23 = vld [vmem:[%s3818_s27 + $0x314] ss:$8 sps:$4 sm:$0xff]   ;;  %v3286_v27 = vld [vmem:[%s3818_s27 + $0x310] ss:$8 sps:$4 sm:$0xff]  }
  0xb7   : > { %v3291_v28 = vld [vmem:[%s3818_s27 + $0x124] ss:$8 sps:$4 sm:$0xff]   ;;  %v3289_v30 = vld [vmem:[%s3818_s27 + $0x120] ss:$8 sps:$4 sm:$0xff]   ;;  %v3297_v32 = vld [vmem:[%s3818_s27 + $0x134] ss:$8 sps:$4 sm:$0xff]  }
  0xb8   : > { %1944 = vmatpush1.bf16.msra.mxu1 %v3221_v34  ;;  %2170 = vmatpush1.bf16.msra.mxu0 %v3222_v35  ;;  %v3294_v29 = vld [vmem:[%s3818_s27 + $0x324] ss:$8 sps:$4 sm:$0xff]   ;;  %v3292_v31 = vld [vmem:[%s3818_s27 + $0x320] ss:$8 sps:$4 sm:$0xff]   ;;  %v3300_v33 = vld [vmem:[%s3818_s27 + $0x334] ss:$8 sps:$4 sm:$0xff]  }
  0xb9   : > { %1945 = vmatprep.subr.bf16.mxu1 %v3223_v36  ;;  %2171 = vmatprep.subr.bf16.mxu0 %v3225_v37  ;;  %v799_v1 = vld [vmem:[%s4472_s0 + $0xa0] sm:$0xff]  ;;  %v3295_v36 = vld [vmem:[%s3818_s27 + $0x130] ss:$8 sps:$4 sm:$0xff]   ;;  %s3377_s13 = scalar_lea.vmem %s4413_s9, 4096 }
  0xba   : > { %v2860_v34 = vcombine.high %v795_v0, %v799_v1  ;;  %v3298_v37 = vld [vmem:[%s3818_s27 + $0x330] ss:$8 sps:$4 sm:$0xff]   ;;  %v823_v17 = vld [vmem:[%s4472_s0 + $0x160] sm:$0xff]  ;;  %p3378_p0 = scmp.ne.s32.totalorder %s4413_s9, %s3377_s13 }
  0xbc   : > { %1946 = vmatpush1.bf16.msra.mxu1 %v3227_v38  ;;  %2172 = vmatpush1.bf16.msra.mxu0 %v3228_v39  ;;  %v3303_v38 = vld [vmem:[%s3818_s27 + $0x144] ss:$8 sps:$4 sm:$0xff]   ;;  %p3379_p1 = pnand %p3378_p0, %p3510_p6 }
  0xbd   : > { %1947 = vmatprep.subr.bf16.mxu1 %v3229_v40  ;;  %2173 = vmatprep.subr.bf16.mxu0 %v3231_v41  ;;  %v3306_v39 = vld [vmem:[%s3818_s27 + $0x344] ss:$8 sps:$4 sm:$0xff]   ;;  %v2859_v41 = vcombine.low %v795_v0, %v799_v1 }
  0xbe   : > { %v803_v40 = vld [vmem:[%s4472_s0 + $0xc0] sm:$0xff]  ;;  %p3380_p2 = pneg %p3379_p1 }
  0xbf   : > { %v827_v0 = vld [vmem:[%s4472_s0 + $0x180] sm:$0xff] }
  0xc0   : > { %1948 = vmatpush1.bf16.msra.mxu1 %v3233_v42  ;;  %2174 = vmatpush1.bf16.msra.mxu0 %v3234_v43  ;;  %v807_v43 = vld [vmem:[%s4472_s0 + $0xe0] sm:$0xff] }
  0xc1   : > { %1949 = vmatprep.subr.bf16.mxu1 %v3235_v44  ;;  %2175 = vmatprep.subr.bf16.mxu0 %v3237_v45  ;;  %v805_v44 = vld [vmem:[%s4472_s0 + $0xd0] sm:$0xff] }
  0xc2   : > { %v809_v45 = vld [vmem:[%s4472_s0 + $0xf0] sm:$0xff] }
  0xc4   : > { %1950 = vmatpush1.bf16.msra.mxu1 %v3239_v46  ;;  %2176 = vmatpush1.bf16.msra.mxu0 %v3240_v47  ;;  %v3301_v46 = vld [vmem:[%s3818_s27 + $0x140] ss:$8 sps:$4 sm:$0xff]  }
  0xc5   : > { %1951 = vmatprep.subr.bf16.mxu1 %v3241_v48  ;;  %2177 = vmatprep.subr.bf16.mxu0 %v3243_v49  ;;  %v3304_v47 = vld [vmem:[%s3818_s27 + $0x340] ss:$8 sps:$4 sm:$0xff]   ;;  %v3309_v48 = vld [vmem:[%s3818_s27 + $0x154] ss:$8 sps:$4 sm:$0xff]  }
  0xc6   : > { %v3312_v49 = vld [vmem:[%s3818_s27 + $0x354] ss:$8 sps:$4 sm:$0xff]  }
  0xc8   : > { %1952 = vmatpush1.bf16.msra.mxu1 %v3245_v50  ;;  %2178 = vmatpush1.bf16.msra.mxu0 %v3246_v51  ;;  %v2868_v50 = vcombine.high %v803_v40, %v807_v43  ;;  %v2872_v51 = vcombine.high %v805_v44, %v809_v45 }
  0xc9   : > { %1953 = vmatprep.subr.bf16.mxu1 %v3247_v52  ;;  %2179 = vmatprep.subr.bf16.mxu0 %v3249_v53  ;;  %v3307_v52 = vld [vmem:[%s3818_s27 + $0x150] ss:$8 sps:$4 sm:$0xff]  }
  0xca   : > { %v3310_v53 = vld [vmem:[%s3818_s27 + $0x350] ss:$8 sps:$4 sm:$0xff]  }
  0xcc   : > { %1954 = vmatpush1.bf16.msra.mxu1 %v3251_v54  ;;  %2180 = vmatpush1.bf16.msra.mxu0 %v3252_v55  ;;  %v3315_v54 = vld [vmem:[%s3818_s27 + $0x164] ss:$8 sps:$4 sm:$0xff]  }
  0xcd   : > { %1955 = vmatprep.subr.bf16.mxu1 %v3253_v56  ;;  %2181 = vmatprep.subr.bf16.mxu0 %v3255_v57  ;;  %v3318_v55 = vld [vmem:[%s3818_s27 + $0x364] ss:$8 sps:$4 sm:$0xff]   ;;  %v3313_v56 = vld [vmem:[%s3818_s27 + $0x160] ss:$8 sps:$4 sm:$0xff]  }
  0xce   : > { %v811_v57 = vld [vmem:[%s4472_s0 + $0x100] sm:$0xff] }
  0xd0   : > { %1956 = vmatpush1.bf16.msra.mxu1 %v3257_v58  ;;  %2182 = vmatpush1.bf16.msra.mxu0 %v3258_v59  ;;  %v815_v58 = vld [vmem:[%s4472_s0 + $0x120] sm:$0xff]  ;;  %v2867_v59 = vcombine.low %v803_v40, %v807_v43 }
  0xd1   : > { %1957 = vmatprep.subr.bf16.mxu1 %v3259_v60  ;;  %2183 = vmatprep.subr.bf16.mxu0 %v3261_v61  ;;  %v2871_v60 = vcombine.low %v805_v44, %v809_v45  ;;  %v813_v61 = vld [vmem:[%s4472_s0 + $0x110] sm:$0xff]  ;;  %v835_v40 = vld [vmem:[%s4472_s0 + $0x1c0] sm:$0xff] }
  0xd2   : > { %v839_v43 = vld [vmem:[%s4472_s0 + $0x1e0] sm:$0xff]  ;;  %v837_v44 = vld [vmem:[%s4472_s0 + $0x1d0] sm:$0xff] }
  0xd3   : > { %v841_v45 = vld [vmem:[%s4472_s0 + $0x1f0] sm:$0xff] }
  0xd4   : > { %1958 = vmatpush1.bf16.msra.mxu1 %v3263_v62  ;;  %2184 = vmatpush1.bf16.msra.mxu0 %v3264_v63  ;;  %v817_v62 = vld [vmem:[%s4472_s0 + $0x130] sm:$0xff]  ;;  %v3316_v63 = vld [vmem:[%s3818_s27 + $0x360] ss:$8 sps:$4 sm:$0xff]  }
  0xd5   : > { %1959 = vmatprep.subr.bf16.mxu1 %v3265_v4  ;;  %2185 = vmatprep.subr.bf16.mxu0 %v3267_v7  ;;  %v3321_v4 = vld [vmem:[%s3818_s27 + $0x174] ss:$8 sps:$4 sm:$0xff]   ;;  %v2879_v16 = vcombine.low %v813_v61, %v817_v62 }
  0xd6   : > { %v3324_v7 = vld [vmem:[%s3818_s27 + $0x374] ss:$8 sps:$4 sm:$0xff]  }
  0xd8   : > { %1960 = vmatpush1.bf16.msra.mxu1 %v3269_v8  ;;  %2186 = vmatpush1.bf16.msra.mxu0 %v3270_v9  ;;  %v2876_v8 = vcombine.high %v811_v57, %v815_v58  ;;  %v2880_v9 = vcombine.high %v813_v61, %v817_v62  ;;  %v786_v61 = vld [vmem:[%s4472_s0 + $0x38] sm:$0xff]  ;;  %v3361_v62 = vld [vmem:[%s3818_s27 + $0x1e0] ss:$8 sps:$4 sm:$0xff]  }
  0xd9   : > { %1961 = vmatprep.subr.bf16.mxu1 %v3271_v10  ;;  %2187 = vmatprep.subr.bf16.mxu0 %v3273_v11  ;;  %v3319_v10 = vld [vmem:[%s3818_s27 + $0x170] ss:$8 sps:$4 sm:$0xff]  }
  0xda   : > { %v3322_v11 = vld [vmem:[%s3818_s27 + $0x370] ss:$8 sps:$4 sm:$0xff]  }
  0xdc   : > { %1962 = vmatpush1.bf16.msra.mxu1 %v3275_v12  ;;  %2188 = vmatpush1.bf16.msra.mxu0 %v3276_v13  ;;  %v3327_v12 = vld [vmem:[%s3818_s27 + $0x184] ss:$8 sps:$4 sm:$0xff]  }
  0xdd   : > { %2044 = vmatprep.subr.bf16.mxu1 %v3279_v14  ;;  %2270 = vmatprep.subr.bf16.mxu0 %v3282_v15  ;;  %v3330_v13 = vld [vmem:[%s3818_s27 + $0x384] ss:$8 sps:$4 sm:$0xff]   ;;  %v2875_v15 = vcombine.low %v811_v57, %v815_v58  ;;  %v2899_v57 = vcombine.low %v835_v40, %v839_v43  ;;  %v2903_v58 = vcombine.low %v837_v44, %v841_v45 }
  0xde   : > { %v819_v14 = vld [vmem:[%s4472_s0 + $0x140] sm:$0xff] }
  0xdf   : > { %1964 = vmatmul.mubr.bf16.vlgmr.msra.gmra.mrb[0].mxu1 %v2843_v3  ;;  %2190 = vmatmul.mubr.bf16.vlgmr.msra.gmra.mrb[0].mxu0 %v2847_v6  ;;  %v2855_v3 = vcombine.low %v789_v18, %v793_v20  ;;  %v801_v6 = vld [vmem:[%s4472_s0 + $0xb0] sm:$0xff]  ;;  %v3325_v20 = vld [vmem:[%s3818_s27 + $0x180] ss:$8 sps:$4 sm:$0xff]   ;;  %v2883_v1 = vcombine.low %v819_v14, %v823_v17 }
  0xe0   : > { %2045 = vmatpush1.bf16.msra.mxu1 %v3277_v19  ;;  %2271 = vmatpush1.bf16.msra.mxu0 %v3280_v21  ;;  %v2864_v35 = vcombine.high %v797_v5, %v801_v6  ;;  %v2863_v42 = vcombine.low %v797_v5, %v801_v6  ;;  %v821_v18 = vld [vmem:[%s4472_s0 + $0x150] sm:$0xff]  ;;  %v3328_v21 = vld [vmem:[%s3818_s27 + $0x380] ss:$8 sps:$4 sm:$0xff]  }
  0xe1   : > { %2046 = vmatprep.subr.bf16.mxu1 %v3285_v22  ;;  %2272 = vmatprep.subr.bf16.mxu0 %v3288_v23  ;;  %v825_v19 = vld [vmem:[%s4472_s0 + $0x170] sm:$0xff] }
  0xe2   : > { %1973 = vmatprep.mubr.bf16.mxu1 %v2852_v24  ;;  %2199 = vmatprep.mubr.bf16.mxu0 %v2856_v25  ;;  %v3333_v22 = vld [vmem:[%s3818_s27 + $0x194] ss:$8 sps:$4 sm:$0xff]   ;;  %v2884_v24 = vcombine.high %v819_v14, %v823_v17  ;;  %v2888_v25 = vcombine.high %v821_v18, %v825_v19 }
  0xe3   : > { %v3336_v23 = vld [vmem:[%s3818_s27 + $0x394] ss:$8 sps:$4 sm:$0xff]  }
  0xe4   : > { %2047 = vmatpush1.bf16.msra.mxu1 %v3283_v26  ;;  %2273 = vmatpush1.bf16.msra.mxu0 %v3286_v27  ;;  %v3331_v26 = vld [vmem:[%s3818_s27 + $0x190] ss:$8 sps:$4 sm:$0xff]  }
  0xe5   : > { %2048 = vmatprep.subr.bf16.mxu1 %v3291_v28  ;;  %2274 = vmatprep.subr.bf16.mxu0 %v3294_v29  ;;  %v3334_v27 = vld [vmem:[%s3818_s27 + $0x390] ss:$8 sps:$4 sm:$0xff]   ;;  %v3339_v28 = vld [vmem:[%s3818_s27 + $0x1a4] ss:$8 sps:$4 sm:$0xff]  }
  0xe6   : > { %v3342_v29 = vld [vmem:[%s3818_s27 + $0x3a4] ss:$8 sps:$4 sm:$0xff]   ;;  %v829_v5 = vld [vmem:[%s4472_s0 + $0x190] sm:$0xff]  ;;  %v790_v14 = vld [vmem:[%s4472_s0 + $0x58] sm:$0xff] }
  0xe7   : > { %1974 = vmatmul.mubr.bf16.gmra.mrb[4].mxu1 %v2851_v2  ;;  %2200 = vmatmul.mubr.bf16.gmra.mrb[4].mxu0 %v2855_v3  ;;  %v2887_v2 = vcombine.low %v821_v18, %v825_v19  ;;  %v831_v3 = vld [vmem:[%s4472_s0 + $0x1a0] sm:$0xff]  ;;  %v833_v6 = vld [vmem:[%s4472_s0 + $0x1b0] sm:$0xff] }
  0xe8   : > { %2049 = vmatpush1.bf16.msra.mxu1 %v3289_v30  ;;  %2275 = vmatpush1.bf16.msra.mxu0 %v3292_v31  ;;  %v3337_v30 = vld [vmem:[%s3818_s27 + $0x1a0] ss:$8 sps:$4 sm:$0xff]  }
  0xe9   : > { %2050 = vmatprep.subr.bf16.mxu1 %v3297_v32  ;;  %2276 = vmatprep.subr.bf16.mxu0 %v3300_v33  ;;  %v3340_v31 = vld [vmem:[%s3818_s27 + $0x3a0] ss:$8 sps:$4 sm:$0xff]   ;;  %v3345_v32 = vld [vmem:[%s3818_s27 + $0x1b4] ss:$8 sps:$4 sm:$0xff]  }
  0xea   : > { %1983 = vmatprep.mubr.bf16.mxu1 %v2860_v34  ;;  %2209 = vmatprep.mubr.bf16.mxu0 %v2864_v35  ;;  %v3348_v33 = vld [vmem:[%s3818_s27 + $0x3b4] ss:$8 sps:$4 sm:$0xff]   ;;  %v2892_v34 = vcombine.high %v827_v0, %v831_v3  ;;  %v2896_v35 = vcombine.high %v829_v5, %v833_v6 }
  0xec   : > { %2051 = vmatpush1.bf16.msra.mxu1 %v3295_v36  ;;  %2277 = vmatpush1.bf16.msra.mxu0 %v3298_v37  ;;  %v3343_v36 = vld [vmem:[%s3818_s27 + $0x1b0] ss:$8 sps:$4 sm:$0xff]  }
  0xed   : > { %2052 = vmatprep.subr.bf16.mxu1 %v3303_v38  ;;  %2278 = vmatprep.subr.bf16.mxu0 %v3306_v39  ;;  %v3346_v37 = vld [vmem:[%s3818_s27 + $0x3b0] ss:$8 sps:$4 sm:$0xff]   ;;  %v3351_v38 = vld [vmem:[%s3818_s27 + $0x1c4] ss:$8 sps:$4 sm:$0xff]  }
  0xee   : > { %v3354_v39 = vld [vmem:[%s3818_s27 + $0x3c4] ss:$8 sps:$4 sm:$0xff]  }
  0xef   : > { %1984 = vmatmul.mubr.bf16.gmra.mrb[8].mxu1 %v2859_v41  ;;  %2210 = vmatmul.mubr.bf16.gmra.mrb[8].mxu0 %v2863_v42  ;;  %v2891_v41 = vcombine.low %v827_v0, %v831_v3  ;;  %v2895_v42 = vcombine.low %v829_v5, %v833_v6  ;;  %v806_v0 = vld [vmem:[%s4472_s0 + $0xd8] sm:$0xff] }
  0xf0   : > { %2053 = vmatpush1.bf16.msra.mxu1 %v3301_v46  ;;  %2279 = vmatpush1.bf16.msra.mxu0 %v3304_v47  ;;  %v3349_v46 = vld [vmem:[%s3818_s27 + $0x1c0] ss:$8 sps:$4 sm:$0xff]  }
  0xf1   : > { %2054 = vmatprep.subr.bf16.mxu1 %v3309_v48  ;;  %2280 = vmatprep.subr.bf16.mxu0 %v3312_v49  ;;  %v3352_v47 = vld [vmem:[%s3818_s27 + $0x3c0] ss:$8 sps:$4 sm:$0xff]   ;;  %v3357_v48 = vld [vmem:[%s3818_s27 + $0x1d4] ss:$8 sps:$4 sm:$0xff]  }
  0xf2   : > { %1993 = vmatprep.mubr.bf16.mxu1 %v2868_v50  ;;  %2219 = vmatprep.mubr.bf16.mxu0 %v2872_v51  ;;  %v3360_v49 = vld [vmem:[%s3818_s27 + $0x3d4] ss:$8 sps:$4 sm:$0xff]   ;;  %v2900_v50 = vcombine.high %v835_v40, %v839_v43  ;;  %v2904_v51 = vcombine.high %v837_v44, %v841_v45 }
  0xf3   : > { %v822_v40 = vld [vmem:[%s4472_s0 + $0x158] sm:$0xff] }
  0xf4   : > { %2055 = vmatpush1.bf16.msra.mxu1 %v3307_v52  ;;  %2281 = vmatpush1.bf16.msra.mxu0 %v3310_v53  ;;  %v3355_v52 = vld [vmem:[%s3818_s27 + $0x1d0] ss:$8 sps:$4 sm:$0xff]  }
  0xf5   : > { %2056 = vmatprep.subr.bf16.mxu1 %v3315_v54  ;;  %2282 = vmatprep.subr.bf16.mxu0 %v3318_v55  ;;  %v3358_v53 = vld [vmem:[%s3818_s27 + $0x3d0] ss:$8 sps:$4 sm:$0xff]   ;;  %v3363_v54 = vld [vmem:[%s3818_s27 + $0x1e4] ss:$8 sps:$4 sm:$0xff]  }
  0xf6   : > { %v3366_v55 = vld [vmem:[%s3818_s27 + $0x3e4] ss:$8 sps:$4 sm:$0xff]  }
  0xf7   : > { %1994 = vmatmul.mubr.bf16.gmra.mrb[12].mxu1 %v2867_v59  ;;  %2220 = vmatmul.mubr.bf16.gmra.mrb[12].mxu0 %v2871_v60  ;;  %v784_v59 = vld [vmem:[%s4472_s0 + $0x28] sm:$0xff]  ;;  %v782_v60 = vld [vmem:[%s4472_s0 + $0x18] sm:$0xff] }
  0xf8   : > { %2057 = vmatpush1.bf16.msra.mxu1 %v3313_v56  ;;  %2283 = vmatpush1.bf16.msra.mxu0 %v3316_v63  ;;  %v780_v56 = vld [vmem:[%s4472_s0 + $0x8] sm:$0xff]  ;;  %v2849_v17 = vcombine.low %v782_v60, %v786_v61 }
  0xf9   : > { %2058 = vmatprep.subr.bf16.mxu1 %v3321_v4  ;;  %2284 = vmatprep.subr.bf16.mxu0 %v3324_v7  ;;  %v3364_v63 = vld [vmem:[%s3818_s27 + $0x3e0] ss:$8 sps:$4 sm:$0xff]   ;;  %v3369_v4 = vld [vmem:[%s3818_s27 + $0x1f4] ss:$8 sps:$4 sm:$0xff]  }
  0xfa   : > { %2003 = vmatprep.mubr.bf16.mxu1 %v2876_v8  ;;  %2229 = vmatprep.mubr.bf16.mxu0 %v2880_v9  ;;  %v3372_v7 = vld [vmem:[%s3818_s27 + $0x3f4] ss:$8 sps:$4 sm:$0xff]   ;;  %v2846_v8 = vcombine.high %v780_v56, %v784_v59  ;;  %v2850_v9 = vcombine.high %v782_v60, %v786_v61 }
  0xfc   : > { %2059 = vmatpush1.bf16.msra.mxu1 %v3319_v10  ;;  %2285 = vmatpush1.bf16.msra.mxu0 %v3322_v11  ;;  %v3367_v10 = vld [vmem:[%s3818_s27 + $0x1f0] ss:$8 sps:$4 sm:$0xff]  }
  0xfd   : > { %2060 = vmatprep.subr.bf16.mxu1 %v3327_v12  ;;  %2286 = vmatprep.subr.bf16.mxu0 %v3330_v13  ;;  %v3370_v11 = vld [vmem:[%s3818_s27 + $0x3f0] ss:$8 sps:$4 sm:$0xff]   ;;  %v788_v12 = vld [vmem:[%s4472_s0 + $0x48] sm:$0xff]  ;;  %s2841_s27 = sshll.u32 %s3492_s19, 1 }
  0xfe   : > { %v792_v13 = vld [vmem:[%s4472_s0 + $0x68] sm:$0xff]  ;;  %p769_p13 = scmp.lt.s32.totalorder %s2841_s27, 7 }
  0xff   : > { %2004 = vmatmul.mubr.bf16.gmra.mrb[16].mxu1 %v2875_v15  ;;  %2230 = vmatmul.mubr.bf16.gmra.mrb[16].mxu0 %v2879_v16  ;;  %v794_v15 = vld [vmem:[%s4472_s0 + $0x78] sm:$0xff]  ;;  %v2845_v16 = vcombine.low %v780_v56, %v784_v59  ;;  %v2854_v18 = vcombine.high %v788_v12, %v792_v13 }
 0x100   : > { %2061 = vmatpush1.bf16.msra.mxu1 %v3325_v20  ;;  %2287 = vmatpush1.bf16.msra.mxu0 %v3328_v21  ;;  %v2858_v19 = vcombine.high %v790_v14, %v794_v15  ;;  %v796_v20 = vld [vmem:[%s4472_s0 + $0x88] sm:$0xff]  ;;  %v838_v56 = vld [vmem:[%s4472_s0 + $0x1d8] sm:$0xff]  ;;  %s4484_s27 = smov (!%p769_p13, %s2841_s27), 7 }
 0x101   : > { %2062 = vmatprep.subr.bf16.mxu1 %v3333_v22  ;;  %2288 = vmatprep.subr.bf16.mxu0 %v3336_v23  ;;  %v800_v21 = vld [vmem:[%s4472_s0 + $0xa8] sm:$0xff]  ;;  %v798_v22 = vld [vmem:[%s4472_s0 + $0x98] sm:$0xff]  ;;  %s771_s23 = scalar_lea.vmem %s4474_s2, %s4484_s27  ;;  %s776_s30 = scalar_lea.vmem %s4475_s3, %s4484_s27 }
 0x102   : > { %2013 = vmatprep.mubr.bf16.mxu1 %v2884_v24  ;;  %2239 = vmatprep.mubr.bf16.mxu0 %v2888_v25  ;;  %v802_v23 = vld [vmem:[%s4472_s0 + $0xb8] sm:$0xff]  ;;  %v2853_v24 = vcombine.low %v788_v12, %v792_v13  ;;  %v2857_v25 = vcombine.low %v790_v14, %v794_v15  ;;  %s3381_s27 = sshll.u32 %s3442_s14, 4  ;;  %s3382_s27 = int_to_ptr.vmem [resolvable:$false] %s3381_s27 }
 0x103   : > { %v2865_v3 = vcombine.low %v798_v22, %v802_v23  ;;  %s3383_s20 = scalar_lea.vmem %s3382_s27, 8192  ;;  %p3384_p3 = scmp.lt.s32.totalorder %s4413_s9, %s3382_s27 }
 0x104   : > { %2063 = vmatpush1.bf16.msra.mxu1 %v3331_v26  ;;  %2289 = vmatpush1.bf16.msra.mxu0 %v3334_v27  ;;  %v2862_v26 = vcombine.high %v796_v20, %v800_v21  ;;  %v2866_v27 = vcombine.high %v798_v22, %v802_v23  ;;  %p3385_p4 = scmp.lt.s32.totalorder %s3383_s20, %s3377_s13 }
 0x105   : > { %2064 = vmatprep.subr.bf16.mxu1 %v3339_v28  ;;  %2290 = vmatprep.subr.bf16.mxu0 %v3342_v29  ;;  %v804_v28 = vld [vmem:[%s4472_s0 + $0xc8] sm:$0xff] }
 0x106   : > { %v808_v29 = vld [vmem:[%s4472_s0 + $0xe8] sm:$0xff]  ;;  %p3386_p5 = por %p3385_p4, %p3384_p3 }
 0x107   : > { %2014 = vmatmul.mubr.bf16.gmra.mrb[20].mxu1 %v2883_v1  ;;  %2240 = vmatmul.mubr.bf16.gmra.mrb[20].mxu0 %v2887_v2  ;;  %v810_v1 = vld [vmem:[%s4472_s0 + $0xf8] sm:$0xff]  ;;  %v2861_v2 = vcombine.low %v796_v20, %v800_v21  ;;  %v2870_v5 = vcombine.high %v804_v28, %v808_v29 }
 0x108   : > { %2065 = vmatpush1.bf16.msra.mxu1 %v3337_v30  ;;  %2291 = vmatpush1.bf16.msra.mxu0 %v3340_v31  ;;  %v2874_v6 = vcombine.high %v806_v0, %v810_v1  ;;  %v812_v30 = vld [vmem:[%s4472_s0 + $0x108] sm:$0xff]  ;;  %p3387_p7 = pnand %p3386_p5, %p3380_p2 }
 0x109   : > { %2066 = vmatprep.subr.bf16.mxu1 %v3345_v32  ;;  %2292 = vmatprep.subr.bf16.mxu0 %v3348_v33  ;;  %v816_v31 = vld [vmem:[%s4472_s0 + $0x128] sm:$0xff]  ;;  %v814_v32 = vld [vmem:[%s4472_s0 + $0x118] sm:$0xff] }
 0x10a   : > { %2023 = vmatprep.mubr.bf16.mxu1 %v2892_v34  ;;  %2249 = vmatprep.mubr.bf16.mxu0 %v2896_v35  ;;  %v818_v33 = vld [vmem:[%s4472_s0 + $0x138] sm:$0xff]  ;;  %v2869_v34 = vcombine.low %v804_v28, %v808_v29  ;;  %v2873_v35 = vcombine.low %v806_v0, %v810_v1 }
 0x10b   : > { %v2881_v43 = vcombine.low %v814_v32, %v818_v33 }
 0x10c   : > { %2067 = vmatpush1.bf16.msra.mxu1 %v3343_v36  ;;  %2293 = vmatpush1.bf16.msra.mxu0 %v3346_v37  ;;  %v2878_v36 = vcombine.high %v812_v30, %v816_v31  ;;  %v2882_v37 = vcombine.high %v814_v32, %v818_v33 }
 0x10d   : > { %2068 = vmatprep.subr.bf16.mxu1 %v3351_v38  ;;  %2294 = vmatprep.subr.bf16.mxu0 %v3354_v39  ;;  %v820_v38 = vld [vmem:[%s4472_s0 + $0x148] sm:$0xff] }
 0x10e   : > { %v824_v39 = vld [vmem:[%s4472_s0 + $0x168] sm:$0xff] }
 0x10f   : > { %2024 = vmatmul.mubr.bf16.gmra.mrb[24].mxu1 %v2891_v41  ;;  %2250 = vmatmul.mubr.bf16.gmra.mrb[24].mxu0 %v2895_v42  ;;  %v826_v41 = vld [vmem:[%s4472_s0 + $0x178] sm:$0xff]  ;;  %v2877_v42 = vcombine.low %v812_v30, %v816_v31  ;;  %v2886_v44 = vcombine.high %v820_v38, %v824_v39 }
 0x110   : > { %2069 = vmatpush1.bf16.msra.mxu1 %v3349_v46  ;;  %2295 = vmatpush1.bf16.msra.mxu0 %v3352_v47  ;;  %v2890_v45 = vcombine.high %v822_v40, %v826_v41  ;;  %v828_v46 = vld [vmem:[%s4472_s0 + $0x188] sm:$0xff] }
 0x111   : > { %2070 = vmatprep.subr.bf16.mxu1 %v3357_v48  ;;  %2296 = vmatprep.subr.bf16.mxu0 %v3360_v49  ;;  %v832_v47 = vld [vmem:[%s4472_s0 + $0x1a8] sm:$0xff]  ;;  %v830_v48 = vld [vmem:[%s4472_s0 + $0x198] sm:$0xff] }
 0x112   : > { %2033 = vmatprep.mubr.bf16.mxu1 %v2900_v50  ;;  %2259 = vmatprep.mubr.bf16.mxu0 %v2904_v51  ;;  %v834_v49 = vld [vmem:[%s4472_s0 + $0x1b8] sm:$0xff]  ;;  %v2885_v50 = vcombine.low %v820_v38, %v824_v39  ;;  %v2889_v51 = vcombine.low %v822_v40, %v826_v41 }
 0x113   : > { %v2897_v59 = vcombine.low %v830_v48, %v834_v49 }
 0x114   : > { %2071 = vmatpush1.bf16.msra.mxu1 %v3355_v52  ;;  %2297 = vmatpush1.bf16.msra.mxu0 %v3358_v53  ;;  %v2894_v52 = vcombine.high %v828_v46, %v832_v47  ;;  %v2898_v53 = vcombine.high %v830_v48, %v834_v49 }
 0x115   : > { %2072 = vmatprep.subr.bf16.mxu1 %v3363_v54  ;;  %2298 = vmatprep.subr.bf16.mxu0 %v3366_v55  ;;  %v836_v54 = vld [vmem:[%s4472_s0 + $0x1c8] sm:$0xff] }
 0x116   : > { %v840_v55 = vld [vmem:[%s4472_s0 + $0x1e8] sm:$0xff] }
 0x117   : > { %2034 = vmatmul.mubr.bf16.gmra.mrb[28].mxu1 %v2899_v57  ;;  %2260 = vmatmul.mubr.bf16.gmra.mrb[28].mxu0 %v2903_v58  ;;  %v842_v57 = vld [vmem:[%s4472_s0 + $0x1f8] sm:$0xff]  ;;  %v2893_v58 = vcombine.low %v828_v46, %v832_v47  ;;  %v2902_v60 = vcombine.high %v836_v54, %v840_v55 }
 0x118   : > { %2073 = vmatpush1.bf16.msra.mxu1 %v3361_v62  ;;  %2299 = vmatpush1.bf16.msra.mxu0 %v3364_v63  ;;  %v2906_v61 = vcombine.high %v838_v56, %v842_v57  ;;  %v2901_v62 = vcombine.low %v836_v54, %v840_v55  ;;  %v2905_v63 = vcombine.low %v838_v56, %v842_v57 }
 0x119   : > { %2074 = vmatprep.subr.bf16.mxu1 %v3369_v4  ;;  %2300 = vmatprep.subr.bf16.mxu0 %v3372_v7 }
 0x11a   : > { %2076 = vmatprep.mubr.bf16.mxu1 %v2846_v8  ;;  %2302 = vmatprep.mubr.bf16.mxu0 %v2850_v9 }
 0x11c   : > { %2075 = vmatpush1.bf16.msra.mxu1 %v3367_v10  ;;  %2301 = vmatpush1.bf16.msra.mxu0 %v3370_v11 }
 0x11f   : > { %2077 = vmatmul.mubr.bf16.vlgmr.msra.gmra.mrb[0].mxu1 %v2845_v16  ;;  %2303 = vmatmul.mubr.bf16.vlgmr.msra.gmra.mrb[0].mxu0 %v2849_v17 }
 0x120   : > { %2086 = vmatprep.mubr.bf16.mxu1 %v2854_v18  ;;  %2312 = vmatprep.mubr.bf16.mxu0 %v2858_v19 }
 0x127   : > { %2087 = vmatmul.mubr.bf16.gmra.mrb[4].mxu1 %v2853_v24  ;;  %2313 = vmatmul.mubr.bf16.gmra.mrb[4].mxu0 %v2857_v25 }
 0x128   : > { %2096 = vmatprep.mubr.bf16.mxu1 %v2862_v26  ;;  %2322 = vmatprep.mubr.bf16.mxu0 %v2866_v27 }
 0x12f   : > { %2097 = vmatmul.mubr.bf16.gmra.mrb[8].mxu1 %v2861_v2  ;;  %2323 = vmatmul.mubr.bf16.gmra.mrb[8].mxu0 %v2865_v3 }
 0x130   : > { %2106 = vmatprep.mubr.bf16.mxu1 %v2870_v5  ;;  %2332 = vmatprep.mubr.bf16.mxu0 %v2874_v6 }
 0x137   : > { %2107 = vmatmul.mubr.bf16.gmra.mrb[12].mxu1 %v2869_v34  ;;  %2333 = vmatmul.mubr.bf16.gmra.mrb[12].mxu0 %v2873_v35 }
 0x138   : > { %2116 = vmatprep.mubr.bf16.mxu1 %v2878_v36  ;;  %2342 = vmatprep.mubr.bf16.mxu0 %v2882_v37 }
 0x13f   : > { %2117 = vmatmul.mubr.bf16.gmra.mrb[16].mxu1 %v2877_v42  ;;  %2343 = vmatmul.mubr.bf16.gmra.mrb[16].mxu0 %v2881_v43 }
 0x140   : > { %2126 = vmatprep.mubr.bf16.mxu1 %v2886_v44  ;;  %2352 = vmatprep.mubr.bf16.mxu0 %v2890_v45 }
 0x147   : > { %2127 = vmatmul.mubr.bf16.gmra.mrb[20].mxu1 %v2885_v50  ;;  %2353 = vmatmul.mubr.bf16.gmra.mrb[20].mxu0 %v2889_v51 }
 0x148   : > { %2136 = vmatprep.mubr.bf16.mxu1 %v2894_v52  ;;  %2362 = vmatprep.mubr.bf16.mxu0 %v2898_v53 }
 0x14f   : > { %2137 = vmatmul.mubr.bf16.gmra.mrb[24].mxu1 %v2893_v58  ;;  %2363 = vmatmul.mubr.bf16.gmra.mrb[24].mxu0 %v2897_v59 }
 0x150   : > { %2146 = vmatprep.mubr.bf16.mxu1 %v2902_v60  ;;  %2372 = vmatprep.mubr.bf16.mxu0 %v2906_v61 }
 0x157   : > { %2147 = vmatmul.mubr.bf16.gmra.mrb[28].mxu1 %v2901_v62  ;;  %2373 = vmatmul.mubr.bf16.gmra.mrb[28].mxu0 %v2905_v63 }
 0x1f2   : > { %v2078_v4 = vpop.f32.mrb[0].mxu1  ;;  %v2304_v7 = vpop.f32.mrb[0].mxu0 }
 0x1f3   : > { %v4134_v8 = vadd.f32 %v2304_v7, %v2078_v4  ;;  %v2080_v9 = vpop.f32.mrb[1].mxu1  ;;  %v2306_v10 = vpop.f32.mrb[1].mxu0 }
 0x1f4   : > { %v4136_v11 = vadd.f32 %v2306_v10, %v2080_v9  ;;  %v2082_v12 = vpop.f32.mrb[2].mxu1  ;;  %v2308_v13 = vpop.f32.mrb[2].mxu0 }
 0x1f5   : > { %v4138_v14 = vadd.f32 %v2308_v13, %v2082_v12  ;;  %v2084_v15 = vpop.f32.mrb[3].mxu1  ;;  %v2310_v16 = vpop.f32.mrb[3].mxu0 }
 0x1f6   : > { %v4140_v17 = vadd.f32 %v2310_v16, %v2084_v15 }
 0x1f7   : > { %v2383_v36 = vadd.f32 %v4138_v14, %v4134_v8 }
 0x1f8   : > { %v2404_v37 = vadd.f32 %v4140_v17, %v4136_v11 }
 0x1fa   : > { %v2088_v18 = vpop.f32.mrb[4].mxu1  ;;  %v2314_v19 = vpop.f32.mrb[4].mxu0 }
 0x1fb   : > { %v4142_v20 = vadd.f32 %v2314_v19, %v2088_v18  ;;  %v2090_v21 = vpop.f32.mrb[5].mxu1  ;;  %v2316_v22 = vpop.f32.mrb[5].mxu0 }
 0x1fc   : > { %v4144_v23 = vadd.f32 %v2316_v22, %v2090_v21  ;;  %v2092_v24 = vpop.f32.mrb[6].mxu1  ;;  %v2318_v25 = vpop.f32.mrb[6].mxu0 }
 0x1fd   : > { %v4146_v26 = vadd.f32 %v2318_v25, %v2092_v24  ;;  %v2094_v27 = vpop.f32.mrb[7].mxu1  ;;  %v2320_v28 = vpop.f32.mrb[7].mxu0  ;;  %v2384_v38 = vadd.f32 %v4142_v20, %v2383_v36 }
 0x1fe   : > { %v4148_v29 = vadd.f32 %v2320_v28, %v2094_v27  ;;  %v2405_v39 = vadd.f32 %v4144_v23, %v2404_v37 }
 0x1ff   : > { %v2385_v48 = vadd.f32 %v4146_v26, %v2384_v38 }
 0x200   : > { %v2406_v52 = vadd.f32 %v4148_v29, %v2405_v39 }
 0x202   : > { %v2098_v0 = vpop.f32.mrb[8].mxu1  ;;  %v2324_v1 = vpop.f32.mrb[8].mxu0 }
 0x203   : > { %v4150_v2 = vadd.f32 %v2324_v1, %v2098_v0  ;;  %v2100_v3 = vpop.f32.mrb[9].mxu1  ;;  %v2326_v5 = vpop.f32.mrb[9].mxu0 }
 0x204   : > { %v4152_v6 = vadd.f32 %v2326_v5, %v2100_v3  ;;  %v2102_v30 = vpop.f32.mrb[10].mxu1  ;;  %v2328_v31 = vpop.f32.mrb[10].mxu0 }
 0x205   : > { %v4154_v32 = vadd.f32 %v2328_v31, %v2102_v30  ;;  %v2104_v33 = vpop.f32.mrb[11].mxu1  ;;  %v2330_v34 = vpop.f32.mrb[11].mxu0  ;;  %v2386_v54 = vadd.f32 %v4150_v2, %v2385_v48 }
 0x206   : > { %v4156_v35 = vadd.f32 %v2330_v34, %v2104_v33  ;;  %v2407_v55 = vadd.f32 %v4152_v6, %v2406_v52 }
 0x207   : > { %v2387_v58 = vadd.f32 %v4154_v32, %v2386_v54 }
 0x208   : > { %v2408_v62 = vadd.f32 %v4156_v35, %v2407_v55 }
 0x20a   : > { %v2108_v40 = vpop.f32.mrb[12].mxu1  ;;  %v2334_v41 = vpop.f32.mrb[12].mxu0 }
 0x20b   : > { %v4164_v42 = vadd.f32 %v2334_v41, %v2108_v40  ;;  %v2110_v43 = vpop.f32.mrb[13].mxu1  ;;  %v2336_v44 = vpop.f32.mrb[13].mxu0 }
 0x20c   : > { %v4166_v45 = vadd.f32 %v2336_v44, %v2110_v43  ;;  %v2112_v46 = vpop.f32.mrb[14].mxu1  ;;  %v2338_v47 = vpop.f32.mrb[14].mxu0 }
 0x20d   : > { %v4169_v49 = vadd.f32 %v2338_v47, %v2112_v46  ;;  %v2114_v50 = vpop.f32.mrb[15].mxu1  ;;  %v2340_v51 = vpop.f32.mrb[15].mxu0  ;;  %v2388_v9 = vadd.f32 %v4164_v42, %v2387_v58 }
 0x20e   : > { %v4172_v53 = vadd.f32 %v2340_v51, %v2114_v50  ;;  %v2409_v15 = vadd.f32 %v4166_v45, %v2408_v62 }
 0x20f   : > { %v2389_v18 = vadd.f32 %v4169_v49, %v2388_v9 }
 0x210   : > { %v2410_v19 = vadd.f32 %v4172_v53, %v2409_v15 }
 0x212   : > { %v2118_v56 = vpop.f32.mrb[16].mxu1  ;;  %v2344_v57 = vpop.f32.mrb[16].mxu0 }
 0x213   : > { %v4177_v59 = vadd.f32 %v2344_v57, %v2118_v56  ;;  %v2120_v60 = vpop.f32.mrb[17].mxu1  ;;  %v2346_v61 = vpop.f32.mrb[17].mxu0 }
 0x214   : > { %v4180_v63 = vadd.f32 %v2346_v61, %v2120_v60  ;;  %v2122_v4 = vpop.f32.mrb[18].mxu1  ;;  %v2348_v7 = vpop.f32.mrb[18].mxu0 }
 0x215   : > { %v4183_v10 = vadd.f32 %v2348_v7, %v2122_v4  ;;  %v2124_v12 = vpop.f32.mrb[19].mxu1  ;;  %v2350_v13 = vpop.f32.mrb[19].mxu0  ;;  %v2390_v24 = vadd.f32 %v4177_v59, %v2389_v18 }
 0x216   : > { %v4186_v16 = vadd.f32 %v2350_v13, %v2124_v12  ;;  %v2411_v0 = vadd.f32 %v4180_v63, %v2410_v19 }
 0x217   : > { %v2391_v36 = vadd.f32 %v4183_v10, %v2390_v24 }
 0x218   : > { %v2412_v37 = vadd.f32 %v4186_v16, %v2411_v0 }
 0x21a   : > { %v2128_v21 = vpop.f32.mrb[20].mxu1  ;;  %v2354_v22 = vpop.f32.mrb[20].mxu0 }
 0x21b   : > { %v4191_v25 = vadd.f32 %v2354_v22, %v2128_v21  ;;  %v2130_v27 = vpop.f32.mrb[21].mxu1  ;;  %v2356_v28 = vpop.f32.mrb[21].mxu0 }
 0x21c   : > { %v4194_v1 = vadd.f32 %v2356_v28, %v2130_v27  ;;  %v2132_v3 = vpop.f32.mrb[22].mxu1  ;;  %v2358_v5 = vpop.f32.mrb[22].mxu0 }
 0x21d   : > { %v4196_v30 = vadd.f32 %v2358_v5, %v2132_v3  ;;  %v2134_v31 = vpop.f32.mrb[23].mxu1  ;;  %v2360_v33 = vpop.f32.mrb[23].mxu0  ;;  %v2392_v38 = vadd.f32 %v4191_v25, %v2391_v36 }
 0x21e   : > { %v4198_v34 = vadd.f32 %v2360_v33, %v2134_v31  ;;  %v2413_v39 = vadd.f32 %v4194_v1, %v2412_v37 }
 0x21f   : > { %v2393_v51 = vadd.f32 %v4196_v30, %v2392_v38 }
 0x220   : > { %v2414_v56 = vadd.f32 %v4198_v34, %v2413_v39 }
 0x222   : > { %v2138_v40 = vpop.f32.mrb[24].mxu1  ;;  %v2364_v41 = vpop.f32.mrb[24].mxu0 }
 0x223   : > { %v4204_v43 = vadd.f32 %v2364_v41, %v2138_v40  ;;  %v2140_v44 = vpop.f32.mrb[25].mxu1  ;;  %v2366_v46 = vpop.f32.mrb[25].mxu0 }
 0x224   : > { %v4206_v47 = vadd.f32 %v2366_v46, %v2140_v44  ;;  %v2142_v48 = vpop.f32.mrb[26].mxu1  ;;  %v2368_v50 = vpop.f32.mrb[26].mxu0 }
 0x225   : > { %v4209_v52 = vadd.f32 %v2368_v50, %v2142_v48  ;;  %v2144_v54 = vpop.f32.mrb[27].mxu1  ;;  %v2370_v55 = vpop.f32.mrb[27].mxu0  ;;  %v2394_v58 = vadd.f32 %v4204_v43, %v2393_v51 }
 0x226   : > { %v4212_v57 = vadd.f32 %v2370_v55, %v2144_v54  ;;  %v2415_v60 = vadd.f32 %v4206_v47, %v2414_v56 }
 0x227   : > { %v2395_v4 = vadd.f32 %v4209_v52, %v2394_v58 }
 0x228   : > { %v2416_v13 = vadd.f32 %v4212_v57, %v2415_v60 }
 0x22a   : > { %v2148_v61 = vpop.f32.mrb[28].mxu1  ;;  %v2374_v62 = vpop.f32.mrb[28].mxu0 }
 0x22b   : > { %v4217_v7 = vadd.f32 %v2374_v62, %v2148_v61  ;;  %v2150_v9 = vpop.f32.mrb[29].mxu1  ;;  %v2376_v12 = vpop.f32.mrb[29].mxu0 }
 0x22c   : > { %v4220_v15 = vadd.f32 %v2376_v12, %v2150_v9  ;;  %v2152_v18 = vpop.f32.mrb[30].mxu1  ;;  %v2378_v19 = vpop.f32.mrb[30].mxu0 }
 0x22d   : > { %v2396_v21 = vadd.f32 %v4217_v7, %v2395_v4  ;;  %v4223_v22 = vadd.f32 %v2378_v19, %v2152_v18  ;;  %v2154_v24 = vpop.f32.mrb[31].mxu1  ;;  %v2380_v27 = vpop.f32.mrb[31].mxu0 }
 0x22e   : > { %v2417_v28 = vadd.f32 %v4220_v15, %v2416_v13  ;;  %v4226_v0 = vadd.f32 %v2380_v27, %v2154_v24 }
 0x22f   : > { %v2397_v3 = vadd.f32 %v4223_v22, %v2396_v21 }
 0x230   : > { %v2418_v5 = vadd.f32 %v4226_v0, %v2417_v28 }
 0x231   : > { %v2398_v31 = vrot.slane %v2397_v3, 4 }
 0x232   : > { %v2419_v33 = vrot.slane %v2418_v5, 4 }
 0x233   : > { %v2399_v36 = vadd.f32 %v2398_v31, %v2397_v3 }
 0x234   : > { %v2420_v37 = vadd.f32 %v2419_v33, %v2418_v5 }
 0x235   : > { %v2400_v38 = vrot.slane %v2399_v36, 2 }
 0x236   : > { %v2421_v39 = vrot.slane %v2420_v37, 2 }
 0x237   : > { %v2401_v40 = vadd.f32 %v2400_v38, %v2399_v36 }
 0x238   : > { %v2422_v41 = vadd.f32 %v2421_v39, %v2420_v37 }
 0x239   : > { %v2402_v44 = vrot.slane %v2401_v40, 1 }
 0x23a   : > { %v2423_v48 = vrot.slane %v2422_v41, 1 }
 0x23b   : > { %v2403_v46 = vadd.f32 %v2402_v44, %v2401_v40 }
 0x23c   : > { %v2424_v55 = vadd.f32 %v2423_v48, %v2422_v41 }
 0x23d   : > { %v4230_v50 = vmul.f32 0.0078125, %v2403_v46 }
 0x23e   : > { %v4238_v61 = vmul.f32 0.0078125, %v2424_v55 }
 0x23f   : > { %v2428_v51 = vsub.f32 %v4134_v8, %v4230_v50  ;;  %v2430_v54 = vsub.f32 %v4138_v14, %v4230_v50  ;;  %v2432_v56 = vsub.f32 %v4142_v20, %v4230_v50  ;;  %v2434_v62 = vsub.f32 %v4146_v26, %v4230_v50 }
 0x240   : > { %v2436_v4 = vsub.f32 %v4150_v2, %v4230_v50  ;;  %v2429_v13 = vsub.f32 %v4136_v11, %v4238_v61  ;;  %v2431_v18 = vsub.f32 %v4140_v17, %v4238_v61  ;;  %v2438_v19 = vsub.f32 %v4154_v32, %v4230_v50 }
 0x241   : > { %v2460_v58 = vmul.f32 %v2428_v51, %v2428_v51  ;;  %v2462_v60 = vmul.f32 %v2430_v54, %v2430_v54  ;;  %v2464_v9 = vmul.f32 %v2432_v56, %v2432_v56  ;;  %v2466_v21 = vmul.f32 %v2434_v62, %v2434_v62 }
 0x242   : > { %v2440_v27 = vsub.f32 %v4164_v42, %v4230_v50  ;;  %v2468_v28 = vmul.f32 %v2436_v4, %v2436_v4  ;;  %v2433_v5 = vsub.f32 %v4144_v23, %v4238_v61  ;;  %v2461_v31 = vmul.f32 %v2429_v13, %v2429_v13 }
 0x243   : > { %v2492_v12 = vadd.f32 %v2462_v60, %v2460_v58  ;;  %v2463_v33 = vmul.f32 %v2431_v18, %v2431_v18  ;;  %v2442_v36 = vsub.f32 %v4169_v49, %v4230_v50  ;;  %v2470_v37 = vmul.f32 %v2438_v19, %v2438_v19 }
 0x244   : > { %v2435_v39 = vsub.f32 %v4148_v29, %v4238_v61  ;;  %v2444_v40 = vsub.f32 %v4177_v59, %v4230_v50  ;;  %v2472_v41 = vmul.f32 %v2440_v27, %v2440_v27  ;;  %v2437_v46 = vsub.f32 %v4152_v6, %v4238_v61 }
 0x245   : > { %v2493_v24 = vadd.f32 %v2492_v12, %v2464_v9  ;;  %v2465_v48 = vmul.f32 %v2433_v5, %v2433_v5  ;;  %v2513_v51 = vadd.f32 %v2463_v33, %v2461_v31  ;;  %v2446_v54 = vsub.f32 %v4183_v10, %v4230_v50 }
 0x246   : > { %v2474_v55 = vmul.f32 %v2442_v36, %v2442_v36  ;;  %v2439_v58 = vsub.f32 %v4156_v35, %v4238_v61  ;;  %v2467_v60 = vmul.f32 %v2435_v39, %v2435_v39  ;;  %v2448_v4 = vsub.f32 %v4191_v25, %v4230_v50 }
 0x247   : > { %v2494_v3 = vadd.f32 %v2493_v24, %v2466_v21  ;;  %v2514_v62 = vadd.f32 %v2513_v51, %v2465_v48  ;;  %v2476_v9 = vmul.f32 %v2444_v40, %v2444_v40  ;;  %v2441_v13 = vsub.f32 %v4166_v45, %v4238_v61 }
 0x248   : > { %v2469_v18 = vmul.f32 %v2437_v46, %v2437_v46  ;;  %v2450_v21 = vsub.f32 %v4196_v30, %v4230_v50  ;;  %v2478_v24 = vmul.f32 %v2446_v54, %v2446_v54  ;;  %v2452_v31 = vsub.f32 %v4204_v43, %v4230_v50 }
 0x249   : > { %v2495_v38 = vadd.f32 %v2494_v3, %v2468_v28  ;;  %v2515_v19 = vadd.f32 %v2514_v62, %v2467_v60  ;;  %v2443_v28 = vsub.f32 %v4172_v53, %v4238_v61  ;;  %v2471_v3 = vmul.f32 %v2439_v58, %v2439_v58 }
 0x24a   : > { %v2480_v33 = vmul.f32 %v2448_v4, %v2448_v4  ;;  %v2454_v40 = vsub.f32 %v4209_v52, %v4230_v50  ;;  %v2447_v46 = vsub.f32 %v4186_v16, %v4238_v61  ;;  %v2456_v54 = vsub.f32 %v4217_v7, %v4230_v50 }
 0x24b   : > { %v2496_v44 = vadd.f32 %v2495_v38, %v2470_v37  ;;  %v2516_v5 = vadd.f32 %v2515_v19, %v2469_v18  ;;  %v2445_v37 = vsub.f32 %v4180_v63, %v4238_v61  ;;  %v2473_v38 = vmul.f32 %v2441_v13, %v2441_v13 }
 0x24c   : > { %v2475_v48 = vmul.f32 %v2443_v28, %v2443_v28  ;;  %v2449_v58 = vsub.f32 %v4194_v1, %v4238_v61  ;;  %v2458_v4 = vsub.f32 %v4223_v22, %v4230_v50  ;;  %v2451_v13 = vsub.f32 %v4198_v34, %v4238_v61 }
 0x24d   : > { %v2497_v56 = vadd.f32 %v2496_v44, %v2472_v41  ;;  %v2517_v39 = vadd.f32 %v2516_v5, %v2471_v3  ;;  %v2482_v41 = vmul.f32 %v2450_v21, %v2450_v21  ;;  %v2477_v60 = vmul.f32 %v2445_v37, %v2445_v37 }
 0x24e   : > { %v2479_v18 = vmul.f32 %v2447_v46, %v2447_v46  ;;  %v2488_v21 = vmul.f32 %v2456_v54, %v2456_v54  ;;  %v2481_v28 = vmul.f32 %v2449_v58, %v2449_v58  ;;  %v2490_v5 = vmul.f32 %v2458_v4, %v2458_v4 }
 0x24f   : > { %v2498_v12 = vadd.f32 %v2497_v56, %v2474_v55  ;;  %v2518_v51 = vadd.f32 %v2517_v39, %v2473_v38  ;;  %v2484_v55 = vmul.f32 %v2452_v31, %v2452_v31  ;;  %v2457_v39 = vsub.f32 %v4220_v15, %v4238_v61 }
 0x250   : > { %v2459_v46 = vsub.f32 %v4226_v0, %v4238_v61 }
 0x251   : > { %v2499_v27 = vadd.f32 %v2498_v12, %v2476_v9  ;;  %v2519_v62 = vadd.f32 %v2518_v51, %v2475_v48  ;;  %v2486_v9 = vmul.f32 %v2454_v40, %v2454_v40 }
 0x253   : > { %v2500_v36 = vadd.f32 %v2499_v27, %v2478_v24  ;;  %v2520_v19 = vadd.f32 %v2519_v62, %v2477_v60  ;;  %v2453_v27 = vsub.f32 %v4206_v47, %v4238_v61  ;;  %v2491_v60 = vmul.f32 %v2459_v46, %v2459_v46 }
 0x255   : > { %v2501_v44 = vadd.f32 %v2500_v36, %v2480_v33  ;;  %v2521_v3 = vadd.f32 %v2520_v19, %v2479_v18  ;;  %v2455_v33 = vsub.f32 %v4212_v57, %v4238_v61  ;;  %v2483_v36 = vmul.f32 %v2451_v13, %v2451_v13 }
 0x256   : > { %v2485_v40 = vmul.f32 %v2453_v27, %v2453_v27 }
 0x257   : > { %v2502_v56 = vadd.f32 %v2501_v44, %v2482_v41  ;;  %v2522_v37 = vadd.f32 %v2521_v3, %v2481_v28  ;;  %v2487_v48 = vmul.f32 %v2455_v33, %v2455_v33 }
 0x259   : > { %v2503_v12 = vadd.f32 %v2502_v56, %v2484_v55  ;;  %v2523_v41 = vadd.f32 %v2522_v37, %v2483_v36  ;;  %v2489_v55 = vmul.f32 %v2457_v39, %v2457_v39  ;;  %v3441_v36 = vmov 1966171168  }
 0x25a   : > { %v2545_v37 = vunpack.c.l.s4 %v3441_v36 }
 0x25b   : > { %v2504_v24 = vadd.f32 %v2503_v12, %v2486_v9  ;;  %v2524_v51 = vadd.f32 %v2523_v41, %v2485_v40 }
 0x25c   : > { %v2546_v39 = vunpack.c.0.s8 %v2545_v37 }
 0x25d   : > { %v2505_v31 = vadd.f32 %v2504_v24, %v2488_v21  ;;  %v2525_v56 = vadd.f32 %v2524_v51, %v2487_v48 }
 0x25f   : > { %v2506_v38 = vadd.f32 %v2505_v31, %v2490_v5  ;;  %v2526_v62 = vadd.f32 %v2525_v56, %v2489_v55 }
 0x261   : > { %v2507_v44 = vrot.slane %v2506_v38, 4  ;;  %v2527_v9 = vadd.f32 %v2526_v62, %v2491_v60 }
 0x263   : > { %v2508_v54 = vadd.f32 %v2507_v44, %v2506_v38  ;;  %v2528_v13 = vrot.slane %v2527_v9, 4  ;;  %v2547_v38 = vlaneseq }
 0x265   : > { %v2509_v58 = vrot.slane %v2508_v54, 2  ;;  %v2529_v19 = vadd.f32 %v2528_v13, %v2527_v9  ;;  %v2548_v40 = vshrl.u32 %v2547_v38, 7 }
 0x267   : > { %v2510_v4 = vadd.f32 %v2509_v58, %v2508_v54  ;;  %v2530_v21 = vrot.slane %v2529_v19, 2  ;;  %v2549_v44 = vsub.s32 %v2546_v39, %v2548_v40  ;;  %v2536_v54 = vld [vmem:[%s771_s23] sm:$0x3]  ;;  %v2564_v56 = vsub.s32 0, %v2548_v40 }
 0x268   : > { %v2568_v58 = vsub.s32 1, %v2548_v40 }
 0x269   : > { %v2511_v12 = vrot.slane %v2510_v4, 1  ;;  %v2531_v27 = vadd.f32 %v2530_v21, %v2529_v19 }
 0x26b   : > { %v2512_v18 = vadd.f32 %v2511_v12, %v2510_v4  ;;  %v2532_v28 = vrot.slane %v2531_v27, 1 }
 0x26d   : > { %v2534_v24 = vmul.f32 0.0078125, %v2512_v18  ;;  %v2533_v5 = vadd.f32 %v2532_v28, %v2531_v27 }
 0x26f   : > { %v2537_v3 = vadd.f32 1e-05, %v2534_v24  ;;  %v2535_v31 = vmul.f32 0.0078125, %v2533_v5  ;;  %v2560_v5 = vld [vmem:[%s776_s30] sm:$0x3] }
 0x271   : > { %3373 = vrsqrt.f32 %v2537_v3  ;;  %v2538_v33 = vadd.f32 1e-05, %v2535_v31 }
 0x273   : > { %3375 = vrsqrt.f32 %v2538_v33 }
 0x27b   : > { %v3374_v41 = vpop.eup %3373 }
 0x27d   : > { %v3376_v46 = vpop.eup %3375 }
 0x27e   : > { %v2543_v48 = vcombine.low %v3374_v41, %v3376_v46 }
 0x280   : > { %v2550_v51 = vrot.slane %v2543_v48, %v2549_v44 }
 0x282   : > { %v2557_v55 = vrot.slane %v2550_v51, %v2549_v44 }
 0x284   : > { %v2559_v60 = vmul.f32 %v2557_v55, %v2536_v54 }
 0x286   : > { %v2565_v62 = vrot.slane %v2559_v60, %v2564_v56  ;;  %v2569_v4 = vrot.slane %v2559_v60, %v2568_v58 }
 0x288   : > { %v2572_v9 = vmul.f32 %v2565_v62, %v4230_v50  ;;  %v2573_v12 = vmul.f32 %v2569_v4, %v4238_v61  ;;  %v2593_v18 = vmul.f32 %v4134_v8, %v2565_v62  ;;  %v2594_v19 = vmul.f32 %v4136_v11, %v2569_v4 }
 0x289   : > { %v2595_v21 = vmul.f32 %v4138_v14, %v2565_v62  ;;  %v2596_v24 = vmul.f32 %v4140_v17, %v2569_v4  ;;  %v2597_v27 = vmul.f32 %v4142_v20, %v2565_v62  ;;  %v2598_v50 = vmul.f32 %v4144_v23, %v2569_v4 }
 0x28a   : > { %v2576_v13 = vcombine.low %v2572_v9, %v2573_v12  ;;  %v2599_v61 = vmul.f32 %v4146_v26, %v2565_v62  ;;  %v2600_v3 = vmul.f32 %v4148_v29, %v2569_v4  ;;  %v2601_v31 = vmul.f32 %v4150_v2, %v2565_v62 }
 0x28b   : > { %v2602_v8 = vmul.f32 %v4152_v6, %v2569_v4  ;;  %v2603_v11 = vmul.f32 %v4154_v32, %v2565_v62  ;;  %v2604_v14 = vmul.f32 %v4156_v35, %v2569_v4  ;;  %v2605_v17 = vmul.f32 %v4164_v42, %v2565_v62 }
 0x28c   : > { %v2583_v28 = vrot.slane %v2576_v13, %v2549_v44  ;;  %v2606_v20 = vmul.f32 %v4166_v45, %v2569_v4  ;;  %v2607_v23 = vmul.f32 %v4169_v49, %v2565_v62  ;;  %v2608_v26 = vmul.f32 %v4172_v53, %v2569_v4 }
 0x28d   : > { %v2609_v29 = vmul.f32 %v4177_v59, %v2565_v62  ;;  %v2610_v36 = vmul.f32 %v4180_v63, %v2569_v4  ;;  %v2611_v2 = vmul.f32 %v4183_v10, %v2565_v62  ;;  %v2612_v32 = vmul.f32 %v4186_v16, %v2569_v4 }
 0x28e   : > { %v2590_v33 = vrot.slane %v2583_v28, %v2549_v44  ;;  %v2613_v35 = vmul.f32 %v4191_v25, %v2565_v62  ;;  %v2614_v37 = vmul.f32 %v4194_v1, %v2569_v4  ;;  %v2615_v42 = vmul.f32 %v4196_v30, %v2565_v62 }
 0x28f   : > { %v2616_v45 = vmul.f32 %v4198_v34, %v2569_v4  ;;  %v2617_v49 = vmul.f32 %v4204_v43, %v2565_v62  ;;  %v2618_v53 = vmul.f32 %v4206_v47, %v2569_v4  ;;  %v2619_v59 = vmul.f32 %v4209_v52, %v2565_v62 }
 0x290   : > { %v2592_v6 = vsub.f32 %v2560_v5, %v2590_v33  ;;  %v2620_v63 = vmul.f32 %v4212_v57, %v2569_v4  ;;  %v2621_v16 = vmul.f32 %v4217_v7, %v2565_v62  ;;  %v2622_v25 = vmul.f32 %v4220_v15, %v2569_v4 }
 0x291   : > { %v2623_v1 = vmul.f32 %v4223_v22, %v2565_v62  ;;  %v2624_v30 = vmul.f32 %v4226_v0, %v2569_v4 }
 0x292   : > { %v2629_v10 = vrot.slane %v2592_v6, %v2564_v56  ;;  %v2633_v38 = vrot.slane %v2592_v6, %v2568_v58 }
 0x294   : > { %v2636_v39 = vadd.f32 %v2629_v10, %v2593_v18  ;;  %v2637_v34 = vadd.f32 %v2633_v38, %v2594_v19  ;;  %v2638_v43 = vadd.f32 %v2629_v10, %v2595_v21  ;;  %v2639_v40 = vadd.f32 %v2633_v38, %v2596_v24 }
 0x295   : > { %v2640_v47 = vadd.f32 %v2629_v10, %v2597_v27  ;;  %v2641_v41 = vadd.f32 %v2633_v38, %v2598_v50  ;;  %v2642_v52 = vadd.f32 %v2629_v10, %v2599_v61  ;;  %v2643_v44 = vadd.f32 %v2633_v38, %v2600_v3 }
 0x296   : > { %v2644_v57 = vadd.f32 %v2629_v10, %v2601_v31  ;;  %v2645_v46 = vadd.f32 %v2633_v38, %v2602_v8  ;;  %v2646_v48 = vadd.f32 %v2629_v10, %v2603_v11  ;;  %v2647_v51 = vadd.f32 %v2633_v38, %v2604_v14 }
 0x297   : > { %v2648_v7 = vadd.f32 %v2629_v10, %v2605_v17  ;;  %v2649_v54 = vadd.f32 %v2633_v38, %v2606_v20  ;;  %v2650_v15 = vadd.f32 %v2629_v10, %v2607_v23  ;;  %v2651_v55 = vadd.f32 %v2633_v38, %v2608_v26 }
 0x298   : > { %v4340_v22 = vadd.f32 %v2629_v10, %v2609_v29  ;;  %v4342_v0 = vadd.f32 %v2633_v38, %v2610_v36  ;;  %v4344_v56 = vadd.f32 %v2629_v10, %v2611_v2  ;;  %v4346_v58 = vadd.f32 %v2633_v38, %v2612_v32 }
 0x299   : > { %v4348_v60 = vadd.f32 %v2629_v10, %v2613_v35  ;;  %v4350_v62 = vadd.f32 %v2633_v38, %v2614_v37  ;;  %v4352_v4 = vadd.f32 %v2629_v10, %v2615_v42  ;;  %v4354_v9 = vadd.f32 %v2633_v38, %v2616_v45 }
 0x29a   : > { %v4356_v12 = vadd.f32 %v2629_v10, %v2617_v49  ;;  %v4358_v13 = vadd.f32 %v2633_v38, %v2618_v53  ;;  %v4360_v18 = vadd.f32 %v2629_v10, %v2619_v59  ;;  %v4362_v19 = vadd.f32 %v2633_v38, %v2620_v63 }
 0x29b   : > { %v4364_v21 = vadd.f32 %v2629_v10, %v2621_v16  ;;  %v4366_v24 = vadd.f32 %v2633_v38, %v2622_v25  ;;  %v4368_v27 = vadd.f32 %v2629_v10, %v2623_v1  ;;  %v4370_v28 = vadd.f32 %v2633_v38, %v2624_v30 }
 0x29c   : > { %v2668_v50 = vmax.f32 %v2636_v39, 0.0  ;;  %v2669_v61 = vmax.f32 %v2637_v34, 0.0  ;;  %v2670_v3 = vmax.f32 %v2638_v43, 0.0  ;;  %v2671_v5 = vmax.f32 %v2639_v40, 0.0 }
 0x29d   : > { %v2672_v31 = vmax.f32 %v2640_v47, 0.0  ;;  %v2673_v8 = vmax.f32 %v2641_v41, 0.0  ;;  %v2674_v11 = vmax.f32 %v2642_v52, 0.0  ;;  %v2675_v14 = vmax.f32 %v2643_v44, 0.0 }
 0x29e   : > { %v2676_v33 = vmax.f32 %v2644_v57, 0.0  ;;  %v2677_v17 = vmax.f32 %v2645_v46, 0.0  ;;  %v2678_v20 = vmax.f32 %v2646_v48, 0.0  ;;  %v2679_v23 = vmax.f32 %v2647_v51, 0.0  ;;  %2700 = vst [vmem:[%s4372_s6] sm:$0xff] %v2668_v50  ;;  %2701 = vst [vmem:[%s4372_s6 + $0x8] sm:$0xff] %v2669_v61 }
 0x29f   : > { %2702 = vst [vmem:[%s4372_s6 + $0x10] sm:$0xff] %v2670_v3  ;;  %2703 = vst [vmem:[%s4372_s6 + $0x18] sm:$0xff] %v2671_v5  ;;  %v2680_v26 = vmax.f32 %v2648_v7, 0.0  ;;  %v2681_v29 = vmax.f32 %v2649_v54, 0.0  ;;  %v2682_v36 = vmax.f32 %v2650_v15, 0.0  ;;  %v2683_v2 = vmax.f32 %v2651_v55, 0.0 }
 0x2a0   : > { %2704 = vst [vmem:[%s4372_s6 + $0x20] sm:$0xff] %v2672_v31  ;;  %2705 = vst [vmem:[%s4372_s6 + $0x28] sm:$0xff] %v2673_v8  ;;  %v2684_v6 = vmax.f32 %v4340_v22, 0.0  ;;  %v2685_v32 = vmax.f32 %v4342_v0, 0.0  ;;  %v2686_v35 = vmax.f32 %v4344_v56, 0.0  ;;  %v2687_v37 = vmax.f32 %v4346_v58, 0.0 }
 0x2a1   : > { %2706 = vst [vmem:[%s4372_s6 + $0x30] sm:$0xff] %v2674_v11  ;;  %2707 = vst [vmem:[%s4372_s6 + $0x38] sm:$0xff] %v2675_v14  ;;  %v2688_v42 = vmax.f32 %v4348_v60, 0.0  ;;  %v2689_v45 = vmax.f32 %v4350_v62, 0.0  ;;  %v2690_v49 = vmax.f32 %v4352_v4, 0.0  ;;  %v2691_v53 = vmax.f32 %v4354_v9, 0.0 }
 0x2a2   : > { %2708 = vst [vmem:[%s4372_s6 + $0x40] sm:$0xff] %v2676_v33  ;;  %2709 = vst [vmem:[%s4372_s6 + $0x48] sm:$0xff] %v2677_v17  ;;  %v2692_v59 = vmax.f32 %v4356_v12, 0.0  ;;  %v2693_v63 = vmax.f32 %v4358_v13, 0.0  ;;  %v2694_v10 = vmax.f32 %v4360_v18, 0.0  ;;  %v2695_v38 = vmax.f32 %v4362_v19, 0.0 }
 0x2a3   : > { %2710 = vst [vmem:[%s4372_s6 + $0x50] sm:$0xff] %v2678_v20  ;;  %2711 = vst [vmem:[%s4372_s6 + $0x58] sm:$0xff] %v2679_v23  ;;  %v2696_v16 = vmax.f32 %v4364_v21, 0.0  ;;  %v2697_v25 = vmax.f32 %v4366_v24, 0.0  ;;  %v2698_v1 = vmax.f32 %v4368_v27, 0.0  ;;  %v2699_v30 = vmax.f32 %v4370_v28, 0.0 }
 0x2a4   : > { %2712 = vst [vmem:[%s4372_s6 + $0x60] sm:$0xff] %v2680_v26  ;;  %2713 = vst [vmem:[%s4372_s6 + $0x68] sm:$0xff] %v2681_v29 }
 0x2a5   : > { %2714 = vst [vmem:[%s4372_s6 + $0x70] sm:$0xff] %v2682_v36  ;;  %2715 = vst [vmem:[%s4372_s6 + $0x78] sm:$0xff] %v2683_v2 }
 0x2a6   : > { %2716 = vst [vmem:[%s4372_s6 + $0x80] sm:$0xff] %v2684_v6  ;;  %2717 = vst [vmem:[%s4372_s6 + $0x88] sm:$0xff] %v2685_v32 }
 0x2a7   : > { %2718 = vst [vmem:[%s4372_s6 + $0x90] sm:$0xff] %v2686_v35  ;;  %2719 = vst [vmem:[%s4372_s6 + $0x98] sm:$0xff] %v2687_v37 }
 0x2a8   : > { %2720 = vst [vmem:[%s4372_s6 + $0xa0] sm:$0xff] %v2688_v42  ;;  %2721 = vst [vmem:[%s4372_s6 + $0xa8] sm:$0xff] %v2689_v45 }
 0x2a9   : > { %2722 = vst [vmem:[%s4372_s6 + $0xb0] sm:$0xff] %v2690_v49  ;;  %2723 = vst [vmem:[%s4372_s6 + $0xb8] sm:$0xff] %v2691_v53 }
 0x2aa   : > { %2724 = vst [vmem:[%s4372_s6 + $0xc0] sm:$0xff] %v2692_v59  ;;  %2725 = vst [vmem:[%s4372_s6 + $0xc8] sm:$0xff] %v2693_v63 }
 0x2ab   : > { %2726 = vst [vmem:[%s4372_s6 + $0xd0] sm:$0xff] %v2694_v10  ;;  %2727 = vst [vmem:[%s4372_s6 + $0xd8] sm:$0xff] %v2695_v38 }
 0x2ac   : > { %2728 = vst [vmem:[%s4372_s6 + $0xe0] sm:$0xff] %v2696_v16  ;;  %2729 = vst [vmem:[%s4372_s6 + $0xe8] sm:$0xff] %v2697_v25 }
 0x2ad   : > { %2730 = vst [vmem:[%s4372_s6 + $0xf0] sm:$0xff] %v2698_v1  ;;  %2731 = vst [vmem:[%s4372_s6 + $0xf8] sm:$0xff] %v2699_v30 }
 0x2ae   : > { %3390 = shalt.err (!%p3387_p7)
}
 0x2af   : > { %s3391_s22 = scalar_lea.hbm %s4403_s11, 4096  ;;  %s3395_s29 = scalar_lea.hbm %s4476_s4, 16384 }
 0x2b0   : > { %p3392_p9 = scmp.ne.s32.totalorder %s4403_s11, %s3391_s22  ;;  %p3396_p12 = scmp.lt.u32.totalorder %s4403_s11, %s4476_s4 }
 0x2b1   : > { %p3397_p13 = scmp.lt.u32.totalorder %s3395_s29, %s3391_s22  ;;  %p3399_p1 = scmp.lt.u32.totalorder %s3391_s22, %s4403_s11 }
 0x2b2   : > { %p3393_p10 = pnand %p3392_p9, %p3510_p6 }
 0x2b3   : > { %p3398_p0 = por %p3397_p13, %p3396_p12 }
 0x2b4   : > { %p3394_p11 = pneg %p3393_p10 }
 0x2b5   : > { %p3400_p2 = por %p3399_p1, %p3398_p0 }
 0x2b7   : > { %p3401_p3 = pnand %p3400_p2, %p3394_p11 }
 0x2b9   : > { %3404 = shalt.err (!%p3401_p3)
}
 0x2ba   : > { %s3443_s6 = smov 256   ;;  %s3444_s7 = smov 1024  }
 0x2bb   : > { %s3445_s19 = smov 16  }
 0x2bc   : > { %3138 = dma.vmem_to_hbm [thread:$0]  (%p3510_p6), %s4413_s9, 4096, %s4403_s11, %s2733_s12, %s3443_s6, %s3444_s7, %s3445_s19  }
 0x2bd PF: > { %p3144_p4 = scmp.ge.s32.totalorder %s3439_s18, 2  ;;  %s2761_s10 = sand.u32 1, %s3427_s15  }
 0x2be   : > { %s2762_s13 = scalar_lea.sflag [#allocation4], %s2761_s10 }
 0x2bf   : > { %p3141_p5 = pnand %p3144_p4, %p3514_p8 }
 0x2c1   : > { %3422 = dma.done.wait (!%p3141_p5), %s2762_s13, 4096  }
 0x2c2   : > { %3424 = vsyncadd (!%p3141_p5), %s2762_s13, 4294963200  ;;  %p14_p7 = scmp.ge.s32.totalorder %s3496_s21, 6   ;;  %s4479_s15 = smov %s3431_s16 }
 0x2c3   : > { %s4480_s16 = smov %s3435_s17  ;;  %s4481_s17 = smov %s3508_s24 }
 0x2c4   : > { %s4482_s18 = smov %s3496_s21  ;;  %16 = sbr.rel (!%p14_p7) target bundleno = 3 (0x3), region = 120 }
 0x2cb   :  { %2767 = vsyncpa [#allocation4], 1 }
 0x2cc   :  { %2769 = vsyncpa [#allocation4 + $0x1], 1 }

</bundles_post_ra>
